<compile_context>
chip_gen: v6e
topology: v6e:2x2x1
jax: 0.10.0
libtpu: 0.0.40
codegen_flags: <defaults>
</compile_context>

<pallas_src>
import functools
import math

import jax
import jax.numpy as jnp
from jax.experimental import pallas as pl
from jax.experimental.pallas import tpu as pltpu


def _round_up(x, m):
    return (x + m - 1) // m * m


def _pick_row_tile(ho, wo, max_rows):
    """Row-tile height th and padded output-row count.

    Guarantees th*wo % 8 == 0 (unmasked sublane stores) unless a single tile
    covers everything, and th*wo <= max_rows whenever a whole output row fits.
    Never returns an unbounded tile: awkward Ho are padded up to a multiple of
    th and the padded rows are sliced off after the kernel.
    """
    if ho * wo <= max_rows:
        return ho, ho
    g = 8 // math.gcd(wo, 8)                 # smallest th with th*wo % 8 == 0
    th = max(g, (max_rows // wo) // g * g)
    ho_pad = -(-ho // th) * th
    return th, ho_pad


def _conv_kernel(x_ref, w_ref, b_ref, o_ref, *, th, wo, hq, wq, kw, stride,
                 cin, chunks):
    """One (batch element, output-row tile) step of the conv.

    x_ref : (1, s*Hq, s*Wq, Cin)  bf16  phase-split padded image (per n)
    w_ref : (kh*kw*Cin, Coutp)    bf16  whole weight, tap-major rows
    b_ref : (1, Coutp)            f32   bias (zeros if module has no bias)
    o_ref : (1, th*Wo, Coutp)     f32   output tile (written exactly once)
    """
    t = pl.program_id(1)
    rows = th * wo
    acc = None
    for chunk in chunks:                      # static tuples of (dh, dw) taps
        slabs = []
        for dh, dw in chunk:
            r0 = (dh % stride) * hq + dh // stride + t * th   # dynamic (t only)
            c0 = (dw % stride) * wq + dw // stride            # static
            slabs.append(x_ref[0, pl.ds(r0, th), pl.ds(c0, wo), :])  # (th,wo,cin)
        xk = slabs[0] if len(slabs) == 1 else jnp.concatenate(slabs, axis=-1)
        xk = xk.reshape(rows, cin * len(chunk))               # (rows, K_chunk)
        w0 = (chunk[0][0] * kw + chunk[0][1]) * cin           # static row start
        wk = w_ref[pl.ds(w0, cin * len(chunk)), :]
        part = jnp.dot(xk, wk, preferred_element_type=jnp.float32)
        acc = part if acc is None else acc + part
    o_ref[0] = acc + b_ref[...]               # bias broadcast + single store


def meta_conv2d(x_nchw, weight_oihw, bias=None, *, stride=1, padding=0,
                max_rows=1024, k_pack_max=1024):
    """F.conv2d(x, weight, bias, stride, padding) with NCHW/OIHW layouts."""
    N, Cin, H, W = x_nchw.shape
    Cout, Cin_w, kh, kw = weight_oihw.shape
    assert Cin_w == Cin, "groups != 1 not supported"
    s, p = int(stride), int(padding)
    Ho = (H + 2 * p - kh) // s + 1
    Wo = (W + 2 * p - kw) // s + 1
    Hp, Wp = H + 2 * p, W + 2 * p
    Hq, Wq = -(-Hp // s), -(-Wp // s)          # per-phase spatial extents

    # OOB VMEM reads are unchecked on TPU -> statically prove every tap window
    # stays inside its phase slab.
    assert (kh - 1) // s + Ho <= Hq and (kw - 1) // s + Wo <= Wq

    th, Ho_pad = _pick_row_tile(Ho, Wo, max_rows)
    T = Ho_pad // th
    # Row tiles of the padded output may read past Hq inside a phase slab;
    # grow the slab so those (discarded) reads stay inside the VMEM block.
    Hq_pad = max(Hq, (kh - 1) // s + Ho_pad)

    # ---- input: NCHW -> NHWC bf16, conv zero-pad, space-to-batch phase split.
    # Phase (a, b) lives at rows [a*Hq_pad, (a+1)*Hq_pad), cols [b*Wq, (b+1)*Wq)
    # of one (s*Hq_pad, s*Wq) image per batch element (single reshape+transpose,
    # no python slice/pad/concat passes).
    xh = jnp.transpose(x_nchw, (0, 2, 3, 1)).astype(jnp.bfloat16)
    xh = jnp.pad(xh, ((0, 0), (p, p + s * Hq_pad - Hp),
                      (p, p + s * Wq - Wp), (0, 0)))
    if s == 1:
        x_arr = xh                                       # (N, Hq_pad, Wq, Cin)
    else:
        x_arr = xh.reshape(N, Hq_pad, s, Wq, s, Cin)
        x_arr = jnp.transpose(x_arr, (0, 2, 1, 4, 3, 5))
        x_arr = x_arr.reshape(N, s * Hq_pad, s * Wq, Cin)

    # ---- weight: OIHW -> (kh*kw*Cin, Coutp) bf16 (tap-major, lane-padded Cout)
    Coutp = _round_up(Cout, 128)
    w_k = jnp.transpose(weight_oihw, (2, 3, 1, 0)).reshape(kh * kw * Cin, Cout)
    w_k = jnp.pad(w_k, ((0, 0), (0, Coutp - Cout))).astype(jnp.bfloat16)

    # ---- bias (f32, lane-padded)
    if bias is None:
        b_arr = jnp.zeros((1, Coutp), jnp.float32)
    else:
        b_arr = jnp.pad(bias.astype(jnp.float32),
                        (0, Coutp - Cout)).reshape(1, Coutp)

    # ---- group the kh*kw taps into contiguous chunks so each dot's K
    # (= len(chunk)*Cin) is big enough to fill the MXU depth but VMEM-bounded.
    taps = [(dh, dw) for dh in range(kh) for dw in range(kw)]
    if kh * kw * Cin <= k_pack_max:
        chunks = (tuple(taps),)                          # one big-K dot
    elif kw * Cin <= k_pack_max:
        chunks = tuple(tuple((dh, dw) for dw in range(kw)) for dh in range(kh))
    else:
        chunks = tuple((tap,) for tap in taps)           # per-tap dots

    # ---- explicit VMEM budget (x/out double-buffered, weight/bias 1x)
    x_blk = s * Hq_pad * s * Wq * Cin * 2
    w_tot = kh * kw * Cin * Coutp * 2
    o_blk = th * Wo * Coutp * 4
    k_chunk = max(len(c) for c in chunks) * Cin
    scratch = th * Wo * k_chunk * 2 + o_blk              # packed operand + acc
    vmem_bytes = 2 * x_blk + w_tot + Coutp * 4 + 2 * o_blk + scratch
    vmem_limit = int(min(max(1.25 * vmem_bytes + (2 << 20), 16 << 20), 64 << 20))

    kernel = functools.partial(_conv_kernel, th=th, wo=Wo, hq=Hq_pad, wq=Wq,
                               kw=kw, stride=s, cin=Cin, chunks=chunks)
    out_shape = jax.ShapeDtypeStruct((N, Ho_pad * Wo, Coutp), jnp.float32)

    def call(single_buffer_resident):
        resident = (dict(pipeline_mode=pl.Buffered(1))
                    if single_buffer_resident else {})
        grid_spec = pltpu.PrefetchScalarGridSpec(
            num_scalar_prefetch=0,
            grid=(N, T),
            in_specs=[
                # phase-split image: one block per batch element (DMA'd once/n)
                pl.BlockSpec((1, s * Hq_pad, s * Wq, Cin),
                             lambda n, t: (n, 0, 0, 0)),
                # whole weight / bias: constant index -> fetched once
                pl.BlockSpec((kh * kw * Cin, Coutp), lambda n, t: (0, 0),
                             **resident),
                pl.BlockSpec((1, Coutp), lambda n, t: (0, 0), **resident),
            ],
            out_specs=pl.BlockSpec((1, th * Wo, Coutp),
                                   lambda n, t: (n, t, 0)),
        )
        return pl.pallas_call(
            kernel, out_shape=out_shape, grid_spec=grid_spec,
            compiler_params=pltpu.CompilerParams(
                dimension_semantics=("parallel", "parallel"),
                vmem_limit_bytes=vmem_limit),
        )(x_arr, w_k, b_arr)

    try:
        out = call(True)
    except Exception:   # pl.Buffered(1) unsupported on this jax/libtpu combo
        out = call(False)

    y = out[:, :Ho * Wo, :Cout].reshape(N, Ho, Wo, Cout)
    return jnp.transpose(y, (0, 3, 1, 2))                # back to NCHW


# ----------------------------- pure-JAX reference ---------------------------

def conv2d_reference(x, w, b, stride, padding):
    y = jax.lax.conv_general_dilated(
        x, w, (stride, stride), ((padding, padding), (padding, padding)),
        dimension_numbers=("NCHW", "OIHW", "NCHW"))
    if b is not None:
        y = y + b.reshape(1, -1, 1, 1)
    return y


# ----------------------------------- main ------------------------------------

if __name__ == "__main__":
    key = jax.random.PRNGKey(0)
    kx, kw_, kb, kx2, kw2, kb2 = jax.random.split(key, 6)

    # Equivalent of MetaConv2d(4, 8, kernel_size=3, stride=?, padding=?)
    N, Cin, H, W = 2, 4, 16, 16
    Cout, ksz = 8, 3
    x = jax.random.normal(kx, (N, Cin, H, W), jnp.float32)
    weight = (2.0 / (Cin * ksz * ksz)) ** 0.5 * jax.random.normal(
        kw_, (Cout, Cin, ksz, ksz), jnp.float32)
    bias = 0.1 * jax.random.normal(kb, (Cout,), jnp.float32)

    # larger-Cin conv to exercise the chunked (per-kernel-row) contraction path
    Cin2 = 128
    x2 = jax.random.normal(kx2, (N, Cin2, H, W), jnp.float32)
    weight2 = (2.0 / (Cin2 * ksz * ksz)) ** 0.5 * jax.random.normal(
        kw2, (Cout, Cin2, ksz, ksz), jnp.float32)
    bias2 = 0.1 * jax.random.normal(kb2, (Cout,), jnp.float32)

    configs = [
        # (x, weight, bias, stride, padding) -- typical MetaConv2d usages
        (x, weight, bias, 1, 1),                 # 3x3, stride 1, pad 1
        (x, weight, bias, 2, 1),                 # 3x3, stride 2, pad 1
        (x, weight[:, :, :1, :1], None, 2, 0),   # 1x1 shortcut conv, no bias
        (x2, weight2, bias2, 1, 1),              # 3x3, Cin=128 (chunked K path)
    ]
    for x_, w_, b_, s_, p_ in configs:
        out = meta_conv2d(x_, w_, b_, stride=s_, padding=p_)
        out = jax.block_until_ready(out)
        ref = conv2d_reference(x_, w_, b_, s_, p_)
        assert out.shape == ref.shape, (out.shape, ref.shape)
        max_err = float(jnp.max(jnp.abs(out - ref)))
        # bf16 MXU operands with f32 accumulation -> loosened tolerance
        assert jnp.allclose(out, ref, rtol=5e-2, atol=5e-2), max_err

    print("KERNEL_OK")
</pallas_src>

<mosaic_0001>
module attributes {stable_mosaic.version = 11 : i64} {
  func.func @_conv_kernel(%arg0: i32, %arg1: i32, %arg2: memref<1x18x18x4xbf16, #tpu.memory_space<vmem>>, %arg3: memref<36x128xbf16, #tpu.memory_space<vmem>>, %arg4: memref<1x128xf32, #tpu.memory_space<vmem>>, %arg5: memref<1x256x128xf32, #tpu.memory_space<vmem>>) attributes {dimension_semantics = [#tpu.dimension_semantics<parallel>, #tpu.dimension_semantics<parallel>], iteration_bounds = array<i64: 2, 1>, scalar_prefetch = 0 : i64, scratch_operands = 0 : i64, tpu.core_type = #tpu.core_type<tc>, window_params = [{transform_indices = @transform_0, window_bounds = array<i64: 1, 18, 18, 4>}, {pipeline_mode = #tpu.pipeline_mode<synchronous>, transform_indices = @transform_1, window_bounds = array<i64: 36, 128>}, {pipeline_mode = #tpu.pipeline_mode<synchronous>, transform_indices = @transform_2, window_bounds = array<i64: 1, 128>}, {transform_indices = @transform_3, window_bounds = array<i64: 1, 256, 128>}]} {
    %c16_i32 = arith.constant 16 : i32
    %0 = arith.muli %arg1, %c16_i32 : i32
    %c0_i32 = arith.constant 0 : i32
    %1 = arith.addi %c0_i32, %0 : i32
    %c0 = arith.constant 0 : index
    %2 = arith.index_cast %1 : i32 to index
    %c0_0 = arith.constant 0 : index
    %c0_1 = arith.constant 0 : index
    %3 = vector.load %arg2[%c0, %2, %c0_0, %c0_1] : memref<1x18x18x4xbf16, #tpu.memory_space<vmem>>, vector<1x16x16x4xbf16>
    %4 = vector.shape_cast %3 : vector<1x16x16x4xbf16> to vector<16x16x4xbf16>
    %c16_i32_2 = arith.constant 16 : i32
    %5 = arith.muli %arg1, %c16_i32_2 : i32
    %c0_i32_3 = arith.constant 0 : i32
    %6 = arith.addi %c0_i32_3, %5 : i32
    %c0_4 = arith.constant 0 : index
    %7 = arith.index_cast %6 : i32 to index
    %c1 = arith.constant 1 : index
    %c0_5 = arith.constant 0 : index
    %8 = vector.load %arg2[%c0_4, %7, %c1, %c0_5] : memref<1x18x18x4xbf16, #tpu.memory_space<vmem>>, vector<1x16x16x4xbf16>
    %9 = vector.shape_cast %8 : vector<1x16x16x4xbf16> to vector<16x16x4xbf16>
    %c16_i32_6 = arith.constant 16 : i32
    %10 = arith.muli %arg1, %c16_i32_6 : i32
    %c0_i32_7 = arith.constant 0 : i32
    %11 = arith.addi %c0_i32_7, %10 : i32
    %c0_8 = arith.constant 0 : index
    %12 = arith.index_cast %11 : i32 to index
    %c2 = arith.constant 2 : index
    %c0_9 = arith.constant 0 : index
    %13 = vector.load %arg2[%c0_8, %12, %c2, %c0_9] : memref<1x18x18x4xbf16, #tpu.memory_space<vmem>>, vector<1x16x16x4xbf16>
    %14 = vector.shape_cast %13 : vector<1x16x16x4xbf16> to vector<16x16x4xbf16>
    %c16_i32_10 = arith.constant 16 : i32
    %15 = arith.muli %arg1, %c16_i32_10 : i32
    %c1_i32 = arith.constant 1 : i32
    %16 = arith.addi %c1_i32, %15 : i32
    %c0_11 = arith.constant 0 : index
    %17 = arith.index_cast %16 : i32 to index
    %c0_12 = arith.constant 0 : index
    %c0_13 = arith.constant 0 : index
    %18 = vector.load %arg2[%c0_11, %17, %c0_12, %c0_13] : memref<1x18x18x4xbf16, #tpu.memory_space<vmem>>, vector<1x16x16x4xbf16>
    %19 = vector.shape_cast %18 : vector<1x16x16x4xbf16> to vector<16x16x4xbf16>
    %c16_i32_14 = arith.constant 16 : i32
    %20 = arith.muli %arg1, %c16_i32_14 : i32
    %c1_i32_15 = arith.constant 1 : i32
    %21 = arith.addi %c1_i32_15, %20 : i32
    %c0_16 = arith.constant 0 : index
    %22 = arith.index_cast %21 : i32 to index
    %c1_17 = arith.constant 1 : index
    %c0_18 = arith.constant 0 : index
    %23 = vector.load %arg2[%c0_16, %22, %c1_17, %c0_18] : memref<1x18x18x4xbf16, #tpu.memory_space<vmem>>, vector<1x16x16x4xbf16>
    %24 = vector.shape_cast %23 : vector<1x16x16x4xbf16> to vector<16x16x4xbf16>
    %c16_i32_19 = arith.constant 16 : i32
    %25 = arith.muli %arg1, %c16_i32_19 : i32
    %c1_i32_20 = arith.constant 1 : i32
    %26 = arith.addi %c1_i32_20, %25 : i32
    %c0_21 = arith.constant 0 : index
    %27 = arith.index_cast %26 : i32 to index
    %c2_22 = arith.constant 2 : index
    %c0_23 = arith.constant 0 : index
    %28 = vector.load %arg2[%c0_21, %27, %c2_22, %c0_23] : memref<1x18x18x4xbf16, #tpu.memory_space<vmem>>, vector<1x16x16x4xbf16>
    %29 = vector.shape_cast %28 : vector<1x16x16x4xbf16> to vector<16x16x4xbf16>
    %c16_i32_24 = arith.constant 16 : i32
    %30 = arith.muli %arg1, %c16_i32_24 : i32
    %c2_i32 = arith.constant 2 : i32
    %31 = arith.addi %c2_i32, %30 : i32
    %c0_25 = arith.constant 0 : index
    %32 = arith.index_cast %31 : i32 to index
    %c0_26 = arith.constant 0 : index
    %c0_27 = arith.constant 0 : index
    %33 = vector.load %arg2[%c0_25, %32, %c0_26, %c0_27] : memref<1x18x18x4xbf16, #tpu.memory_space<vmem>>, vector<1x16x16x4xbf16>
    %34 = vector.shape_cast %33 : vector<1x16x16x4xbf16> to vector<16x16x4xbf16>
    %c16_i32_28 = arith.constant 16 : i32
    %35 = arith.muli %arg1, %c16_i32_28 : i32
    %c2_i32_29 = arith.constant 2 : i32
    %36 = arith.addi %c2_i32_29, %35 : i32
    %c0_30 = arith.constant 0 : index
    %37 = arith.index_cast %36 : i32 to index
    %c1_31 = arith.constant 1 : index
    %c0_32 = arith.constant 0 : index
    %38 = vector.load %arg2[%c0_30, %37, %c1_31, %c0_32] : memref<1x18x18x4xbf16, #tpu.memory_space<vmem>>, vector<1x16x16x4xbf16>
    %39 = vector.shape_cast %38 : vector<1x16x16x4xbf16> to vector<16x16x4xbf16>
    %c16_i32_33 = arith.constant 16 : i32
    %40 = arith.muli %arg1, %c16_i32_33 : i32
    %c2_i32_34 = arith.constant 2 : i32
    %41 = arith.addi %c2_i32_34, %40 : i32
    %c0_35 = arith.constant 0 : index
    %42 = arith.index_cast %41 : i32 to index
    %c2_36 = arith.constant 2 : index
    %c0_37 = arith.constant 0 : index
    %43 = vector.load %arg2[%c0_35, %42, %c2_36, %c0_37] : memref<1x18x18x4xbf16, #tpu.memory_space<vmem>>, vector<1x16x16x4xbf16>
    %44 = vector.shape_cast %43 : vector<1x16x16x4xbf16> to vector<16x16x4xbf16>
    %45 = tpu.concatenate %4, %9, %14, %19, %24, %29, %34, %39, %44 in 2 : vector<16x16x4xbf16>, vector<16x16x4xbf16>, vector<16x16x4xbf16>, vector<16x16x4xbf16>, vector<16x16x4xbf16>, vector<16x16x4xbf16>, vector<16x16x4xbf16>, vector<16x16x4xbf16>, vector<16x16x4xbf16> -> vector<16x16x36xbf16>
    %46 = vector.shape_cast %45 : vector<16x16x36xbf16> to vector<256x36xbf16>
    %c0_38 = arith.constant 0 : index
    %c0_39 = arith.constant 0 : index
    %47 = vector.load %arg3[%c0_38, %c0_39] : memref<36x128xbf16, #tpu.memory_space<vmem>>, vector<36x128xbf16>
    %cst = arith.constant dense<0.000000e+00> : vector<256x128xf32>
    %48 = tpu.matmul %46, %47, %cst {dimension_numbers = #tpu.dot_dimension_numbers<[1], [0], [0], [1], [0, 0, 1, 1], [], []>} : vector<256x36xbf16>, vector<36x128xbf16>, vector<256x128xf32> -> vector<256x128xf32>
    %c0_40 = arith.constant 0 : index
    %c0_41 = arith.constant 0 : index
    %49 = vector.load %arg4[%c0_40, %c0_41] : memref<1x128xf32, #tpu.memory_space<vmem>>, vector<1x128xf32>
    %50 = vector.broadcast %49 : vector<1x128xf32> to vector<256x128xf32>
    %51 = arith.addf %48, %50 : vector<256x128xf32>
    %c0_42 = arith.constant 0 : index
    %c0_43 = arith.constant 0 : index
    %c0_44 = arith.constant 0 : index
    %52 = vector.load %arg5[%c0_42, %c0_43, %c0_44] : memref<1x256x128xf32, #tpu.memory_space<vmem>>, vector<1x256x128xf32>
    %53 = vector.shape_cast %52 : vector<1x256x128xf32> to vector<256x128xf32>
    %54 = vector.shape_cast %51 : vector<256x128xf32> to vector<1x256x128xf32>
    tpu.vector_store %arg5[%c0_42, %c0_43, %c0_44], %54 {strides = array<i32>} : memref<1x256x128xf32, #tpu.memory_space<vmem>>, vector<1x256x128xf32>,
    return
  }
  func.func @transform_0(%arg0: i32, %arg1: i32) -> (i32, i32, i32, i32) {
    %c0_i32 = arith.constant 0 : i32
    %c0_i32_0 = arith.constant 0 : i32
    %c0_i32_1 = arith.constant 0 : i32
    %c0_i32_2 = arith.constant 0 : i32
    return %arg0, %c0_i32, %c0_i32_0, %c0_i32_1 : i32, i32, i32, i32
  }
  func.func @transform_1(%arg0: i32, %arg1: i32) -> (i32, i32) {
    %c0_i32 = arith.constant 0 : i32
    %c0_i32_0 = arith.constant 0 : i32
    %c0_i32_1 = arith.constant 0 : i32
    return %c0_i32, %c0_i32_0 : i32, i32
  }
  func.func @transform_2(%arg0: i32, %arg1: i32) -> (i32, i32) {
    %c0_i32 = arith.constant 0 : i32
    %c0_i32_0 = arith.constant 0 : i32
    %c0_i32_1 = arith.constant 0 : i32
    return %c0_i32, %c0_i32_0 : i32, i32
  }
  func.func @transform_3(%arg0: i32, %arg1: i32) -> (i32, i32, i32) {
    %c0_i32 = arith.constant 0 : i32
    %c0_i32_0 = arith.constant 0 : i32
    return %arg0, %arg1, %c0_i32 : i32, i32, i32
  }
}

module attributes {stable_mosaic.version = 11 : i64} {
  func.func @_conv_kernel(%arg0: i32, %arg1: i32, %arg2: memref<1x18x18x4xbf16, #tpu.memory_space<vmem>>, %arg3: memref<36x128xbf16, #tpu.memory_space<vmem>>, %arg4: memref<1x128xf32, #tpu.memory_space<vmem>>, %arg5: memref<1x256x128xf32, #tpu.memory_space<vmem>>) attributes {dimension_semantics = [#tpu.dimension_semantics<parallel>, #tpu.dimension_semantics<parallel>], iteration_bounds = array<i64: 2, 1>, scalar_prefetch = 0 : i64, scratch_operands = 0 : i64, tpu.core_type = #tpu.core_type<tc>, window_params = [{transform_indices = @transform_0, window_bounds = array<i64: 1, 18, 18, 4>}, {pipeline_mode = #tpu.pipeline_mode<synchronous>, transform_indices = @transform_1, window_bounds = array<i64: 36, 128>}, {pipeline_mode = #tpu.pipeline_mode<synchronous>, transform_indices = @transform_2, window_bounds = array<i64: 1, 128>}, {transform_indices = @transform_3, window_bounds = array<i64: 1, 256, 128>}]} {
    %c16_i32 = arith.constant 16 : i32
    %0 = arith.muli %arg1, %c16_i32 : i32
    %c0_i32 = arith.constant 0 : i32
    %1 = arith.addi %c0_i32, %0 : i32
    %c0 = arith.constant 0 : index
    %2 = arith.index_cast %1 : i32 to index
    %c0_0 = arith.constant 0 : index
    %c0_1 = arith.constant 0 : index
    %3 = vector.load %arg2[%c0, %2, %c0_0, %c0_1] : memref<1x18x18x4xbf16, #tpu.memory_space<vmem>>, vector<1x16x16x4xbf16>
    %4 = vector.shape_cast %3 : vector<1x16x16x4xbf16> to vector<16x16x4xbf16>
    %c16_i32_2 = arith.constant 16 : i32
    %5 = arith.muli %arg1, %c16_i32_2 : i32
    %c0_i32_3 = arith.constant 0 : i32
    %6 = arith.addi %c0_i32_3, %5 : i32
    %c0_4 = arith.constant 0 : index
    %7 = arith.index_cast %6 : i32 to index
    %c1 = arith.constant 1 : index
    %c0_5 = arith.constant 0 : index
    %8 = vector.load %arg2[%c0_4, %7, %c1, %c0_5] : memref<1x18x18x4xbf16, #tpu.memory_space<vmem>>, vector<1x16x16x4xbf16>
    %9 = vector.shape_cast %8 : vector<1x16x16x4xbf16> to vector<16x16x4xbf16>
    %c16_i32_6 = arith.constant 16 : i32
    %10 = arith.muli %arg1, %c16_i32_6 : i32
    %c0_i32_7 = arith.constant 0 : i32
    %11 = arith.addi %c0_i32_7, %10 : i32
    %c0_8 = arith.constant 0 : index
    %12 = arith.index_cast %11 : i32 to index
    %c2 = arith.constant 2 : index
    %c0_9 = arith.constant 0 : index
    %13 = vector.load %arg2[%c0_8, %12, %c2, %c0_9] : memref<1x18x18x4xbf16, #tpu.memory_space<vmem>>, vector<1x16x16x4xbf16>
    %14 = vector.shape_cast %13 : vector<1x16x16x4xbf16> to vector<16x16x4xbf16>
    %c16_i32_10 = arith.constant 16 : i32
    %15 = arith.muli %arg1, %c16_i32_10 : i32
    %c1_i32 = arith.constant 1 : i32
    %16 = arith.addi %c1_i32, %15 : i32
    %c0_11 = arith.constant 0 : index
    %17 = arith.index_cast %16 : i32 to index
    %c0_12 = arith.constant 0 : index
    %c0_13 = arith.constant 0 : index
    %18 = vector.load %arg2[%c0_11, %17, %c0_12, %c0_13] : memref<1x18x18x4xbf16, #tpu.memory_space<vmem>>, vector<1x16x16x4xbf16>
    %19 = vector.shape_cast %18 : vector<1x16x16x4xbf16> to vector<16x16x4xbf16>
    %c16_i32_14 = arith.constant 16 : i32
    %20 = arith.muli %arg1, %c16_i32_14 : i32
    %c1_i32_15 = arith.constant 1 : i32
    %21 = arith.addi %c1_i32_15, %20 : i32
    %c0_16 = arith.constant 0 : index
    %22 = arith.index_cast %21 : i32 to index
    %c1_17 = arith.constant 1 : index
    %c0_18 = arith.constant 0 : index
    %23 = vector.load %arg2[%c0_16, %22, %c1_17, %c0_18] : memref<1x18x18x4xbf16, #tpu.memory_space<vmem>>, vector<1x16x16x4xbf16>
    %24 = vector.shape_cast %23 : vector<1x16x16x4xbf16> to vector<16x16x4xbf16>
    %c16_i32_19 = arith.constant 16 : i32
    %25 = arith.muli %arg1, %c16_i32_19 : i32
    %c1_i32_20 = arith.constant 1 : i32
    %26 = arith.addi %c1_i32_20, %25 : i32
    %c0_21 = arith.constant 0 : index
    %27 = arith.index_cast %26 : i32 to index
    %c2_22 = arith.constant 2 : index
    %c0_23 = arith.constant 0 : index
    %28 = vector.load %arg2[%c0_21, %27, %c2_22, %c0_23] : memref<1x18x18x4xbf16, #tpu.memory_space<vmem>>, vector<1x16x16x4xbf16>
    %29 = vector.shape_cast %28 : vector<1x16x16x4xbf16> to vector<16x16x4xbf16>
    %c16_i32_24 = arith.constant 16 : i32
    %30 = arith.muli %arg1, %c16_i32_24 : i32
    %c2_i32 = arith.constant 2 : i32
    %31 = arith.addi %c2_i32, %30 : i32
    %c0_25 = arith.constant 0 : index
    %32 = arith.index_cast %31 : i32 to index
    %c0_26 = arith.constant 0 : index
    %c0_27 = arith.constant 0 : index
    %33 = vector.load %arg2[%c0_25, %32, %c0_26, %c0_27] : memref<1x18x18x4xbf16, #tpu.memory_space<vmem>>, vector<1x16x16x4xbf16>
    %34 = vector.shape_cast %33 : vector<1x16x16x4xbf16> to vector<16x16x4xbf16>
    %c16_i32_28 = arith.constant 16 : i32
    %35 = arith.muli %arg1, %c16_i32_28 : i32
    %c2_i32_29 = arith.constant 2 : i32
    %36 = arith.addi %c2_i32_29, %35 : i32
    %c0_30 = arith.constant 0 : index
    %37 = arith.index_cast %36 : i32 to index
    %c1_31 = arith.constant 1 : index
    %c0_32 = arith.constant 0 : index
    %38 = vector.load %arg2[%c0_30, %37, %c1_31, %c0_32] : memref<1x18x18x4xbf16, #tpu.memory_space<vmem>>, vector<1x16x16x4xbf16>
    %39 = vector.shape_cast %38 : vector<1x16x16x4xbf16> to vector<16x16x4xbf16>
    %c16_i32_33 = arith.constant 16 : i32
    %40 = arith.muli %arg1, %c16_i32_33 : i32
    %c2_i32_34 = arith.constant 2 : i32
    %41 = arith.addi %c2_i32_34, %40 : i32
    %c0_35 = arith.constant 0 : index
    %42 = arith.index_cast %41 : i32 to index
    %c2_36 = arith.constant 2 : index
    %c0_37 = arith.constant 0 : index
    %43 = vector.load %arg2[%c0_35, %42, %c2_36, %c0_37] : memref<1x18x18x4xbf16, #tpu.memory_space<vmem>>, vector<1x16x16x4xbf16>
    %44 = vector.shape_cast %43 : vector<1x16x16x4xbf16> to vector<16x16x4xbf16>
    %45 = tpu.concatenate %4, %9, %14, %19, %24, %29, %34, %39, %44 in 2 : vector<16x16x4xbf16>, vector<16x16x4xbf16>, vector<16x16x4xbf16>, vector<16x16x4xbf16>, vector<16x16x4xbf16>, vector<16x16x4xbf16>, vector<16x16x4xbf16>, vector<16x16x4xbf16>, vector<16x16x4xbf16> -> vector<16x16x36xbf16>
    %46 = vector.shape_cast %45 : vector<16x16x36xbf16> to vector<256x36xbf16>
    %c0_38 = arith.constant 0 : index
    %c0_39 = arith.constant 0 : index
    %47 = vector.load %arg3[%c0_38, %c0_39] : memref<36x128xbf16, #tpu.memory_space<vmem>>, vector<36x128xbf16>
    %cst = arith.constant dense<0.000000e+00> : vector<256x128xf32>
    %48 = tpu.matmul %46, %47, %cst {dimension_numbers = #tpu.dot_dimension_numbers<[1], [0], [0], [1], [0, 0, 1, 1], [], []>} : vector<256x36xbf16>, vector<36x128xbf16>, vector<256x128xf32> -> vector<256x128xf32>
    %c0_40 = arith.constant 0 : index
    %c0_41 = arith.constant 0 : index
    %49 = vector.load %arg4[%c0_40, %c0_41] : memref<1x128xf32, #tpu.memory_space<vmem>>, vector<1x128xf32>
    %50 = vector.broadcast %49 : vector<1x128xf32> to vector<256x128xf32>
    %51 = arith.addf %48, %50 : vector<256x128xf32>
    %c0_42 = arith.constant 0 : index
    %c0_43 = arith.constant 0 : index
    %c0_44 = arith.constant 0 : index
    %52 = vector.load %arg5[%c0_42, %c0_43, %c0_44] : memref<1x256x128xf32, #tpu.memory_space<vmem>>, vector<1x256x128xf32>
    %53 = vector.shape_cast %52 : vector<1x256x128xf32> to vector<256x128xf32>
    %54 = vector.shape_cast %51 : vector<256x128xf32> to vector<1x256x128xf32>
    tpu.vector_store %arg5[%c0_42, %c0_43, %c0_44], %54 {strides = array<i32>} : memref<1x256x128xf32, #tpu.memory_space<vmem>>, vector<1x256x128xf32>,
    return
  }
  func.func @transform_0(%arg0: i32, %arg1: i32) -> (i32, i32, i32, i32) {
    %c0_i32 = arith.constant 0 : i32
    %c0_i32_0 = arith.constant 0 : i32
    %c0_i32_1 = arith.constant 0 : i32
    %c0_i32_2 = arith.constant 0 : i32
    return %arg0, %c0_i32, %c0_i32_0, %c0_i32_1 : i32, i32, i32, i32
  }
  func.func @transform_1(%arg0: i32, %arg1: i32) -> (i32, i32) {
    %c0_i32 = arith.constant 0 : i32
    %c0_i32_0 = arith.constant 0 : i32
    %c0_i32_1 = arith.constant 0 : i32
    return %c0_i32, %c0_i32_0 : i32, i32
  }
  func.func @transform_2(%arg0: i32, %arg1: i32) -> (i32, i32) {
    %c0_i32 = arith.constant 0 : i32
    %c0_i32_0 = arith.constant 0 : i32
    %c0_i32_1 = arith.constant 0 : i32
    return %c0_i32, %c0_i32_0 : i32, i32
  }
  func.func @transform_3(%arg0: i32, %arg1: i32) -> (i32, i32, i32) {
    %c0_i32 = arith.constant 0 : i32
    %c0_i32_0 = arith.constant 0 : i32
    return %arg0, %arg1, %c0_i32 : i32, i32, i32
  }
}

</mosaic_0001>

<bundles_post_ra>
// kernel: tpu_custom_call.1
= control target key start
LH: loop header
LB: loop body
LE: loop exit
PB: predicated region body
PF: predicated region fallthrough
CT: control target
= control target key end

     0   :  { %8 = vsyncpa [#allocation3], 0  ;;  %s4612_s0 = inlined_call_operand.vmem [shape: bf16[2,18,18,4], index: 0, kind: input, shape index: {}]   ;;  %s4613_s1 = inlined_call_operand.vmem [shape: bf16[36,128], index: 1, kind: input, shape index: {}]   ;;  %s4614_s2 = inlined_call_operand.vmem [shape: f32[1,128], index: 2, kind: input, shape index: {}]   ;;  %s4615_s3 = inlined_call_operand.hbm [shape: f32[2,256,128], index: 3, kind: output, shape index: {}]  }
   0x1   :  { %10 = vsyncpa [#allocation3 + $0x1], 0  ;;  %s3205_s12 = smov 0   ;;  %s3207_s13 = smov 0  }
   0x2   :  { %s3209_s14 = smov 0   ;;  %s3211_s15 = smov 0  }
   0x3   :  { %s3213_s16 = smov 0   ;;  %s3215_s17 = smov 0  }
   0x4 LB: > { %s2515_s18 = sadd.s32 4294967295, %s3173_s17   ;;  %s2516_s19 = sadd.s32 4294967294, %s3173_s17   ;;  %s3173_s17 = sphi %s3215_s17, %s16_s17   ;;  %s3169_s16 = sphi %s3213_s16, %s4637_s16   ;;  %s3165_s15 = sphi %s3211_s15, %s4636_s15   ;;  %s3161_s14 = sphi %s3209_s14, %s4635_s14   ;;  %s3157_s13 = sphi %s3207_s13, %s4634_s13   ;;  %s3153_s12 = sphi %s3205_s12, %s4633_s12  }
   0x5   : > { %s28_s20 = sadd.s32 1, %s3169_s16  ;;  %s105_s21 = sadd.s32 1, %s3161_s14 }
   0x6   : > { %p30_p0 = scmp.ge.s32.totalorder %s28_s20, 2  ;;  %p115_p1 = scmp.ne.s32.totalorder %s3161_s14, %s3157_s13 }
   0x7   : > { %p116_p2 = scmp.eq.s32.totalorder %s2515_s18, 1  ;;  %p121_p3 = scmp.ne.s32.totalorder %s3157_s13, %s3153_s12 }
   0x8   : > { %s4639_s20 = smov (%p30_p0, %s28_s20), 0  ;;  %p122_p5 = scmp.eq.s32.totalorder %s2516_s19, 1 }
   0x9   : > { %p3245_p4 = por %p116_p2, %p115_p1  ;;  %s100_s23 = ssub.s32 %s3169_s16, %s4639_s20 }
   0xa   : > { %p2519_p6 = scmp.ge.s32.totalorder %s3173_s17, 1  ;;  %p103_p7 = scmp.eq.s32.totalorder %s100_s23, 0 }
   0xb   : > { %p3252_p8 = por %p122_p5, %p121_p3  ;;  %p154_p9 = scmp.lt.s32.totalorder %s3173_s17, 3 }
   0xc   : > { %s3258_s25 = scalar_select %p103_p7, %s3161_s14, %s105_s21  }
   0xd   : > { %p155_p10 = pnand %p2519_p6, %p154_p9 }
   0xf   : > { %158 = sbr.rel (%p155_p10) target bundleno = 616 (0x268), region = 32 }
  0x14   : > { %p178_p11 = scmp.lt.s32.totalorder %s3165_s15, 1  ;;  %s3175_s4 = smov 12   ;;  %vm790_vm0 = vcmask 1046528   ;;  %vm517_vm1 = vsmask.f32 7424  ;;  %vm2219_vm2 = vcmask 1041408  }
  0x15   : > { %s3176_s5 = smov 8   ;;  %s3177_s6 = smov 4   ;;  %vm1895_vm3 = vcmask 31744   ;;  %vm1928_vm4 = vcmask 64512   ;;  %vm1961_vm5 = vcmask 97280   ;;  %vm1994_vm6 = vcmask 130048  }
  0x16   : > { %s179_s26 = scalar_select %p178_p11, %s3165_s15, 1  ;;  %vm2027_vm7 = vcmask 162816   ;;  %vm2060_vm8 = vcmask 195584   ;;  %vm2093_vm9 = vcmask 228352   ;;  %vm2126_vm10 = vcmask 261120  }
  0x17   : > { %s3178_s7 = smov 16   ;;  %s3179_s8 = smov 20   ;;  %vm2186_vm11 = vcmask 293888  }
  0x18   : > { %s2885_s27 = smul.u32 216, %s179_s26  ;;  %s3180_s9 = smov 24  }
  0x19   : > { %s3181_s10 = smov 28   ;;  %s3182_s11 = smov 32  }
  0x1a   : > { %s3265_s30 = scalar_lea.vmem %s4612_s0, %s2885_s27  ;;  %s175_s28 = sand.u32 1, %s3157_s13  }
  0x1b   : > { %v2538_v0 = vld [vmem:[%s3265_s30 + $0x6c] sm:$0xf]  ;;  %v3269_v1 = vld [vmem:[%s3265_s30 + $0x70] sm:$0xf]  ;;  %v206_v6 = vld [vmem:[%s3265_s30 + $0x64] sm:$0xf] }
  0x1c   : > { %v3272_v2 = vcombine.low %v2538_v0, %v3269_v1  ;;  %v2522_v3 = vld [vmem:[%s3265_s30 + $0xc] sm:$0xf]  ;;  %v3276_v4 = vld [vmem:[%s3265_s30 + $0x10] sm:$0xf]  ;;  %v245_v7 = vld [vmem:[%s3265_s30 + $0x60] sm:$0xe] }
  0x1d   : > { %v3279_v5 = vcombine.low %v2522_v3, %v3276_v4  ;;  %v3286_v8 = vld [vmem:[%s3265_s30 + $0x68] ss:$0 sps:$4 sm:$0x11]   ;;  %v2690_v9 = vcombine.low %v245_v7, %v206_v6  ;;  %v205_v10 = vld [vmem:[%s3265_s30 + $0x60] sm:$0xf]  ;;  %s2520_s29 = sshll.u32 %s175_s28, 8 }
  0x1e   : > { %967 = vrot.lane.b32.xlu1 %v3272_v2, %s3175_s4  ;;  %v1130_v11 = vshll.u32 %v3272_v2, 16  ;;  %v190_v12 = vld [vmem:[%s3265_s30 + $0x4] sm:$0xf]  ;;  %v816_v14 = vrot.slane %v3286_v8, 1  ;;  %v237_v15 = vld [vmem:[%s3265_s30] sm:$0xe]  ;;  %v3297_v18 = vcombine.low %v205_v10, %v206_v6 }
  0x1f   : > { %951 = vrot.lane.b32.xlu0 %v3279_v5, %s3175_s4  ;;  %v815_v13 = vrot.slane %v2690_v9, 1  ;;  %v189_v16 = vld [vmem:[%s3265_s30] sm:$0xf]  ;;  %v1034_v17 = vshll.u32 %v3279_v5, 16  ;;  %v2682_v20 = vcombine.low %v237_v15, %v190_v12  ;;  %v207_v21 = vld [vmem:[%s3265_s30 + $0x6c] sm:$0xf] }
  0x20   : > { %v2957_v19 = vld [vmem:[%s3265_s30 + $0x8] ss:$0 sps:$4 sm:$0x11]   ;;  %v3302_v23 = vcombine.low %v189_v16, %v190_v12  ;;  %v208_v24 = vld [vmem:[%s3265_s30 + $0x70] sm:$0xf]  ;;  %v615_v30 = vshrl.u32 %v3297_v18, 16 }
  0x21   : > { %v817_v22 = vsel %vm790_vm0, %v815_v13, %v816_v14  ;;  %v246_v25 = vld [vmem:[%s3265_s30 + $0x6c] sm:$0xe]  ;;  %v791_v26 = vrot.slane %v2682_v20, 1  ;;  %v792_v27 = vrot.slane %v2957_v19, 1  ;;  %v3309_v31 = vcombine.low %v207_v21, %v208_v24  ;;  %v192_v33 = vld [vmem:[%s3265_s30 + $0x10] sm:$0xf] }
  0x22   : > { %855 = vrot.lane.b32.xlu1 %v817_v22, %s3176_s5  ;;  %v2961_v28 = vld [vmem:[%s3265_s30 + $0x74] ss:$0 sps:$4 sm:$0x11]   ;;  %v2691_v29 = vcombine.low %v246_v25, %v208_v24  ;;  %v191_v32 = vld [vmem:[%s3265_s30 + $0xc] sm:$0xf]  ;;  %v519_v41 = vshrl.u32 %v3302_v23, 16 }
  0x23   : > { %v793_v34 = vsel %vm790_vm0, %v791_v26, %v792_v27  ;;  %v819_v36 = vrot.slane %v2961_v28, 1  ;;  %v238_v37 = vld [vmem:[%s3265_s30 + $0xc] sm:$0xe]  ;;  %v3315_v38 = vcombine.low %v191_v32, %v192_v33  ;;  %v2964_v39 = vld [vmem:[%s3265_s30 + $0x14] ss:$0 sps:$4 sm:$0x11]  }
  0x24   : > { %v818_v35 = vrot.slane %v2691_v29, 1  ;;  %839 = vrot.lane.b32.xlu0 %v793_v34, %s3176_s5  ;;  %v2683_v40 = vcombine.low %v238_v37, %v192_v33  ;;  %v521_v42 = vshll.u32 %v3302_v23, 16  ;;  %v526_v43 = vshll.u32 %v2957_v19, 16  ;;  %v2540_v52 = vld [vmem:[%s3265_s30 + $0x78] sm:$0xf]  ;;  %s3183_s19 = smov [#allocation2]  }
  0x25   : > { %v531_v45 = vshrl.u32 %v3315_v38, 16  ;;  %v533_v46 = vshll.u32 %v3315_v38, 16  ;;  %v627_v47 = vshrl.u32 %v3309_v31, 16  ;;  %v795_v49 = vrot.slane %v2964_v39, 1  ;;  %v3329_v57 = vld [vmem:[%s3265_s30 + $0x7c] sm:$0xf] }
  0x26   : > { %v820_v44 = vsel %vm790_vm0, %v818_v35, %v819_v36  ;;  %v794_v48 = vrot.slane %v2683_v40, 1  ;;  %v538_v50 = vshll.u32 %v2964_v39, 16  ;;  %v523_v51 = vrot.slane %v521_v42, 1  ;;  %v2524_v62 = vld [vmem:[%s3265_s30 + $0x18] sm:$0xf]  ;;  %s3101_s21 = sshll.u32 %s3183_s19, 4  ;;  %s3102_s21 = int_to_ptr.vmem [resolvable:$false] %s3101_s21 }
  0x27   : > { %857 = vrot.lane.b32.xlu1 %v820_v44, %s3176_s5  ;;  %v535_v53 = vrot.slane %v533_v46, 1  ;;  %v528_v54 = vrot.slane %v526_v43, 1  ;;  %v629_v55 = vshll.u32 %v3309_v31, 16  ;;  %v634_v56 = vshll.u32 %v2961_v28, 16  ;;  %v3335_v63 = vld [vmem:[%s3265_s30 + $0x1c] sm:$0xf] }
  0x28   : > { %v796_v58 = vsel %vm790_vm0, %v794_v48, %v795_v49  ;;  %v540_v59 = vrot.slane %v538_v50, 1  ;;  %v524_v60 = vor.u32 %v523_v51, %v519_v41  ;;  %v617_v61 = vshll.u32 %v3297_v18, 16  ;;  %v3342_v13 = vld [vmem:[%s3265_s30 + $0x74] ss:$0 sps:$4 sm:$0x11]   ;;  %s3103_s23 = scalar_lea.vmem %s3102_s21, 8192 }
  0x29   : > { %841 = vrot.lane.b32.xlu0 %v796_v58, %s3176_s5  ;;  %v536_v0 = vor.u32 %v535_v53, %v531_v45  ;;  %v631_v3 = vrot.slane %v629_v55, 1  ;;  %v636_v6 = vrot.slane %v634_v56, 1  ;;  %v622_v7 = vshll.u32 %v3286_v8, 16  ;;  %v3347_v20 = vld [vmem:[%s3265_s30 + $0x14] ss:$0 sps:$4 sm:$0x11]  }
  0x2a   : > { %v529_v9 = vsel %vm517_vm1, %v524_v60, %v528_v54  ;;  %v619_v10 = vrot.slane %v617_v61, 1  ;;  %v2707_v12 = vcombine.low %v2540_v52, %v3329_v57  ;;  %v2699_v19 = vcombine.low %v2524_v62, %v3335_v63  ;;  %v3354_v24 = vld [vmem:[%s3265_s30 + $0x80] ss:$0 sps:$4 sm:$0x11]   ;;  %v2578_v35 = vld [vmem:[%s3265_s30 + $0x6c] sm:$0xe] }
  0x2b   : > { %v541_v14 = vsel %vm517_vm1, %v536_v0, %v540_v59  ;;  %v632_v15 = vor.u32 %v631_v3, %v627_v47  ;;  %v624_v16 = vrot.slane %v622_v7, 1  ;;  %v1128_v21 = vshrl.u32 %v3272_v2, 16  ;;  %v2570_v43 = vld [vmem:[%s3265_s30 + $0xc] sm:$0xe]  ;;  %v2579_v45 = vld [vmem:[%s3265_s30 + $0x78] sm:$0xe] }
  0x2c   : > { %712 = vrot.lane.b32.xlu1 %v541_v14, %s3177_s6  ;;  %v620_v8 = vor.u32 %v619_v10, %v615_v30  ;;  %v1132_v22 = vrot.slane %v1130_v11, 1  ;;  %v1142_v26 = vshll.u32 %v2707_v12, 16  ;;  %v1135_v27 = vshll.u32 %v3342_v13, 16  ;;  %v3365_v11 = vld [vmem:[%s3265_s30 + $0x20] ss:$0 sps:$4 sm:$0x11]  }
  0x2d   : > { %710 = vrot.lane.b32.xlu0 %v529_v9, %s3177_s6  ;;  %v637_v25 = vsel %vm517_vm1, %v632_v15, %v636_v6  ;;  %v1032_v28 = vshrl.u32 %v3279_v5, 16  ;;  %v1046_v30 = vshll.u32 %v2699_v19, 16  ;;  %v1036_v32 = vrot.slane %v1034_v17, 1  ;;  %v2571_v50 = vld [vmem:[%s3265_s30 + $0x18] sm:$0xe] }
  0x2e   : > { %v625_v29 = vsel %vm517_vm1, %v620_v8, %v624_v16  ;;  %v1039_v2 = vshll.u32 %v3347_v20, 16  ;;  %v1133_v33 = vor.u32 %v1132_v22, %v1128_v21  ;;  %v1137_v34 = vrot.slane %v1135_v27, 1  ;;  %v2602_v55 = vld [vmem:[%s3265_s30 + $0x78] sm:$0xf]  ;;  %v3385_v56 = vld [vmem:[%s3265_s30 + $0x7c] sm:$0xf] }
  0x2f   : > { %v1037_v36 = vor.u32 %v1036_v32, %v1032_v28  ;;  %v1140_v37 = vshrl.u32 %v2707_v12, 16  ;;  %v1144_v39 = vrot.slane %v1142_v26, 1  ;;  %v1147_v5 = vshll.u32 %v3354_v24, 16  ;;  %v2586_v3 = vld [vmem:[%s3265_s30 + $0x18] sm:$0xf] }
  0x30   : > { %728 = vrot.lane.b32.xlu1 %v637_v25, %s3177_s6  ;;  %v1041_v17 = vrot.slane %v1039_v2, 1  ;;  %v1044_v40 = vshrl.u32 %v2699_v19, 16  ;;  %v1048_v41 = vrot.slane %v1046_v30, 1  ;;  %v1051_v42 = vshll.u32 %v3365_v11, 16  ;;  %v3396_v6 = vld [vmem:[%s3265_s30 + $0x1c] sm:$0xf] }
  0x31   : > { %726 = vrot.lane.b32.xlu0 %v625_v29, %s3177_s6  ;;  %v2738_v44 = vcombine.low %v2578_v35, %v3269_v1  ;;  %v1138_v46 = vsel %vm517_vm1, %v1133_v33, %v1137_v34  ;;  %v1145_v47 = vor.u32 %v1144_v39, %v1140_v37  ;;  %v1149_v48 = vrot.slane %v1147_v5, 1  ;;  %v2588_v16 = vld [vmem:[%s3265_s30 + $0x24] sm:$0xf]  ;;  %v3416_v21 = vld [vmem:[%s3265_s30 + $0x80] ss:$0 sps:$4 sm:$0x11]  }
  0x32   : > { %v2730_v49 = vcombine.low %v2570_v43, %v3276_v4  ;;  %v1042_v51 = vsel %vm517_vm1, %v1037_v36, %v1041_v17  ;;  %v1049_v52 = vor.u32 %v1048_v41, %v1044_v40  ;;  %v1053_v53 = vrot.slane %v1051_v42, 1  ;;  %v3423_v27 = vld [vmem:[%s3265_s30 + $0x20] ss:$0 sps:$4 sm:$0x11]   ;;  %v209_v37 = vld [vmem:[%s3265_s30 + $0x78] sm:$0xf] }
  0x33   : > { %v1327_v1 = vrot.slane %v2738_v44, 1  ;;  %v1328_v54 = vrot.slane %v3342_v13, 1  ;;  %v2739_v58 = vcombine.low %v2579_v45, %v3329_v57  ;;  %v2731_v4 = vcombine.low %v2571_v50, %v3335_v63  ;;  %v2604_v63 = vld [vmem:[%s3265_s30 + $0x84] sm:$0xf]  ;;  %v3405_v13 = vld [vmem:[%s3265_s30 + $0x88] sm:$0xf] }
  0x34   : > { %969 = vrot.lane.b32.xlu1 %v2707_v12, %s3175_s4  ;;  %v1150_v59 = vsel %vm517_vm1, %v1145_v47, %v1149_v48  ;;  %v1054_v60 = vsel %vm517_vm1, %v1049_v52, %v1053_v53  ;;  %v1303_v61 = vrot.slane %v2730_v49, 1  ;;  %v1304_v62 = vrot.slane %v3347_v20, 1  ;;  %v3432_v34 = vld [vmem:[%s3265_s30 + $0x2c] ss:$0 sps:$4 sm:$0x11]  }
  0x35   : > { %953 = vrot.lane.b32.xlu0 %v2699_v19, %s3175_s4  ;;  %v2754_v0 = vcombine.low %v2602_v55, %v3385_v56  ;;  %v1329_v57 = vsel %vm790_vm0, %v1327_v1, %v1328_v54  ;;  %v1330_v7 = vrot.slane %v2739_v58, 1  ;;  %v1331_v9 = vrot.slane %v3354_v24, 1  ;;  %v3411_v19 = vld [vmem:[%s3265_s30 + $0x28] sm:$0xf]  ;;  %v3437_v39 = vld [vmem:[%s3265_s30 + $0x7c] sm:$0xf] }
  0x36   : > { %v1306_v10 = vrot.slane %v2731_v4, 1  ;;  %v1307_v12 = vrot.slane %v3365_v11, 1  ;;  %v1305_v14 = vsel %vm790_vm0, %v1303_v61, %v1304_v62  ;;  %v2746_v15 = vcombine.low %v2586_v3, %v3396_v6  ;;  %v3428_v11 = vld [vmem:[%s3265_s30 + $0x8c] ss:$0 sps:$4 sm:$0x11]  }
  0x37   : > { %v1642_v20 = vshll.u32 %v2754_v0, 16  ;;  %v2755_v8 = vcombine.low %v2604_v63, %v3405_v13  ;;  %v1332_v22 = vsel %vm790_vm0, %v1330_v7, %v1331_v9  ;;  %v2747_v24 = vcombine.low %v2588_v16, %v3411_v19  ;;  %v193_v17 = vld [vmem:[%s3265_s30 + $0x18] sm:$0xf]  ;;  %v3441_v40 = vld [vmem:[%s3265_s30 + $0x1c] sm:$0xf] }
  0x38   : > { %1239 = vrot.lane.b32.xlu1 %v1138_v46, %s3178_s7  ;;  %v1308_v25 = vsel %vm790_vm0, %v1306_v10, %v1307_v12  ;;  %v1546_v26 = vshll.u32 %v2746_v15, 16  ;;  %v1640_v28 = vshrl.u32 %v2754_v0, 16  ;;  %v1647_v32 = vshll.u32 %v3416_v21, 16  ;;  %v2642_v41 = vld [vmem:[%s3265_s30 + $0x78] sm:$0xe] }
  0x39   : > { %1223 = vrot.lane.b32.xlu0 %v1042_v51, %s3178_s7  ;;  %v1644_v29 = vrot.slane %v1642_v20, 1  ;;  %v1654_v30 = vshll.u32 %v2755_v8, 16  ;;  %v1544_v2 = vshrl.u32 %v2746_v15, 16  ;;  %v1558_v33 = vshll.u32 %v2747_v24, 16  ;;  %v2634_v46 = vld [vmem:[%s3265_s30 + $0x18] sm:$0xe] }
  0x3a   : > { %v1548_v35 = vrot.slane %v1546_v26, 1  ;;  %v1551_v36 = vshll.u32 %v3423_v27, 16  ;;  %v1649_v42 = vrot.slane %v1647_v32, 1  ;;  %v1652_v43 = vshrl.u32 %v2755_v8, 16  ;;  %v195_v9 = vld [vmem:[%s3265_s30 + $0x24] sm:$0xf] }
  0x3b   : > { %v1645_v5 = vor.u32 %v1644_v29, %v1640_v28  ;;  %v1656_v44 = vrot.slane %v1654_v30, 1  ;;  %v1659_v45 = vshll.u32 %v3428_v11, 16  ;;  %v1556_v47 = vshrl.u32 %v2747_v24, 16  ;;  %v3459_v4 = vld [vmem:[%s3265_s30 + $0x80] ss:$0 sps:$4 sm:$0x11]  }
  0x3c   : > { %1241 = vrot.lane.b32.xlu1 %v1150_v59, %s3178_s7  ;;  %v1560_v48 = vrot.slane %v1558_v33, 1  ;;  %v1563_v49 = vshll.u32 %v3432_v34, 16  ;;  %v3450_v50 = vcombine.low %v209_v37, %v3437_v39  ;;  %v1549_v51 = vor.u32 %v1548_v35, %v1544_v2  ;;  %v3476_v10 = vld [vmem:[%s3265_s30 + $0x28] sm:$0xf]  ;;  %v2643_v12 = vld [vmem:[%s3265_s30 + $0x84] sm:$0xe] }
  0x3d   : > { %1225 = vrot.lane.b32.xlu0 %v1054_v60, %s3178_s7  ;;  %v1553_v52 = vrot.slane %v1551_v36, 1  ;;  %v3453_v53 = vcombine.low %v193_v17, %v3441_v40  ;;  %v2786_v1 = vcombine.low %v2642_v41, %v3385_v56  ;;  %v2778_v54 = vcombine.low %v2634_v46, %v3396_v6  ;;  %v3465_v56 = vld [vmem:[%s3265_s30 + $0x20] ss:$0 sps:$4 sm:$0x11]   ;;  %v211_v6 = vld [vmem:[%s3265_s30 + $0x84] sm:$0xf] }
  0x3e   : > { %v1657_v55 = vor.u32 %v1656_v44, %v1652_v43  ;;  %v1661_v58 = vrot.slane %v1659_v45, 1  ;;  %v1650_v59 = vsel %vm517_vm1, %v1645_v5, %v1649_v42  ;;  %v1561_v60 = vor.u32 %v1560_v48, %v1556_v47  ;;  %v3501_v36 = vld [vmem:[%s3265_s30 + $0x8c] ss:$0 sps:$4 sm:$0x11]  }
  0x3f   : > { %v1565_v61 = vrot.slane %v1563_v49, 1  ;;  %v641_v62 = vshll.u32 %v3450_v50, 16  ;;  %v545_v3 = vshll.u32 %v3453_v53, 16  ;;  %v1839_v63 = vrot.slane %v2786_v1, 1 }
  0x40   : > { %1367 = vrot.lane.b32.xlu1 %v1329_v57, %s3179_s8  ;;  %v3471_v57 = vld [vmem:[%s3265_s30 + $0x88] sm:$0xf]  ;;  %v1840_v7 = vrot.slane %v3416_v21, 1  ;;  %v1816_v16 = vrot.slane %v3423_v27, 1  ;;  %v646_v20 = vshll.u32 %v3459_v4, 16  ;;  %v543_v26 = vshrl.u32 %v3453_v53, 16 }
  0x41   : > { %1351 = vrot.lane.b32.xlu0 %v1305_v14, %s3179_s8  ;;  %v1662_v14 = vsel %vm517_vm1, %v1657_v55, %v1661_v58  ;;  %v1566_v21 = vsel %vm517_vm1, %v1561_v60, %v1565_v61  ;;  %v547_v28 = vrot.slane %v545_v3, 1  ;;  %v550_v27 = vshll.u32 %v3465_v56, 16 }
  0x42   : > { %v3493_v29 = vcombine.low %v195_v9, %v3476_v10  ;;  %v2787_v30 = vcombine.low %v2643_v12, %v3405_v13  ;;  %v648_v2 = vrot.slane %v646_v20, 1  ;;  %v1841_v33 = vsel %vm790_vm0, %v1839_v63, %v1840_v7  ;;  %v3506_v13 = vld [vmem:[%s3265_s30 + $0x2c] ss:$0 sps:$4 sm:$0x11]   ;;  %v240_v63 = vld [vmem:[%s3265_s30 + $0x24] sm:$0xe] }
  0x43   : > { %v548_v17 = vor.u32 %v547_v28, %v543_v26  ;;  %v552_v41 = vrot.slane %v550_v27, 1  ;;  %v1843_v43 = vrot.slane %v3428_v11, 1  ;;  %v1819_v45 = vrot.slane %v3432_v34, 1  ;;  %v239_v34 = vld [vmem:[%s3265_s30 + $0x18] sm:$0xe] }
  0x44   : > { %1369 = vrot.lane.b32.xlu1 %v1332_v22, %s3179_s8  ;;  %v639_v22 = vshrl.u32 %v3450_v50, 16  ;;  %4623 = vst [vmem:[#allocation5_spill] sm:$0xff] %v3493_v29  ;;  %v1842_v42 = vrot.slane %v2787_v30, 1  ;;  %v658_v49 = vshll.u32 %v3501_v36, 16  ;;  %v555_v1 = vshrl.u32 %v3493_v29, 16 }
  0x45   : > { %1353 = vrot.lane.b32.xlu0 %v1308_v25, %s3179_s8  ;;  %v3488_v25 = vcombine.low %v211_v6, %v3471_v57  ;;  %v2684_v61 = vcombine.low %v239_v34, %v3441_v40  ;;  %v822_v7 = vrot.slane %v3459_v4, 1  ;;  %v798_v9 = vrot.slane %v3465_v56, 1  ;;  %v2526_v56 = vld [vmem:[%s3265_s30 + $0x24] sm:$0xf]  ;;  %v2544_v28 = vld [vmem:[%s3265_s30 + $0x90] sm:$0xf] }
  0x46   : > { %v1844_v55 = vsel %vm790_vm0, %v1842_v42, %v1843_v43  ;;  %v2685_v4 = vcombine.low %v240_v63, %v3476_v10  ;;  %v3553_v10 = vld [vmem:[%s3265_s30 + $0x94] sm:$0xf] }
  0x47   : > { %v653_v37 = vshll.u32 %v3488_v25, 16  ;;  %v651_v47 = vshrl.u32 %v3488_v25, 16 }
  0x48   : > { %1479 = vrot.lane.b32.xlu1 %v2754_v0, %s3180_s9  ;;  %v1554_v0 = vsel %vm517_vm1, %v1549_v51, %v1553_v52  ;;  %v247_v51 = vld [vmem:[%s3265_s30 + $0x78] sm:$0xe]  ;;  %v553_v52 = vsel %vm517_vm1, %v548_v17, %v552_v41  ;;  %v800_v30 = vrot.slane %v2685_v4, 1  ;;  %v3567_v41 = vld [vmem:[%s3265_s30 + $0x8c] ss:$0 sps:$4 sm:$0x11]  }
  0x49   : > { %1463 = vrot.lane.b32.xlu0 %v2746_v15, %s3180_s9  ;;  %v1815_v15 = vrot.slane %v2778_v54, 1  ;;  %v655_v48 = vrot.slane %v653_v37, 1  ;;  %v562_v54 = vshll.u32 %v3506_v13, 16  ;;  %v2692_v60 = vcombine.low %v247_v51, %v3437_v39  ;;  %v2573_v4 = vld [vmem:[%s3265_s30 + $0x30] sm:$0xe] }
  0x4b   : > { %v1817_v5 = vsel %vm790_vm0, %v1815_v15, %v1816_v16  ;;  %v656_v58 = vor.u32 %v655_v48, %v651_v47  ;;  %v564_v6 = vrot.slane %v562_v54, 1  ;;  %v821_v40 = vrot.slane %v2692_v60, 1  ;;  %v2542_v15 = vld [vmem:[%s3265_s30 + $0x84] sm:$0xf]  ;;  %v3537_v16 = vld [vmem:[%s3265_s30 + $0x88] sm:$0xf] }
  0x4c   : > { %1481 = vrot.lane.b32.xlu1 %v2755_v8, %s3180_s9  ;;  %v2635_v8 = vld [vmem:[%s3265_s30 + $0x24] sm:$0xe]  ;;  %v1159_v47 = vshll.u32 %v3567_v41, 16 }
  0x4d   : > { %1465 = vrot.lane.b32.xlu0 %v2747_v24, %s3180_s9  ;;  %v643_v24 = vrot.slane %v641_v62, 1  ;;  %v2779_v32 = vcombine.low %v2635_v8, %v3411_v19  ;;  %v557_v19 = vshll.u32 %v3493_v29, 16  ;;  %v248_v62 = vld [vmem:[%s3265_s30 + $0x84] sm:$0xe]  ;;  %v3543_v8 = vld [vmem:[%s3265_s30 + $0x28] sm:$0xf] }
  0x4e   : > { %v2693_v12 = vcombine.low %v248_v62, %v3471_v57  ;;  %v2700_v26 = vcombine.low %v2526_v56, %v3543_v8  ;;  %v1161_v54 = vrot.slane %v1159_v47, 1  ;;  %v3046_v47 = vld [vmem:[%s4613_s1 + $0x10] ss:$0 sps:$4 sm:$0x33]   ;;  %v201_v29 = vld [vmem:[%s3265_s30 + $0x48] sm:$0xf] }
  0x4f   : > { %v644_v35 = vor.u32 %v643_v24, %v639_v22  ;;  %v1818_v44 = vrot.slane %v2779_v32, 1  ;;  %v559_v11 = vrot.slane %v557_v19, 1  ;;  %v2708_v22 = vcombine.low %v2542_v15, %v3537_v16  ;;  %v3571_v19 = vld [vmem:[%s3265_s30 + $0x2c] ss:$0 sps:$4 sm:$0x11]   ;;  %2883 = vmatprep.subr.msk.bf16.mxu0 %vm2219_vm2, %v3046_v47  ;;  %2884 = vmatprep.subr.msk.bf16.mxu1 %vm2219_vm2, %v3046_v47 }
  0x50   : > { %1751 = vrot.lane.b32.xlu1 %v1650_v59, %s3181_s10  ;;  %v660_v59 = vrot.slane %v658_v49, 1  ;;  %v824_v57 = vrot.slane %v2693_v12, 1  ;;  %v823_v24 = vsel %vm790_vm0, %v821_v40, %v822_v7  ;;  %v801_v32 = vrot.slane %v3506_v13, 1  ;;  %v3577_v49 = vld [vmem:[%s3265_s30 + $0x98] ss:$0 sps:$4 sm:$0x11]  }
  0x51   : > { %1735 = vrot.lane.b32.xlu0 %v1554_v0, %s3181_s10  ;;  %v649_v46 = vsel %vm517_vm1, %v644_v35, %v648_v2  ;;  %v1820_v0 = vsel %vm790_vm0, %v1818_v44, %v1819_v45  ;;  %v560_v3 = vor.u32 %v559_v11, %v555_v1  ;;  %v2528_v2 = vld [vmem:[%s3265_s30 + $0x30] sm:$0xf]  ;;  %v1154_v35 = vshll.u32 %v2708_v22, 16 }
  0x52   : > { %v661_v39 = vsel %vm517_vm1, %v656_v58, %v660_v59  ;;  %v802_v13 = vsel %vm790_vm0, %v800_v30, %v801_v32  ;;  %v1152_v43 = vshrl.u32 %v2708_v22, 16  ;;  %v1056_v45 = vshrl.u32 %v2700_v26, 16  ;;  %v2580_v59 = vld [vmem:[%s3265_s30 + $0x84] sm:$0xe]  ;;  %v2590_v30 = vld [vmem:[%s3265_s30 + $0x30] sm:$0xf] }
  0x53   : > { %v565_v20 = vsel %vm517_vm1, %v560_v3, %v564_v6  ;;  %v1156_v44 = vrot.slane %v1154_v35, 1  ;;  %v1063_v51 = vshll.u32 %v3571_v19, 16  ;;  %v1171_v58 = vshll.u32 %v3577_v49, 16  ;;  %v2572_v3 = vld [vmem:[%s3265_s30 + $0x24] sm:$0xe] }
  0x54   : > { %1753 = vrot.lane.b32.xlu1 %v1662_v14, %s3181_s10  ;;  %v797_v14 = vrot.slane %v2684_v61, 1  ;;  %v2581_v6 = vld [vmem:[%s3265_s30 + $0x90] sm:$0xe]  ;;  %v2740_v63 = vcombine.low %v2580_v59, %v3537_v16  ;;  %v3612_v32 = vld [vmem:[%s3265_s30 + $0x34] sm:$0xf] }
  0x55   : > { %1737 = vrot.lane.b32.xlu0 %v1566_v21, %s3181_s10  ;;  %v825_v21 = vrot.slane %v3501_v36, 1  ;;  %v2709_v36 = vcombine.low %v2544_v28, %v3553_v10  ;;  %v1157_v1 = vor.u32 %v1156_v44, %v1152_v43  ;;  %v1065_v60 = vrot.slane %v1063_v51, 1  ;;  %v2608_v35 = vld [vmem:[%s3265_s30 + $0x9c] sm:$0xf] }
  0x56   : > { %v799_v27 = vsel %vm790_vm0, %v797_v14, %v798_v9  ;;  %v1173_v12 = vrot.slane %v1171_v58, 1  ;;  %v1333_v56 = vrot.slane %v2740_v63, 1  ;;  %v1310_v28 = vrot.slane %v3571_v19, 1  ;;  %v3642_v51 = vld [vmem:[%s3265_s30 + $0x38] ss:$0 sps:$4 sm:$0x11]  }
  0x57   : > { %v826_v37 = vsel %vm790_vm0, %v824_v57, %v825_v21  ;;  %v1166_v42 = vshll.u32 %v2709_v36, 16  ;;  %v1164_v11 = vshrl.u32 %v2709_v36, 16  ;;  %v1162_v7 = vsel %vm517_vm1, %v1157_v1, %v1161_v54  ;;  %v2606_v57 = vld [vmem:[%s3265_s30 + $0x90] sm:$0xf]  ;;  %v3604_v21 = vld [vmem:[%s3265_s30 + $0x94] sm:$0xf] }
  0x58   : > { %1879 = vrot.lane.b32.xlu1 %v1841_v33, %s3182_s11  ;;  %v3559_v33 = vld [vmem:[%s3265_s30 + $0x34] sm:$0xf]  ;;  %v2748_v19 = vcombine.low %v2590_v30, %v3612_v32  ;;  %v3645_v1 = vld [vmem:[%s3265_s30 + $0xa4] ss:$0 sps:$4 sm:$0x11]  }
  0x59   : > { %1863 = vrot.lane.b32.xlu0 %v1817_v5, %s3182_s11  ;;  %v1058_v5 = vshll.u32 %v2700_v26, 16  ;;  %v2701_v17 = vcombine.low %v2528_v2, %v3559_v33  ;;  %v2756_v2 = vcombine.low %v2606_v57, %v3604_v21  ;;  %v213_v63 = vld [vmem:[%s3265_s30 + $0x90] sm:$0xf] }
  0x5b   : > { %v1060_v48 = vrot.slane %v1058_v5, 1  ;;  %v1068_v61 = vshrl.u32 %v2701_v17, 16  ;;  %v3624_v5 = vld [vmem:[%s3265_s30 + $0x40] sm:$0xf]  ;;  %v1666_v43 = vshll.u32 %v2756_v2, 16 }
  0x5c   : > { %730 = vrot.lane.b32.xlu1 %v649_v46, %s3177_s6  ;;  %v1070_v46 = vshll.u32 %v2701_v17, 16 }
  0x5d   : > { %714 = vrot.lane.b32.xlu0 %v553_v52, %s3177_s6  ;;  %v3581_v52 = vld [vmem:[%s3265_s30 + $0x38] ss:$0 sps:$4 sm:$0x11]   ;;  %v1061_v34 = vor.u32 %v1060_v48, %v1056_v45  ;;  %v1668_v58 = vrot.slane %v1666_v43, 1 }
  0x5e   : > { %v1072_v62 = vrot.slane %v1070_v46, 1  ;;  %v3635_v46 = vld [vmem:[%s3265_s30 + $0x98] ss:$0 sps:$4 sm:$0x11]  }
  0x5f   : > { %v1066_v40 = vsel %vm517_vm1, %v1061_v34, %v1065_v60  ;;  %v1664_v34 = vshrl.u32 %v2756_v2, 16  ;;  %v1671_v59 = vshll.u32 %v3635_v46, 16  ;;  %v1568_v60 = vshrl.u32 %v2748_v19, 16 }
  0x60   : > { %1881 = vrot.lane.b32.xlu1 %v1844_v55, %s3182_s11  ;;  %v1168_v55 = vrot.slane %v1166_v42, 1  ;;  %v1073_v14 = vor.u32 %v1072_v62, %v1068_v61  ;;  %v2221_v61 = vsel %vm2219_vm2, %v3046_v47, 0  ;;  %v3056_v62 = vld [vmem:[%s4613_s1] sm:$0xff]  }
  0x61   : > { %1865 = vrot.lane.b32.xlu0 %v1820_v0, %s3182_s11  ;;  %v1075_v0 = vshll.u32 %v3581_v52, 16  ;;  %2840 = vmatpush3.bf16.msra.mxu0 %v2221_v61  ;;  %v3703_v47 = vld [vmem:[%s3265_s30 + $0x40] sm:$0xf] }
  0x62   : > { %v1169_v9 = vor.u32 %v1168_v55, %v1164_v11  ;;  %v3051_v11 = vld [vmem:[%s4613_s1 + $0x8] sm:$0xff]   ;;  %v3652_v55 = vld [vmem:[%s3265_s30 + $0x44] ss:$0 sps:$4 sm:$0x11]   ;;  %2880 = vmatpush3.bf16.msra.mxu1 %v2221_v61 }
  0x63   : > { %v1077_v15 = vrot.slane %v1075_v0, 1  ;;  %v2644_v0 = vld [vmem:[%s3265_s30 + $0x90] sm:$0xe]  ;;  %2841 = vmatprep.subr.bf16.mxu0 %v3051_v11  ;;  %2878 = vmatprep.subr.bf16.mxu1 %v3051_v11 }
  0x64   : > { %732 = vrot.lane.b32.xlu1 %v661_v39, %s3177_s6  ;;  %v2732_v39 = vcombine.low %v2572_v3, %v3543_v8  ;;  %v1174_v16 = vsel %vm517_vm1, %v1169_v9, %v1173_v12  ;;  %v1334_v8 = vrot.slane %v3567_v41, 1  ;;  %v1683_v12 = vshll.u32 %v3645_v1, 16 }
  0x65   : > { %716 = vrot.lane.b32.xlu0 %v565_v20, %s3177_s6  ;;  %v2741_v20 = vcombine.low %v2581_v6, %v3553_v10  ;;  %v1575_v6 = vshll.u32 %v3642_v51, 16  ;;  %2842 = vmatpush3.bf16.msra.mxu0 %v3051_v11 }
  0x66   : > { %2881 = vmatpush3.bf16.msra.mxu1 %v3051_v11  ;;  %2843 = vmatprep.subr.bf16.mxu0 %v3056_v62 }
  0x67   : > { %v1336_v10 = vrot.slane %v2741_v20, 1  ;;  %2879 = vmatprep.subr.bf16.mxu1 %v3056_v62 }
  0x68   : > { %859 = vrot.lane.b32.xlu1 %v823_v24, %s3176_s5  ;;  %v1078_v24 = vsel %vm517_vm1, %v1073_v14, %v1077_v15 }
  0x69   : > { %843 = vrot.lane.b32.xlu0 %v799_v27, %s3176_s5  ;;  %v1337_v27 = vrot.slane %v3577_v49, 1  ;;  %v1570_v49 = vshll.u32 %v2748_v19, 16  ;;  %2844 = vmatpush3.bf16.msra.mxu0 %v3056_v62 }
  0x6a   : > { %2882 = vmatpush3.bf16.msra.mxu1 %v3056_v62 }
  0x6b   : > { %v1338_v45 = vsel %vm790_vm0, %v1336_v10, %v1337_v27  ;;  %v1572_v3 = vrot.slane %v1570_v49, 1  ;;  %v1685_v10 = vrot.slane %v1683_v12, 1  ;;  %v3730_v12 = vld [vmem:[%s3265_s30 + $0xa4] ss:$0 sps:$4 sm:$0x11]  }
  0x6c   : > { %861 = vrot.lane.b32.xlu1 %v826_v37, %s3176_s5  ;;  %v2592_v37 = vld [vmem:[%s3265_s30 + $0x3c] sm:$0xf] }
  0x6d   : > { %845 = vrot.lane.b32.xlu0 %v802_v13, %s3176_s5  ;;  %v1313_v13 = vrot.slane %v3581_v52, 1  ;;  %v2749_v44 = vcombine.low %v2592_v37, %v3624_v5 }
  0x6f   : > { %v1582_v54 = vshll.u32 %v2749_v44, 16  ;;  %v1580_v15 = vshrl.u32 %v2749_v44, 16 }
  0x70   : > { %971 = vrot.lane.b32.xlu1 %v2708_v22, %s3175_s4  ;;  %v2733_v22 = vcombine.low %v2573_v4, %v3559_v33  ;;  %v1335_v33 = vsel %vm790_vm0, %v1333_v56, %v1334_v8  ;;  %v1587_v4 = vshll.u32 %v3652_v55, 16  ;;  %v1669_v56 = vor.u32 %v1668_v58, %v1664_v34  ;;  %v2637_v58 = vld [vmem:[%s3265_s30 + $0x3c] sm:$0xe] }
  0x71   : > { %955 = vrot.lane.b32.xlu0 %v2700_v26, %s3175_s4  ;;  %v1309_v26 = vrot.slane %v2732_v39, 1  ;;  %v197_v39 = vld [vmem:[%s3265_s30 + $0x30] sm:$0xf]  ;;  %v1584_v20 = vrot.slane %v1582_v54, 1  ;;  %v1673_v8 = vrot.slane %v1671_v59, 1  ;;  %v1822_v34 = vrot.slane %v3642_v51, 1 }
  0x72   : > { %v1312_v41 = vrot.slane %v2733_v22, 1  ;;  %v1573_v22 = vor.u32 %v1572_v3, %v1568_v60 }
  0x74   : > { %973 = vrot.lane.b32.xlu1 %v2709_v36, %s3175_s4  ;;  %v3618_v36 = vld [vmem:[%s3265_s30 + $0xa0] sm:$0xf]  ;;  %v1314_v48 = vsel %vm790_vm0, %v1312_v41, %v1313_v13 }
  0x75   : > { %957 = vrot.lane.b32.xlu0 %v2701_v17, %s3175_s4  ;;  %v1311_v17 = vsel %vm790_vm0, %v1309_v26, %v1310_v28  ;;  %v2757_v42 = vcombine.low %v2608_v35, %v3618_v36  ;;  %v2788_v28 = vcombine.low %v2644_v0, %v3604_v21  ;;  %v1589_v35 = vrot.slane %v1587_v4, 1 }
  0x76   : > { %v1674_v21 = vsel %vm517_vm1, %v1669_v56, %v1673_v8  ;;  %v3739_v56 = vld [vmem:[%s3265_s30 + $0x44] ss:$0 sps:$4 sm:$0x11]  }
  0x77   : > { %v1678_v52 = vshll.u32 %v2757_v42, 16  ;;  %v1676_v9 = vshrl.u32 %v2757_v42, 16  ;;  %v1845_v43 = vrot.slane %v2788_v28, 1  ;;  %v1849_v28 = vrot.slane %v3645_v1, 1 }
  0x78   : > { %1243 = vrot.lane.b32.xlu1 %v1162_v7, %s3178_s7  ;;  %v3663_v7 = vld [vmem:[%s3265_s30 + $0x94] sm:$0xf] }
  0x79   : > { %1227 = vrot.lane.b32.xlu0 %v1066_v40, %s3178_s7  ;;  %v3668_v40 = vld [vmem:[%s3265_s30 + $0x34] sm:$0xf]  ;;  %v1680_v14 = vrot.slane %v1678_v52, 1  ;;  %v3675_v57 = vcombine.low %v213_v63, %v3663_v7 }
  0x7a   : > { %v3678_v26 = vcombine.low %v197_v39, %v3668_v40 }
  0x7b   : > { %4624 = vst [vmem:[#allocation6_spill] sm:$0xff] %v3675_v57  ;;  %v1681_v30 = vor.u32 %v1680_v14, %v1676_v9  ;;  %v665_v37 = vshll.u32 %v3675_v57, 16  ;;  %v2781_v9 = vcombine.low %v2637_v58, %v3624_v5 }
  0x7c   : > { %1245 = vrot.lane.b32.xlu1 %v1174_v16, %s3178_s7  ;;  %v2636_v16 = vld [vmem:[%s3265_s30 + $0x30] sm:$0xe]  ;;  %4625 = vst [vmem:[#allocation7_spill] sm:$0xff] %v3678_v26  ;;  %v569_v13 = vshll.u32 %v3678_v26, 16  ;;  %v567_v62 = vshrl.u32 %v3678_v26, 16 }
  0x7d   : > { %1229 = vrot.lane.b32.xlu0 %v1078_v24, %s3178_s7  ;;  %v1577_v24 = vrot.slane %v1575_v6, 1  ;;  %v2780_v27 = vcombine.low %v2636_v16, %v3612_v32  ;;  %v1686_v52 = vsel %vm517_vm1, %v1681_v30, %v1685_v10  ;;  %v667_v59 = vrot.slane %v665_v37, 1  ;;  %v249_v37 = vld [vmem:[%s3265_s30 + $0x90] sm:$0xe] }
  0x7e   : > { %v571_v0 = vrot.slane %v569_v13, 1  ;;  %v1824_v10 = vrot.slane %v2781_v9, 1  ;;  %v682_v30 = vshll.u32 %v3730_v12, 16 }
  0x7f   : > { %v1578_v32 = vsel %vm517_vm1, %v1573_v22, %v1577_v24  ;;  %v1821_v54 = vrot.slane %v2780_v27, 1  ;;  %v1825_v27 = vrot.slane %v3652_v55, 1 }
  0x80   : > { %1371 = vrot.lane.b32.xlu1 %v1335_v33, %s3179_s8  ;;  %v3684_v33 = vld [vmem:[%s3265_s30 + $0x98] ss:$0 sps:$4 sm:$0x11]   ;;  %v572_v16 = vor.u32 %v571_v0, %v567_v62  ;;  %v242_v62 = vld [vmem:[%s3265_s30 + $0x3c] sm:$0xe] }
  0x81   : > { %1355 = vrot.lane.b32.xlu0 %v1311_v17, %s3179_s8  ;;  %v3690_v17 = vld [vmem:[%s3265_s30 + $0x38] ss:$0 sps:$4 sm:$0x11]   ;;  %v670_v60 = vshll.u32 %v3684_v33, 16 }
  0x82   : > { %v574_v3 = vshll.u32 %v3690_v17, 16 }
  0x84   : > { %1373 = vrot.lane.b32.xlu1 %v1338_v45, %s3179_s8  ;;  %v199_v45 = vld [vmem:[%s3265_s30 + $0x3c] sm:$0xf]  ;;  %v576_v5 = vrot.slane %v574_v3, 1 }
  0x85   : > { %1357 = vrot.lane.b32.xlu0 %v1314_v48, %s3179_s8  ;;  %v2645_v48 = vld [vmem:[%s3265_s30 + $0x9c] sm:$0xe]  ;;  %v3722_v6 = vcombine.low %v199_v45, %v3703_v47 }
  0x86   : > { %v2789_v51 = vcombine.low %v2645_v48, %v3618_v36  ;;  %v1823_v36 = vsel %vm790_vm0, %v1821_v54, %v1822_v34  ;;  %v577_v13 = vsel %vm517_vm1, %v572_v16, %v576_v5  ;;  %v1826_v34 = vsel %vm790_vm0, %v1824_v10, %v1825_v27  ;;  %v2532_v27 = vld [vmem:[%s3265_s30 + $0x48] sm:$0xf] }
  0x87   : > { %4627 = vst [vmem:[#allocation9_spill] sm:$0xff] %v3722_v6  ;;  %v581_v8 = vshll.u32 %v3722_v6, 16  ;;  %v831_v10 = vrot.slane %v3730_v12, 1 }
  0x88   : > { %1483 = vrot.lane.b32.xlu1 %v2756_v2, %s3180_s9  ;;  %v1585_v2 = vor.u32 %v1584_v20, %v1580_v15  ;;  %v672_v15 = vrot.slane %v670_v60, 1  ;;  %v1848_v22 = vrot.slane %v2789_v51, 1  ;;  %v2546_v51 = vld [vmem:[%s3265_s30 + $0x9c] sm:$0xf] }
  0x89   : > { %1467 = vrot.lane.b32.xlu0 %v2748_v19, %s3180_s9  ;;  %v215_v19 = vld [vmem:[%s3265_s30 + $0x9c] sm:$0xf]  ;;  %v583_v1 = vrot.slane %v581_v8, 1  ;;  %v3794_v8 = vld [vmem:[%s3265_s30 + $0xac] sm:$0xf] }
  0x8a   : > { %v1590_v11 = vsel %vm517_vm1, %v1585_v2, %v1589_v35  ;;  %v1850_v48 = vsel %vm790_vm0, %v1848_v22, %v1849_v28 }
  0x8c   : > { %1485 = vrot.lane.b32.xlu1 %v2757_v42, %s3180_s9  ;;  %v3698_v42 = vld [vmem:[%s3265_s30 + $0xa0] sm:$0xf] }
  0x8d   : > { %1469 = vrot.lane.b32.xlu0 %v2749_v44, %s3180_s9  ;;  %v1846_v44 = vrot.slane %v3635_v46, 1  ;;  %v663_v46 = vshrl.u32 %v3675_v57, 16  ;;  %v3717_v61 = vcombine.low %v215_v19, %v3698_v42  ;;  %v579_v19 = vshrl.u32 %v3722_v6, 16 }
  0x8f   : > { %4626 = vst [vmem:[#allocation8_spill] sm:$0xff] %v3717_v61  ;;  %v1847_v39 = vsel %vm790_vm0, %v1845_v43, %v1846_v44  ;;  %v668_v14 = vor.u32 %v667_v59, %v663_v46  ;;  %v677_v20 = vshll.u32 %v3717_v61, 16  ;;  %v675_v35 = vshrl.u32 %v3717_v61, 16  ;;  %v250_v59 = vld [vmem:[%s3265_s30 + $0x9c] sm:$0xe] }
  0x90   : > { %v3693_v41 = vpop.permute.xlu1 %967  ;;  %1755 = vrot.lane.b32.xlu1 %v1674_v21, %s3181_s10  ;;  %v586_v43 = vshll.u32 %v3739_v56, 16  ;;  %v2694_v44 = vcombine.low %v249_v37, %v3663_v7  ;;  %v584_v58 = vor.u32 %v583_v1, %v579_v19  ;;  %v828_v7 = vrot.slane %v3684_v33, 1  ;;  %v2530_v33 = vld [vmem:[%s3265_s30 + $0x3c] sm:$0xf] }
  0x91   : > { %v3707_v49 = vpop.permute.xlu0 %951  ;;  %1739 = vrot.lane.b32.xlu0 %v1578_v32, %s3181_s10  ;;  %v673_v2 = vsel %vm517_vm1, %v668_v14, %v672_v15  ;;  %v679_v21 = vrot.slane %v677_v20, 1  ;;  %v241_v32 = vld [vmem:[%s3265_s30 + $0x30] sm:$0xe]  ;;  %v3778_v14 = vld [vmem:[%s3265_s30 + $0xa0] sm:$0xf]  ;;  %v2687_v20 = vcombine.low %v242_v62, %v3703_v47  ;;  %v807_v37 = vrot.slane %v3739_v56, 1 }
  0x92   : > { %v2686_v45 = vcombine.low %v241_v32, %v3668_v40  ;;  %v588_v46 = vrot.slane %v586_v43, 1  ;;  %v804_v40 = vrot.slane %v3690_v17, 1  ;;  %v827_v0 = vrot.slane %v2694_v44, 1  ;;  %v3814_v1 = vld [vmem:[%s3265_s30 + $0xa4] ss:$0 sps:$4 sm:$0x11]  }
  0x93   : > { %v2710_v5 = vcombine.low %v2546_v51, %v3778_v14  ;;  %v3830_v62 = vld [vmem:[%s3265_s30 + $0xb0] ss:$0 sps:$4 sm:$0x11]  }
  0x94   : > { %v3725_v63 = vpop.permute.xlu1 %855  ;;  %1757 = vrot.lane.b32.xlu1 %v1686_v52, %s3181_s10  ;;  %v680_v52 = vor.u32 %v679_v21, %v675_v35  ;;  %v803_v3 = vrot.slane %v2686_v45, 1  ;;  %v589_v15 = vsel %vm517_vm1, %v584_v58, %v588_v46  ;;  %v829_v22 = vsel %vm790_vm0, %v827_v0, %v828_v7  ;;  %v3836_v51 = vld [vmem:[%s3265_s30 + $0x50] ss:$0 sps:$4 sm:$0x11]  }
  0x95   : > { %1741 = vrot.lane.b32.xlu0 %v1590_v11, %s3181_s10  ;;  %v684_v11 = vrot.slane %v682_v30, 1  ;;  %v3802_v30 = vld [vmem:[%s3265_s30 + $0x4c] sm:$0xf]  ;;  %v806_v21 = vrot.slane %v2687_v20, 1  ;;  %v1178_v12 = vshll.u32 %v2710_v5, 16 }
  0x96   : > { %v3735_v4 = vpop.permute.xlu0 %839  ;;  %v805_v35 = vsel %vm790_vm0, %v803_v3, %v804_v40  ;;  %v2703_v19 = vcombine.low %v2532_v27, %v3802_v30 }
  0x97   : > { %v685_v9 = vsel %vm517_vm1, %v680_v52, %v684_v11  ;;  %v808_v56 = vsel %vm790_vm0, %v806_v21, %v807_v37  ;;  %v1180_v46 = vrot.slane %v1178_v12, 1  ;;  %v1099_v37 = vshll.u32 %v3836_v51, 16 }
  0x98   : > { %1883 = vrot.lane.b32.xlu1 %v1847_v39, %s3182_s11  ;;  %v2695_v39 = vcombine.low %v250_v59, %v3698_v42  ;;  %v2548_v42 = vld [vmem:[%s3265_s30 + $0xa8] sm:$0xf]  ;;  %v1094_v58 = vshll.u32 %v2703_v19, 16  ;;  %v1183_v59 = vshll.u32 %v3814_v1, 16  ;;  %v1092_v21 = vshrl.u32 %v2703_v19, 16 }
  0x99   : > { %v3743_v24 = vpop.permute.xlu1 %857  ;;  %1867 = vrot.lane.b32.xlu0 %v1823_v36, %s3182_s11  ;;  %v3786_v36 = vld [vmem:[%s3265_s30 + $0x40] sm:$0xf] }
  0x9a   : > { %v830_v28 = vrot.slane %v2695_v39, 1  ;;  %v2702_v47 = vcombine.low %v2530_v33, %v3786_v36  ;;  %v1185_v20 = vrot.slane %v1183_v59, 1  ;;  %v2575_v59 = vld [vmem:[%s3265_s30 + $0x48] sm:$0xe] }
  0x9b   : > { %v3756_v55 = vpop.permute.xlu0 %841 }
  0x9c   : > { %734 = vrot.lane.b32.xlu1 %v673_v2, %s3177_s6  ;;  %v832_v43 = vsel %vm790_vm0, %v830_v28, %v831_v10  ;;  %v1082_v44 = vshll.u32 %v2702_v47, 16  ;;  %v1080_v7 = vshrl.u32 %v2702_v47, 16  ;;  %v1195_v28 = vshll.u32 %v3830_v62, 16  ;;  %v2574_v10 = vld [vmem:[%s3265_s30 + $0x3c] sm:$0xe] }
  0x9d   : > { %718 = vrot.lane.b32.xlu0 %v577_v13, %s3177_s6  ;;  %v2711_v13 = vcombine.low %v2548_v42, %v3794_v8 }
  0x9e   : > { %v3763_v54 = vpop.permute.xlu1 %712  ;;  %v1084_v40 = vrot.slane %v1082_v44, 1  ;;  %v3854_v44 = vld [vmem:[%s3265_s30 + $0xac] sm:$0xf] }
  0x9f   : > { %v3767_v60 = vpop.permute.xlu0 %710  ;;  %v1190_v11 = vshll.u32 %v2711_v13, 16  ;;  %v1188_v33 = vshrl.u32 %v2711_v13, 16 }
  0xa0   : > { %1885 = vrot.lane.b32.xlu1 %v1850_v48, %s3182_s11  ;;  %v3822_v48 = vld [vmem:[%s3265_s30 + $0x44] ss:$0 sps:$4 sm:$0x11]   ;;  %v1085_v42 = vor.u32 %v1084_v40, %v1080_v7  ;;  %v1101_v40 = vrot.slane %v1099_v37, 1 }
  0xa1   : > { %1869 = vrot.lane.b32.xlu0 %v1826_v34, %s3182_s11  ;;  %v1176_v34 = vshrl.u32 %v2710_v5, 16  ;;  %v1087_v3 = vshll.u32 %v3822_v48, 16  ;;  %v1316_v37 = vrot.slane %v3822_v48, 1 }
  0xa2   : > { %v3781_v17 = vpop.permute.xlu1 %728 }
  0xa3   : > { %v3788_v16 = vpop.permute.xlu0 %726  ;;  %v1181_v39 = vor.u32 %v1180_v46, %v1176_v34  ;;  %v1197_v46 = vrot.slane %v1195_v28, 1 }
  0xa4   : > { %736 = vrot.lane.b32.xlu1 %v685_v9, %s3177_s6 }
  0xa5   : > { %720 = vrot.lane.b32.xlu0 %v589_v15, %s3177_s6  ;;  %v2582_v15 = vld [vmem:[%s3265_s30 + $0x9c] sm:$0xe]  ;;  %v1186_v34 = vsel %vm517_vm1, %v1181_v39, %v1185_v20  ;;  %v3875_v39 = vld [vmem:[%s3265_s30 + $0xb8] sm:$0xf] }
  0xa6   : > { %v3804_v2 = vpop.permute.xlu1 %969 }
  0xa7   : > { %v3808_v32 = vpop.permute.xlu0 %953 }
  0xa8   : > { %863 = vrot.lane.b32.xlu1 %v829_v22, %s3176_s5  ;;  %v1192_v22 = vrot.slane %v1190_v11, 1  ;;  %v2583_v11 = vld [vmem:[%s3265_s30 + $0xa8] sm:$0xe] }
  0xa9   : > { %847 = vrot.lane.b32.xlu0 %v805_v35, %s3176_s5  ;;  %v1089_v35 = vrot.slane %v1087_v3, 1  ;;  %v2594_v3 = vld [vmem:[%s3265_s30 + $0x48] sm:$0xf] }
  0xaa   : > { %v3818_v45 = vpop.permute.xlu1 %1239 }
  0xab   : > { %v3824_v52 = vpop.permute.xlu0 %1223 }
  0xac   : > { %865 = vrot.lane.b32.xlu1 %v832_v43, %s3176_s5  ;;  %v2610_v43 = vld [vmem:[%s3265_s30 + $0xa8] sm:$0xf] }
  0xad   : > { %849 = vrot.lane.b32.xlu0 %v808_v56, %s3176_s5  ;;  %v2734_v56 = vcombine.low %v2574_v10, %v3786_v36  ;;  %v3868_v36 = vcombine.low %v2610_v43, %v3854_v44  ;;  %v3871_v10 = vld [vmem:[%s3265_s30 + $0x4c] sm:$0xf] }
  0xae   : > { %v3832_v0 = vpop.permute.xlu1 %1241 }
  0xaf   : > { %v3838_v9 = vpop.permute.xlu0 %1225 }
  0xb0   : > { %975 = vrot.lane.b32.xlu1 %v2710_v5, %s3175_s4  ;;  %v1096_v5 = vrot.slane %v1094_v58, 1  ;;  %v1193_v58 = vor.u32 %v1192_v22, %v1188_v33  ;;  %v2743_v33 = vcombine.low %v2583_v11, %v3794_v8  ;;  %v2735_v22 = vcombine.low %v2575_v59, %v3802_v30  ;;  %v3895_v30 = vld [vmem:[%s3265_s30 + $0x58] sm:$0xf]  ;;  %v3901_v11 = vld [vmem:[%s3265_s30 + $0xb0] ss:$0 sps:$4 sm:$0x11]  }
  0xb1   : > { %959 = vrot.lane.b32.xlu0 %v2702_v47, %s3175_s4  ;;  %v2742_v47 = vcombine.low %v2582_v15, %v3778_v14  ;;  %v1090_v14 = vsel %vm517_vm1, %v1085_v42, %v1089_v35  ;;  %v1340_v42 = vrot.slane %v3814_v1, 1  ;;  %v1315_v35 = vrot.slane %v2734_v56, 1  ;;  %v2596_v1 = vld [vmem:[%s3265_s30 + $0x54] sm:$0xf] }
  0xb2   : > { %v3845_v27 = vpop.permute.xlu1 %1367  ;;  %v1198_v28 = vsel %vm517_vm1, %v1193_v58, %v1197_v46  ;;  %v3888_v8 = vcombine.low %v2594_v3, %v3871_v10  ;;  %v1690_v56 = vshll.u32 %v3868_v36, 16  ;;  %v1343_v58 = vrot.slane %v3830_v62, 1 }
  0xb3   : > { %v3848_v12 = vpop.permute.xlu0 %1351  ;;  %v1339_v20 = vrot.slane %v2742_v47, 1  ;;  %v1318_v46 = vrot.slane %v2735_v22, 1  ;;  %v1319_v59 = vrot.slane %v3836_v51, 1  ;;  %v1317_v3 = vsel %vm790_vm0, %v1315_v35, %v1316_v37  ;;  %v3927_v35 = vld [vmem:[%s3265_s30 + $0x50] ss:$0 sps:$4 sm:$0x11]  }
  0xb4   : > { %977 = vrot.lane.b32.xlu1 %v2711_v13, %s3175_s4  ;;  %v1097_v13 = vor.u32 %v1096_v5, %v1092_v21  ;;  %v1688_v51 = vshrl.u32 %v3868_v36, 16  ;;  %v1913_v22 = vsel %vm1895_vm3, %v3297_v18, %v3788_v16  ;;  %v3937_v16 = vld [vmem:[%s3265_s30 + $0xbc] ss:$0 sps:$4 sm:$0x11]  }
  0xb5   : > { %961 = vrot.lane.b32.xlu0 %v2703_v19, %s3175_s4  ;;  %v2612_v19 = vld [vmem:[%s3265_s30 + $0xb4] sm:$0xf]  ;;  %v1341_v48 = vsel %vm790_vm0, %v1339_v20, %v1340_v42  ;;  %v1692_v20 = vrot.slane %v1690_v56, 1  ;;  %v1695_v42 = vshll.u32 %v3901_v11, 16 }
  0xb6   : > { %v3861_v7 = vpop.permute.xlu1 %1369  ;;  %v1102_v5 = vsel %vm517_vm1, %v1097_v13, %v1101_v40  ;;  %v3891_v47 = vcombine.low %v2612_v19, %v3875_v39  ;;  %v3910_v13 = vcombine.low %v2596_v1, %v3895_v30  ;;  %v1594_v19 = vshll.u32 %v3888_v8, 16 }
  0xb7   : > { %v3865_v15 = vpop.permute.xlu0 %1353  ;;  %v1320_v1 = vsel %vm790_vm0, %v1318_v46, %v1319_v59  ;;  %v3945_v46 = vld [vmem:[%s3265_s30 + $0x5c] ss:$0 sps:$4 sm:$0x11]  }
  0xb8   : > { %1247 = vrot.lane.b32.xlu1 %v1186_v34, %s3178_s7  ;;  %v1342_v34 = vrot.slane %v2743_v33, 1  ;;  %v1702_v33 = vshll.u32 %v3891_v47, 16  ;;  %v1606_v18 = vshll.u32 %v3910_v13, 16  ;;  %v1700_v6 = vshrl.u32 %v3891_v47, 16 }
  0xb9   : > { %1231 = vrot.lane.b32.xlu0 %v1090_v14, %s3178_s7  ;;  %v2646_v14 = vld [vmem:[%s3265_s30 + $0xa8] sm:$0xe]  ;;  %v1611_v57 = vshll.u32 %v3945_v46, 16 }
  0xba   : > { %v3883_v21 = vpop.permute.xlu1 %1479  ;;  %v1344_v37 = vsel %vm790_vm0, %v1342_v34, %v1343_v58  ;;  %v1704_v61 = vrot.slane %v1702_v33, 1  ;;  %v1693_v34 = vor.u32 %v1692_v20, %v1688_v51  ;;  %v1697_v58 = vrot.slane %v1695_v42, 1  ;;  %v217_v20 = vld [vmem:[%s3265_s30 + $0xa8] sm:$0xf]  ;;  %v3957_v42 = vld [vmem:[%s3265_s30 + $0xac] sm:$0xf] }
  0xbb   : > { %v3897_v43 = vpop.permute.xlu0 %1463  ;;  %v1707_v33 = vshll.u32 %v3937_v16, 16  ;;  %v1608_v51 = vrot.slane %v1606_v18, 1 }
  0xbc   : > { %1249 = vrot.lane.b32.xlu1 %v1198_v28, %s3178_s7  ;;  %v2790_v28 = vcombine.low %v2646_v14, %v3854_v44  ;;  %v1592_v44 = vshrl.u32 %v3888_v8, 16  ;;  %v1596_v14 = vrot.slane %v1594_v19, 1  ;;  %v1604_v19 = vshrl.u32 %v3910_v13, 16 }
  0xbd   : > { %1233 = vrot.lane.b32.xlu0 %v1102_v5, %s3178_s7  ;;  %v1897_v5 = vsel %vm1895_vm3, %v3302_v23, %v3767_v60  ;;  %v1946_v23 = vsel %vm1928_vm4, %v1913_v22, %v3725_v63  ;;  %v1698_v18 = vsel %vm517_vm1, %v1693_v34, %v1697_v58 }
  0xbe   : > { %v3912_v40 = vpop.permute.xlu1 %1481  ;;  %v1930_v59 = vsel %vm1928_vm4, %v1897_v5, %v3735_v4  ;;  %v1979_v4 = vsel %vm1961_vm5, %v1946_v23, %v3693_v41  ;;  %v1597_v5 = vor.u32 %v1596_v14, %v1592_v44  ;;  %v3963_v26 = vrot.slane %v2790_v28, 1  ;;  %v3975_v41 = vld [vmem:[%s3265_s30 + $0x4c] sm:$0xf] }
  0xbf   : > { %v3917_v62 = vpop.permute.xlu0 %1465  ;;  %v1609_v14 = vor.u32 %v1608_v51, %v1604_v19  ;;  %v4036_v51 = vld [vmem:[%s3265_s30 + $0xb8] sm:$0xf] }
  0xc0   : > { %1375 = vrot.lane.b32.xlu1 %v1341_v48, %s3179_s8  ;;  %v2638_v48 = vld [vmem:[%s3265_s30 + $0x48] sm:$0xe] }
  0xc1   : > { %1359 = vrot.lane.b32.xlu0 %v1317_v3, %s3179_s8  ;;  %v1599_v3 = vshll.u32 %v3927_v35, 16  ;;  %v2782_v63 = vcombine.low %v2638_v48, %v3871_v10  ;;  %v1963_v10 = vsel %vm1961_vm5, %v1930_v59, %v3707_v49  ;;  %v3984_v49 = vcombine.low %v217_v20, %v3957_v42 }
  0xc2   : > { %v1752_v56 = vpop.permute.xlu1 %1751 }
  0xc3   : > { %v1736_v60 = vpop.permute.xlu0 %1735 }
  0xc4   : > { %1377 = vrot.lane.b32.xlu1 %v1344_v37, %s3179_s8  ;;  %v1705_v37 = vor.u32 %v1704_v61, %v1700_v6  ;;  %v1996_v61 = vsel %vm1994_vm6, %v1963_v10, %v3824_v52  ;;  %v1709_v52 = vrot.slane %v1707_v33, 1  ;;  %v219_v33 = vld [vmem:[%s3265_s30 + $0xb4] sm:$0xf] }
  0xc5   : > { %1361 = vrot.lane.b32.xlu0 %v1320_v1, %s3179_s8  ;;  %v2012_v1 = vsel %vm1994_vm6, %v1979_v4, %v3818_v45  ;;  %v1601_v45 = vrot.slane %v1599_v3, 1  ;;  %v2029_v28 = vsel %vm2027_vm7, %v1996_v61, %v3848_v12  ;;  %v3999_v12 = vcombine.low %v201_v29, %v3975_v41 }
  0xc6   : > { %v3961_v22 = vpop.permute.xlu1 %1753  ;;  %v2045_v6 = vsel %vm2027_vm7, %v2012_v1, %v3845_v27  ;;  %v1915_v27 = vsel %vm1895_vm3, %v3309_v31, %v3781_v17  ;;  %v1613_v31 = vrot.slane %v1611_v57, 1  ;;  %v4007_v17 = vld [vmem:[%s3265_s30 + $0xb0] ss:$0 sps:$4 sm:$0x11]   ;;  %v1852_v29 = vrot.slane %v3901_v11, 1 }
  0xc7   : > { %v3969_v48 = vpop.permute.xlu0 %1737  ;;  %v2078_v44 = vsel %vm2060_vm8, %v2045_v6, %v3883_v21  ;;  %v1899_v21 = vsel %vm1895_vm3, %v3315_v38, %v3763_v54  ;;  %v1827_v38 = vrot.slane %v2782_v63, 1  ;;  %v689_v54 = vshll.u32 %v3984_v49, 16 }
  0xc8   : > { %1487 = vrot.lane.b32.xlu1 %v3868_v36, %s3180_s9  ;;  %v2062_v36 = vsel %vm2060_vm8, %v2029_v28, %v3897_v43  ;;  %v2111_v23 = vsel %vm2093_vm9, %v2078_v44, %v1752_v56  ;;  %v1948_v56 = vsel %vm1928_vm4, %v1915_v27, %v3743_v24  ;;  %v1602_v57 = vsel %vm517_vm1, %v1597_v5, %v1601_v45  ;;  %v203_v5 = vld [vmem:[%s3265_s30 + $0x54] sm:$0xf] }
  0xc9   : > { %1471 = vrot.lane.b32.xlu0 %v3888_v8, %s3180_s9  ;;  %v2095_v8 = vsel %vm2093_vm9, %v2062_v36, %v1736_v60  ;;  %v1828_v11 = vrot.slane %v3927_v35, 1  ;;  %v4024_v60 = vld [vmem:[%s3265_s30 + $0x50] ss:$0 sps:$4 sm:$0x11]   ;;  %v1981_v3 = vsel %vm1961_vm5, %v1948_v56, %v3804_v2  ;;  %v1932_v24 = vsel %vm1928_vm4, %v1899_v21, %v3756_v55  ;;  %v2647_v45 = vld [vmem:[%s3265_s30 + $0xb4] sm:$0xe] }
  0xca   : > { %v1880_v34 = vpop.permute.xlu1 %1879  ;;  %v593_v63 = vshll.u32 %v3999_v12, 16  ;;  %v1965_v35 = vsel %vm1961_vm5, %v1932_v24, %v3808_v32  ;;  %v2014_v2 = vsel %vm1994_vm6, %v1981_v3, %v3832_v0  ;;  %v1614_v55 = vsel %vm517_vm1, %v1609_v14, %v1613_v31  ;;  %v2639_v28 = vld [vmem:[%s3265_s30 + $0x54] sm:$0xe] }
  0xcb   : > { %v1864_v58 = vpop.permute.xlu0 %1863  ;;  %v2144_v59 = vsel %vm2126_vm10, %v2111_v23, %v1880_v34  ;;  %v694_v4 = vshll.u32 %v4007_v17, 16  ;;  %v1998_v1 = vsel %vm1994_vm6, %v1965_v35, %v3838_v9  ;;  %v2047_v10 = vsel %vm2027_vm7, %v2014_v2, %v3861_v7 }
  0xcc   : > { %1489 = vrot.lane.b32.xlu1 %v3891_v47, %s3180_s9  ;;  %v2128_v43 = vsel %vm2126_vm10, %v2095_v8, %v1864_v58  ;;  %2861 = vmatprep.mubr.msk.bf16.mxu1 %vm2186_vm11, %v2144_v59  ;;  %v1710_v47 = vsel %vm517_vm1, %v1705_v37, %v1709_v52  ;;  %v4048_v37 = vld [vmem:[%s3265_s30 + $0x58] sm:$0xf]  ;;  %v691_v32 = vrot.slane %v689_v54, 1  ;;  %v591_v0 = vshrl.u32 %v3999_v12, 16 }
  0xcd   : > { %1473 = vrot.lane.b32.xlu0 %v3910_v13, %s3180_s9  ;;  %2845 = vmatprep.mubr.msk.bf16.mxu0 %vm2186_vm11, %v2128_v43  ;;  %v687_v13 = vshrl.u32 %v3984_v49, 16  ;;  %v2031_v61 = vsel %vm2027_vm7, %v1998_v1, %v3865_v15  ;;  %v2080_v6 = vsel %vm2060_vm8, %v2047_v10, %v3912_v40  ;;  %v598_v9 = vshll.u32 %v4024_v60, 16  ;;  %v4087_v8 = vld [vmem:[%s3265_s30 + $0xbc] ss:$0 sps:$4 sm:$0x11]  }
  0xce   : > { %v4030_v19 = vpop.permute.xlu1 %730  ;;  %v4065_v44 = vcombine.low %v219_v33, %v4036_v51  ;;  %v2064_v7 = vsel %vm2060_vm8, %v2031_v61, %v3917_v62  ;;  %v595_v15 = vrot.slane %v593_v63, 1  ;;  %v4072_v40 = vcombine.low %v203_v5, %v4048_v37  ;;  %v4094_v43 = vld [vmem:[%s3265_s30 + $0x5c] ss:$0 sps:$4 sm:$0x11]  }
  0xcf   : > { %v4042_v20 = vpop.permute.xlu0 %714  ;;  %v2097_v14 = vsel %vm2093_vm9, %v2064_v7, %v3969_v48  ;;  %v2791_v23 = vcombine.low %v2647_v45, %v3875_v39  ;;  %v2783_v62 = vcombine.low %v2639_v28, %v3895_v30  ;;  %v692_v48 = vor.u32 %v691_v32, %v687_v13  ;;  %v252_v28 = vld [vmem:[%s3265_s30 + $0xb4] sm:$0xe] }
  0xd0   : > { %1759 = vrot.lane.b32.xlu1 %v1698_v18, %s3181_s10  ;;  %v2113_v18 = vsel %vm2093_vm9, %v2080_v6, %v3961_v22  ;;  %v1853_v22 = vsel %vm790_vm0, %v3963_v26, %v1852_v29  ;;  %v696_v21 = vrot.slane %v694_v4, 1  ;;  %v701_v39 = vshll.u32 %v4065_v44, 16  ;;  %v244_v7 = vld [vmem:[%s3265_s30 + $0x54] sm:$0xe] }
  0xd1   : > { %1743 = vrot.lane.b32.xlu0 %v1602_v57, %s3181_s10  ;;  %v1829_v58 = vsel %vm790_vm0, %v1827_v38, %v1828_v11  ;;  %v596_v59 = vor.u32 %v595_v15, %v591_v0  ;;  %v600_v31 = vrot.slane %v598_v9, 1  ;;  %v605_v54 = vshll.u32 %v4072_v40, 16 }
  0xd2   : > { %v1882_v52 = vpop.permute.xlu1 %1881  ;;  %v1854_v26 = vrot.slane %v2791_v23, 1  ;;  %v1855_v29 = vrot.slane %v3937_v16, 1  ;;  %v1830_v57 = vrot.slane %v2783_v62, 1  ;;  %v697_v38 = vsel %vm517_vm1, %v692_v48, %v696_v21  ;;  %v2550_v62 = vld [vmem:[%s3265_s30 + $0xb4] sm:$0xf] }
  0xd3   : > { %v2146_v27 = vsel %vm2126_vm10, %v2113_v18, %v1882_v52  ;;  %v1866_v36 = vpop.permute.xlu0 %1865  ;;  %v699_v11 = vshrl.u32 %v4065_v44, 16  ;;  %v703_v3 = vrot.slane %v701_v39, 1  ;;  %v706_v24 = vshll.u32 %v4087_v8, 16  ;;  %v2534_v48 = vld [vmem:[%s3265_s30 + $0x54] sm:$0xf] }
  0xd4   : > { %v2130_v34 = vsel %vm2126_vm10, %v2097_v14, %v1866_v36  ;;  %1761 = vrot.lane.b32.xlu1 %v1710_v47, %s3181_s10  ;;  %2862 = vmatmul.mubr.msk.bf16.vlgmr.msra.gmra.mxu1 %vm2186_vm11, %v2146_v27  ;;  %v1831_v47 = vrot.slane %v3945_v46, 1  ;;  %v601_v63 = vsel %vm517_vm1, %v596_v59, %v600_v31  ;;  %v603_v33 = vshrl.u32 %v4072_v40, 16  ;;  %v251_v46 = vld [vmem:[%s3265_s30 + $0xa8] sm:$0xe] }
  0xd5   : > { %1745 = vrot.lane.b32.xlu0 %v1614_v55, %s3181_s10  ;;  %2846 = vmatmul.mubr.msk.bf16.vlgmr.msra.gmra.mxu0 %vm2186_vm11, %v2130_v34  ;;  %v607_v35 = vrot.slane %v605_v54, 1  ;;  %v610_v16 = vshll.u32 %v4094_v43, 16  ;;  %v243_v55 = vld [vmem:[%s3265_s30 + $0x48] sm:$0xe]  ;;  %v1856_v4 = vsel %vm790_vm0, %v1854_v26, %v1855_v29  ;;  %v704_v5 = vor.u32 %v703_v3, %v699_v11  ;;  %v4139_v34 = vld [vmem:[%s3265_s30 + $0xb8] sm:$0xf] }
  0xd6   : > { %v4090_v30 = vpop.permute.xlu1 %732  ;;  %v708_v1 = vrot.slane %v706_v24, 1  ;;  %v2696_v10 = vcombine.low %v251_v46, %v3957_v42  ;;  %v1832_v0 = vsel %vm790_vm0, %v1830_v57, %v1831_v47  ;;  %v2688_v45 = vcombine.low %v243_v55, %v3975_v41  ;;  %v2552_v26 = vld [vmem:[%s3265_s30 + $0xc0] sm:$0xf]  ;;  %v4159_v29 = vld [vmem:[%s3265_s30 + $0xc4] sm:$0xf] }
  0xd7   : > { %v4097_v56 = vpop.permute.xlu0 %716  ;;  %v608_v61 = vor.u32 %v607_v35, %v603_v33  ;;  %v612_v6 = vrot.slane %v610_v16, 1  ;;  %v834_v52 = vrot.slane %v4007_v17, 1  ;;  %v2697_v15 = vcombine.low %v252_v28, %v4036_v51  ;;  %v4145_v17 = vld [vmem:[%s3265_s30 + $0x58] sm:$0xf]  ;;  %v2536_v47 = vld [vmem:[%s3265_s30 + $0x60] sm:$0xf] }
  0xd8   : > { %1887 = vrot.lane.b32.xlu1 %v1853_v22, %s3182_s11  ;;  %v709_v42 = vsel %vm517_vm1, %v704_v5, %v708_v1  ;;  %v833_v18 = vrot.slane %v2696_v10, 1  ;;  %v809_v27 = vrot.slane %v2688_v45, 1  ;;  %v810_v36 = vrot.slane %v4024_v60, 1  ;;  %v4175_v24 = vld [vmem:[%s3265_s30 + $0x5c] ss:$0 sps:$4 sm:$0x11]  }
  0xd9   : > { %1871 = vrot.lane.b32.xlu0 %v1829_v58, %s3182_s11  ;;  %v613_v41 = vsel %vm517_vm1, %v608_v61, %v612_v6  ;;  %v2689_v23 = vcombine.low %v244_v7, %v4048_v37  ;;  %v836_v51 = vrot.slane %v2697_v15, 1  ;;  %v837_v37 = vrot.slane %v4087_v8, 1  ;;  %v4169_v8 = vld [vmem:[%s3265_s30 + $0xbc] ss:$0 sps:$4 sm:$0x11]  }
  0xda   : > { %v4106_v13 = vpop.permute.xlu1 %859  ;;  %v835_v60 = vsel %vm790_vm0, %v833_v18, %v834_v52  ;;  %v2712_v21 = vcombine.low %v2550_v62, %v4139_v34  ;;  %v811_v58 = vsel %vm790_vm0, %v809_v27, %v810_v36  ;;  %v813_v31 = vrot.slane %v4094_v43, 1  ;;  %v4188_v10 = vld [vmem:[%s3265_s30 + $0xc8] ss:$0 sps:$4 sm:$0x11]  }
  0xdb   : > { %v4112_v2 = vpop.permute.xlu0 %843  ;;  %v812_v59 = vrot.slane %v2689_v23, 1  ;;  %v2704_v54 = vcombine.low %v2534_v48, %v4145_v17  ;;  %v838_v11 = vsel %vm790_vm0, %v836_v51, %v837_v37  ;;  %v2713_v43 = vcombine.low %v2552_v26, %v4159_v29  ;;  %v4193_v28 = vld [vmem:[%s3265_s30 + $0x68] ss:$0 sps:$4 sm:$0x11]   ;;  %v2584_v37 = vld [vmem:[%s3265_s30 + $0xb4] sm:$0xe] }
  0xdc   : > { %738 = vrot.lane.b32.xlu1 %v697_v38, %s3177_s6  ;;  %v4165_v38 = vld [vmem:[%s3265_s30 + $0x64] sm:$0xf]  ;;  %v1202_v3 = vshll.u32 %v2712_v21, 16  ;;  %v1200_v55 = vshrl.u32 %v2712_v21, 16  ;;  %v1111_v1 = vshll.u32 %v4175_v24, 16  ;;  %v1219_v36 = vshll.u32 %v4188_v10, 16 }
  0xdd   : > { %722 = vrot.lane.b32.xlu0 %v601_v63, %s3177_s6  ;;  %v814_v33 = vsel %vm790_vm0, %v812_v59, %v813_v31  ;;  %v2705_v35 = vcombine.low %v2536_v47, %v4165_v38  ;;  %v1106_v16 = vshll.u32 %v2704_v54, 16  ;;  %v1104_v6 = vshrl.u32 %v2704_v54, 16 }
  0xde   : > { %v4119_v32 = vpop.permute.xlu1 %861  ;;  %v1204_v5 = vrot.slane %v1202_v3, 1  ;;  %v1212_v52 = vshrl.u32 %v2713_v43, 16  ;;  %v1123_v51 = vshll.u32 %v4193_v28, 16  ;;  %v2744_v26 = vcombine.low %v2584_v37, %v4139_v34 }
  0xdf   : > { %v4124_v9 = vpop.permute.xlu0 %845  ;;  %v1108_v45 = vrot.slane %v1106_v16, 1  ;;  %v1118_v7 = vshll.u32 %v2705_v35, 16  ;;  %v1116_v48 = vshrl.u32 %v2705_v35, 16 }
  0xe0   : > { %1889 = vrot.lane.b32.xlu1 %v1856_v4, %s3182_s11  ;;  %v1207_v4 = vshll.u32 %v4169_v8, 16  ;;  %v1205_v15 = vor.u32 %v1204_v5, %v1200_v55  ;;  %v2585_v55 = vld [vmem:[%s3265_s30 + $0xc0] sm:$0xe]  ;;  %v1346_v5 = vrot.slane %v4169_v8, 1 }
  0xe1   : > { %1873 = vrot.lane.b32.xlu0 %v1832_v0, %s3182_s11  ;;  %v1214_v0 = vshll.u32 %v2713_v43, 16  ;;  %v1109_v62 = vor.u32 %v1108_v45, %v1104_v6 }
  0xe2   : > { %v4132_v14 = vpop.permute.xlu1 %971  ;;  %v1209_v18 = vrot.slane %v1207_v4, 1  ;;  %v1345_v4 = vrot.slane %v2744_v26, 1 }
  0xe3   : > { %v4141_v22 = vpop.permute.xlu0 %955  ;;  %v1216_v27 = vrot.slane %v1214_v0, 1  ;;  %v4226_v0 = vld [vmem:[%s3265_s30 + $0xc4] sm:$0xf] }
  0xe4   : > { %740 = vrot.lane.b32.xlu1 %v709_v42, %s3177_s6  ;;  %v1210_v59 = vsel %vm517_vm1, %v1205_v15, %v1209_v18  ;;  %v1322_v18 = vrot.slane %v4175_v24, 1  ;;  %v2598_v15 = vld [vmem:[%s3265_s30 + $0x60] sm:$0xf]  ;;  %v1347_v24 = vsel %vm790_vm0, %v1345_v4, %v1346_v5  ;;  %v4277_v4 = vld [vmem:[%s3265_s30 + $0xd4] ss:$0 sps:$4 sm:$0x11]  }
  0xe5   : > { %724 = vrot.lane.b32.xlu0 %v613_v41, %s3177_s6  ;;  %v1113_v41 = vrot.slane %v1111_v1, 1  ;;  %v1217_v31 = vor.u32 %v1216_v27, %v1212_v52  ;;  %v2745_v1 = vcombine.low %v2585_v55, %v4159_v29  ;;  %v2616_v27 = vld [vmem:[%s3265_s30 + $0xcc] sm:$0xf]  ;;  %s4491_s6 = scalar_lea.vmem [#allocation2], %s2520_s29 }
  0xe6   : > { %v4152_v39 = vpop.permute.xlu1 %973 }
  0xe7   : > { %v4161_v57 = vpop.permute.xlu0 %957 }
  0xe8   : > { %867 = vrot.lane.b32.xlu1 %v835_v60, %s3176_s5  ;;  %v1120_v60 = vrot.slane %v1118_v7, 1 }
  0xe9   : > { %851 = vrot.lane.b32.xlu0 %v811_v58, %s3176_s5  ;;  %v2576_v58 = vld [vmem:[%s3265_s30 + $0x54] sm:$0xe] }
  0xea   : > { %v4177_v63 = vpop.permute.xlu1 %1243  ;;  %v1121_v3 = vor.u32 %v1120_v60, %v1116_v48  ;;  %v2736_v16 = vcombine.low %v2576_v58, %v4145_v17  ;;  %v2614_v17 = vld [vmem:[%s3265_s30 + $0xc0] sm:$0xf]  ;;  %v4250_v60 = vld [vmem:[%s3265_s30 + $0xc8] ss:$0 sps:$4 sm:$0x11]  }
  0xeb   : > { %v4181_v46 = vpop.permute.xlu0 %1227  ;;  %v2760_v29 = vcombine.low %v2614_v17, %v4226_v0 }
  0xec   : > { %869 = vrot.lane.b32.xlu1 %v838_v11, %s3176_s5  ;;  %v1114_v11 = vsel %vm517_vm1, %v1109_v62, %v1113_v41  ;;  %v1321_v7 = vrot.slane %v2736_v16, 1  ;;  %v4235_v41 = vld [vmem:[%s3265_s30 + $0x64] sm:$0xf]  ;;  %v1349_v62 = vrot.slane %v4188_v10, 1  ;;  %v1719_v16 = vshll.u32 %v4250_v60, 16 }
  0xed   : > { %853 = vrot.lane.b32.xlu0 %v814_v33, %s3176_s5  ;;  %v1125_v33 = vrot.slane %v1123_v51, 1  ;;  %v2752_v48 = vcombine.low %v2598_v15, %v4235_v41  ;;  %v4266_v10 = vld [vmem:[%s3265_s30 + $0x68] ss:$0 sps:$4 sm:$0x11]  }
  0xee   : > { %v4190_v61 = vpop.permute.xlu1 %1245  ;;  %v1323_v37 = vsel %vm790_vm0, %v1321_v7, %v1322_v18  ;;  %v1623_v17 = vshll.u32 %v4266_v10, 16  ;;  %v1917_v7 = vsel %vm1895_vm3, %v3450_v50, %v4030_v19 }
  0xef   : > { %v4195_v42 = vpop.permute.xlu0 %1229  ;;  %v1126_v45 = vsel %vm517_vm1, %v1121_v3, %v1125_v33  ;;  %v1714_v3 = vshll.u32 %v2760_v29, 16 }
  0xf0   : > { %979 = vrot.lane.b32.xlu1 %v2712_v21, %s3175_s4 }
  0xf1   : > { %963 = vrot.lane.b32.xlu0 %v2704_v54, %s3175_s4  ;;  %v1221_v54 = vrot.slane %v1219_v36, 1  ;;  %v4243_v36 = vld [vmem:[%s3265_s30 + $0xd0] sm:$0xf]  ;;  %v1716_v18 = vrot.slane %v1714_v3, 1  ;;  %v1625_v3 = vrot.slane %v1623_v17, 1 }
  0xf2   : > { %v4200_v23 = vpop.permute.xlu1 %1371  ;;  %v4260_v26 = vcombine.low %v2616_v27, %v4243_v36  ;;  %v1901_v27 = vsel %vm1895_vm3, %v3453_v53, %v4042_v20  ;;  %v1731_v53 = vshll.u32 %v4277_v4, 16 }
  0xf3   : > { %v4204_v21 = vpop.permute.xlu0 %1355  ;;  %v1222_v34 = vsel %vm517_vm1, %v1217_v31, %v1221_v54  ;;  %v2600_v31 = vld [vmem:[%s3265_s30 + $0x6c] sm:$0xf]  ;;  %v1934_v50 = vsel %vm1928_vm4, %v1901_v27, %v4112_v2 }
  0xf4   : > { %981 = vrot.lane.b32.xlu1 %v2713_v43, %s3175_s4  ;;  %v1724_v15 = vshrl.u32 %v4260_v26, 16 }
  0xf5   : > { %965 = vrot.lane.b32.xlu0 %v2705_v35, %s3175_s4  ;;  %v2577_v35 = vld [vmem:[%s3265_s30 + $0x60] sm:$0xe] }
  0xf6   : > { %v4211_v47 = vpop.permute.xlu1 %1373  ;;  %v2737_v52 = vcombine.low %v2577_v35, %v4165_v38  ;;  %v1348_v38 = vrot.slane %v2745_v1, 1  ;;  %v1712_v1 = vshrl.u32 %v2760_v29, 16 }
  0xf7   : > { %v4216_v43 = vpop.permute.xlu0 %1357 }
  0xf8   : > { %1251 = vrot.lane.b32.xlu1 %v1210_v59, %s3178_s7  ;;  %v1324_v58 = vrot.slane %v2737_v52, 1  ;;  %v1325_v59 = vrot.slane %v4193_v28, 1  ;;  %v1350_v33 = vsel %vm790_vm0, %v1348_v38, %v1349_v62  ;;  %v1618_v28 = vshll.u32 %v2752_v48, 16 }
  0xf9   : > { %1235 = vrot.lane.b32.xlu0 %v1114_v11, %s3178_s7  ;;  %v4263_v11 = vld [vmem:[%s3265_s30 + $0x70] sm:$0xf]  ;;  %v1616_v52 = vshrl.u32 %v2752_v48, 16  ;;  %v1721_v38 = vrot.slane %v1719_v16, 1  ;;  %v1717_v16 = vor.u32 %v1716_v18, %v1712_v1 }
  0xfa   : > { %v4228_v6 = vpop.permute.xlu1 %1483  ;;  %v1326_v35 = vsel %vm790_vm0, %v1324_v58, %v1325_v59  ;;  %v1620_v62 = vrot.slane %v1618_v28, 1 }
  0xfb   : > { %v4237_v8 = vpop.permute.xlu0 %1467 }
  0xfc   : > { %1253 = vrot.lane.b32.xlu1 %v1222_v34, %s3178_s7  ;;  %v4274_v34 = vcombine.low %v2600_v31, %v4263_v11  ;;  %v1621_v17 = vor.u32 %v1620_v62, %v1616_v52  ;;  %v1919_v52 = vsel %vm1895_vm3, %v3488_v25, %v4090_v30 }
  0xfd   : > { %1237 = vrot.lane.b32.xlu0 %v1126_v45, %s3178_s7  ;;  %v1726_v45 = vshll.u32 %v4260_v26, 16  ;;  %s2819_s7 = sshll.u32 %s3165_s15, 12 }
  0xfe   : > { %v4252_v51 = vpop.permute.xlu1 %1485  ;;  %v1630_v20 = vshll.u32 %v4274_v34, 16  ;;  %v1628_v28 = vshrl.u32 %v4274_v34, 16  ;;  %v1626_v25 = vsel %vm517_vm1, %v1621_v17, %v1625_v3  ;;  %s4556_s15 = scalar_lea.hbm %s4615_s3, %s2819_s7 }
  0xff   : > { %v4257_v54 = vpop.permute.xlu0 %1469 }
 0x100   : > { %1379 = vrot.lane.b32.xlu1 %v1347_v24, %s3179_s8  ;;  %v1950_v24 = vsel %vm1928_vm4, %v1917_v7, %v4106_v13  ;;  %v1967_v13 = vsel %vm1961_vm5, %v1934_v50, %v4141_v22  ;;  %v1632_v7 = vrot.slane %v1630_v20, 1 }
 0x101   : > { %1363 = vrot.lane.b32.xlu0 %v1323_v37, %s3179_s8  ;;  %v4293_v37 = vld [vmem:[%s3265_s30 + $0x74] ss:$0 sps:$4 sm:$0x11]   ;;  %v1983_v19 = vsel %vm1961_vm5, %v1950_v24, %v4132_v14  ;;  %v2000_v2 = vsel %vm1994_vm6, %v1967_v13, %v4181_v46 }
 0x102   : > { %v1756_v55 = vpop.permute.xlu1 %1755  ;;  %v2016_v59 = vsel %vm1994_vm6, %v1983_v19, %v4177_v63  ;;  %v2033_v22 = vsel %vm2027_vm7, %v2000_v2, %v4204_v21  ;;  %v1635_v46 = vshll.u32 %v4293_v37, 16  ;;  %v2641_v19 = vld [vmem:[%s3265_s30 + $0x6c] sm:$0xe] }
 0x103   : > { %v1740_v5 = vpop.permute.xlu0 %1739  ;;  %v2049_v14 = vsel %vm2027_vm7, %v2016_v59, %v4200_v23  ;;  %v2066_v23 = vsel %vm2060_vm8, %v2033_v22, %v4237_v8  ;;  %v1837_v22 = vrot.slane %v4293_v37, 1 }
 0x104   : > { %1381 = vrot.lane.b32.xlu1 %v1350_v33, %s3179_s8  ;;  %v1728_v33 = vrot.slane %v1726_v45, 1  ;;  %v2082_v63 = vsel %vm2060_vm8, %v2049_v14, %v4228_v6  ;;  %v1733_v45 = vrot.slane %v1731_v53, 1  ;;  %v2099_v18 = vsel %vm2093_vm9, %v2066_v23, %v1740_v5  ;;  %v4628_v5 = vld [vmem:[#allocation5_spill] sm:$0xff] }
 0x105   : > { %1365 = vrot.lane.b32.xlu0 %v1326_v35, %s3179_s8  ;;  %v2648_v35 = vld [vmem:[%s3265_s30 + $0xc0] sm:$0xe]  ;;  %v1637_v30 = vrot.slane %v1635_v46, 1  ;;  %s2432_s8 = sshll.u32 %s4491_s6, 4  ;;  %s4560_s8 = int_to_ptr.vmem [resolvable:$true] %s2432_s8 }
 0x106   : > { %v4299_v58 = vpop.permute.xlu1 %1757  ;;  %v1729_v24 = vor.u32 %v1728_v33, %v1724_v15  ;;  %v2792_v6 = vcombine.low %v2648_v35, %v4226_v0  ;;  %v1903_v0 = vsel %vm1895_vm3, %v4628_v5, %v4097_v56  ;;  %v1952_v15 = vsel %vm1928_vm4, %v1919_v52, %v4119_v32  ;;  %v2649_v32 = vld [vmem:[%s3265_s30 + $0xcc] sm:$0xe]  ;;  %s3097_s18 = scalar_lea.vmem %s4560_s8, 4096  ;;  %p3104_p1 = scmp.lt.s32.totalorder %s4560_s8, %s3102_s21 }
 0x107   : > { %v4307_v31 = vpop.permute.xlu0 %1741  ;;  %v1633_v56 = vor.u32 %v1632_v7, %v1628_v28  ;;  %v2793_v33 = vcombine.low %v2649_v32, %v4243_v36  ;;  %p3098_p12 = scmp.ne.s32.totalorder %s4560_s8, %s3097_s18  ;;  %p3105_p2 = scmp.lt.s32.totalorder %s3103_s23, %s3097_s18 }
 0x108   : > { %1491 = vrot.lane.b32.xlu1 %v2760_v29, %s3180_s9  ;;  %v2115_v29 = vsel %vm2093_vm9, %v2082_v63, %v1756_v55  ;;  %v1722_v55 = vsel %vm517_vm1, %v1717_v16, %v1721_v38  ;;  %v1985_v38 = vsel %vm1961_vm5, %v1952_v15, %v4152_v39  ;;  %v1857_v13 = vrot.slane %v2792_v6, 1 }
 0x109   : > { %1475 = vrot.lane.b32.xlu0 %v2752_v48, %s3180_s9  ;;  %v2640_v48 = vld [vmem:[%s3265_s30 + $0x60] sm:$0xe]  ;;  %v2018_v53 = vsel %vm1994_vm6, %v1985_v38, %v4190_v61  ;;  %v4629_v38 = vld [vmem:[#allocation6_spill] sm:$0xff]  ;;  %p3099_p13 = pnand %p3098_p12, %p3245_p4  ;;  %p3106_p3 = por %p3105_p2, %p3104_p1 }
 0x10a   : > { %v1884_v1 = vpop.permute.xlu1 %1883  ;;  %v2784_v50 = vcombine.low %v2640_v48, %v4235_v41  ;;  %v2051_v59 = vsel %vm2027_vm7, %v2018_v53, %v4211_v47  ;;  %v1858_v41 = vrot.slane %v4250_v60, 1 }
 0x10b   : > { %v2148_v21 = vsel %vm2126_vm10, %v2115_v29, %v1884_v1  ;;  %v1868_v27 = vpop.permute.xlu0 %1867  ;;  %v2084_v3 = vsel %vm2060_vm8, %v2051_v59, %v4252_v51  ;;  %p3100_p0 = pneg %p3099_p13 }
 0x10c   : > { %v2132_v8 = vsel %vm2126_vm10, %v2099_v18, %v1868_v27  ;;  %1493 = vrot.lane.b32.xlu1 %v4260_v26, %s3180_s9  ;;  %2865 = vmatprep.mubr.msk.bf16.mxu1 %vm2186_vm11, %v2148_v21  ;;  %v1936_v26 = vsel %vm1928_vm4, %v1903_v0, %v4124_v9  ;;  %v1734_v9 = vsel %vm517_vm1, %v1729_v24, %v1733_v45  ;;  %v1833_v14 = vrot.slane %v2784_v50, 1  ;;  %v4630_v50 = vld [vmem:[#allocation7_spill] sm:$0xff] }
 0x10d   : > { %1477 = vrot.lane.b32.xlu0 %v4274_v34, %s3180_s9  ;;  %2849 = vmatprep.mubr.msk.bf16.mxu0 %vm2186_vm11, %v2132_v8  ;;  %v1969_v34 = vsel %vm1961_vm5, %v1936_v26, %v4161_v57  ;;  %v1834_v57 = vrot.slane %v4266_v10, 1  ;;  %v2117_v60 = vsel %vm2093_vm9, %v2084_v3, %v4299_v58  ;;  %v1638_v10 = vsel %vm517_vm1, %v1633_v56, %v1637_v30  ;;  %p3107_p5 = pnand %p3106_p3, %p3100_p0 }
 0x10e   : > { %v4350_v62 = vpop.permute.xlu1 %734  ;;  %v2002_v39 = vsel %vm1994_vm6, %v1969_v34, %v4195_v42  ;;  %v2785_v42 = vcombine.low %v2641_v19, %v4263_v11  ;;  %v1860_v11 = vrot.slane %v2793_v33, 1  ;;  %v1861_v58 = vrot.slane %v4277_v4, 1 }
 0x10f   : > { %v4359_v20 = vpop.permute.xlu0 %718  ;;  %v2035_v61 = vsel %vm2027_vm7, %v2002_v39, %v4216_v43  ;;  %v1921_v56 = vsel %vm1895_vm3, %v4629_v38, %v4350_v62 }
 0x110   : > { %1763 = vrot.lane.b32.xlu1 %v1722_v55, %s3181_s10  ;;  %v2068_v47 = vsel %vm2060_vm8, %v2035_v61, %v4257_v54  ;;  %v1859_v54 = vsel %vm790_vm0, %v1857_v13, %v1858_v41  ;;  %v1836_v35 = vrot.slane %v2785_v42, 1  ;;  %v1862_v17 = vsel %vm790_vm0, %v1860_v11, %v1861_v58 }
 0x111   : > { %1747 = vrot.lane.b32.xlu0 %v1626_v25, %s3181_s10  ;;  %v2101_v43 = vsel %vm2093_vm9, %v2068_v47, %v4307_v31  ;;  %v1835_v31 = vsel %vm790_vm0, %v1833_v14, %v1834_v57  ;;  %v1905_v32 = vsel %vm1895_vm3, %v4630_v50, %v4359_v20 }
 0x112   : > { %v1886_v2 = vpop.permute.xlu1 %1885  ;;  %v1838_v23 = vsel %vm790_vm0, %v1836_v35, %v1837_v22 }
 0x113   : > { %v2150_v51 = vsel %vm2126_vm10, %v2117_v60, %v1886_v2  ;;  %v1870_v16 = vpop.permute.xlu0 %1869  ;;  %v4631_v2 = vld [vmem:[#allocation8_spill] sm:$0xff] }
 0x114   : > { %v2134_v36 = vsel %vm2126_vm10, %v2101_v43, %v1870_v16  ;;  %1765 = vrot.lane.b32.xlu1 %v1734_v9, %s3181_s10  ;;  %2866 = vmatmul.mubr.msk.bf16.gmra.mxu1 %vm2186_vm11, %v2150_v51  ;;  %v4632_v43 = vld [vmem:[#allocation9_spill] sm:$0xff] }
 0x115   : > { %1749 = vrot.lane.b32.xlu0 %v1638_v10, %s3181_s10  ;;  %2850 = vmatmul.mubr.msk.bf16.gmra.mxu0 %vm2186_vm11, %v2134_v36 }
 0x116   : > { %v737_v28 = vpop.permute.xlu1 %736 }
 0x117   : > { %v721_v63 = vpop.permute.xlu0 %720  ;;  %v1923_v10 = vsel %vm1895_vm3, %v4631_v2, %v737_v28 }
 0x118   : > { %1891 = vrot.lane.b32.xlu1 %v1859_v54, %s3182_s11  ;;  %v1907_v51 = vsel %vm1895_vm3, %v4632_v43, %v721_v63 }
 0x119   : > { %1875 = vrot.lane.b32.xlu0 %v1835_v31, %s3182_s11 }
 0x11a   : > { %v864_v46 = vpop.permute.xlu1 %863 }
 0x11b   : > { %v848_v29 = vpop.permute.xlu0 %847  ;;  %v1954_v19 = vsel %vm1928_vm4, %v1921_v56, %v864_v46 }
 0x11c   : > { %1893 = vrot.lane.b32.xlu1 %v1862_v17, %s3182_s11  ;;  %v1938_v34 = vsel %vm1928_vm4, %v1905_v32, %v848_v29 }
 0x11d   : > { %1877 = vrot.lane.b32.xlu0 %v1838_v23, %s3182_s11  ;;  %s4566_s11 = scalar_lea.sflag [#allocation3], %s175_s28 }
 0x11e   : > { %v866_v4 = vpop.permute.xlu1 %865 }
 0x11f   : > { %v850_v1 = vpop.permute.xlu0 %849  ;;  %v1956_v16 = vsel %vm1928_vm4, %v1923_v10, %v866_v4 }
 0x120   : > { %v1940_v36 = vsel %vm1928_vm4, %v1907_v51, %v850_v1 }
 0x122   : > { %v976_v45 = vpop.permute.xlu1 %975 }
 0x123   : > { %v960_v7 = vpop.permute.xlu0 %959  ;;  %v1987_v53 = vsel %vm1961_vm5, %v1954_v19, %v976_v45 }
 0x124   : > { %v1971_v13 = vsel %vm1961_vm5, %v1938_v34, %v960_v7 }
 0x126   : > { %v978_v37 = vpop.permute.xlu1 %977 }
 0x127   : > { %v962_v18 = vpop.permute.xlu0 %961  ;;  %v1989_v54 = vsel %vm1961_vm5, %v1956_v16, %v978_v37 }
 0x128   : > { %v1973_v58 = vsel %vm1961_vm5, %v1940_v36, %v962_v18 }
 0x12a   : > { %v1248_v21 = vpop.permute.xlu1 %1247 }
 0x12b   : > { %v1232_v27 = vpop.permute.xlu0 %1231  ;;  %v2020_v39 = vsel %vm1994_vm6, %v1987_v53, %v1248_v21 }
 0x12c   : > { %v2004_v41 = vsel %vm1994_vm6, %v1971_v13, %v1232_v27 }
 0x12e   : > { %v1250_v24 = vpop.permute.xlu1 %1249 }
 0x12f   : > { %v1234_v6 = vpop.permute.xlu0 %1233  ;;  %v2022_v28 = vsel %vm1994_vm6, %v1989_v54, %v1250_v24 }
 0x130   : > { %v2006_v35 = vsel %vm1994_vm6, %v1973_v58, %v1234_v6 }
 0x132   : > { %v1376_v48 = vpop.permute.xlu1 %1375 }
 0x133   : > { %v1360_v52 = vpop.permute.xlu0 %1359  ;;  %v2053_v62 = vsel %vm2027_vm7, %v2020_v39, %v1376_v48 }
 0x134   : > { %v2037_v57 = vsel %vm2027_vm7, %v2004_v41, %v1360_v52 }
 0x136   : > { %v1378_v8 = vpop.permute.xlu1 %1377 }
 0x137   : > { %v1362_v55 = vpop.permute.xlu0 %1361  ;;  %v2055_v22 = vsel %vm2027_vm7, %v2022_v28, %v1378_v8 }
 0x138   : > { %v2039_v63 = vsel %vm2027_vm7, %v2006_v35, %v1362_v55 }
 0x13a   : > { %v1488_v5 = vpop.permute.xlu1 %1487 }
 0x13b   : > { %v1472_v0 = vpop.permute.xlu0 %1471  ;;  %v2086_v20 = vsel %vm2060_vm8, %v2053_v62, %v1488_v5 }
 0x13c   : > { %v2070_v61 = vsel %vm2060_vm8, %v2037_v57, %v1472_v0 }
 0x13e   : > { %v1490_v15 = vpop.permute.xlu1 %1489 }
 0x13f   : > { %v1474_v25 = vpop.permute.xlu0 %1473  ;;  %v2088_v17 = vsel %vm2060_vm8, %v2055_v22, %v1490_v15 }
 0x140   : > { %v2072_v46 = vsel %vm2060_vm8, %v2039_v63, %v1474_v25 }
 0x142   : > { %v1760_v30 = vpop.permute.xlu1 %1759 }
 0x143   : > { %v1744_v26 = vpop.permute.xlu0 %1743  ;;  %v2119_v3 = vsel %vm2093_vm9, %v2086_v20, %v1760_v30 }
 0x144   : > { %v2103_v42 = vsel %vm2093_vm9, %v2070_v61, %v1744_v26 }
 0x146   : > { %v1762_v9 = vpop.permute.xlu1 %1761 }
 0x147   : > { %v1746_v59 = vpop.permute.xlu0 %1745  ;;  %v2121_v23 = vsel %vm2093_vm9, %v2088_v17, %v1762_v9 }
 0x148   : > { %v2105_v4 = vsel %vm2093_vm9, %v2072_v46, %v1746_v59 }
 0x14a   : > { %v1888_v33 = vpop.permute.xlu1 %1887 }
 0x14b   : > { %v2152_v47 = vsel %vm2126_vm10, %v2119_v3, %v1888_v33  ;;  %v1872_v60 = vpop.permute.xlu0 %1871 }
 0x14c   : > { %v2136_v14 = vsel %vm2126_vm10, %v2103_v42, %v1872_v60  ;;  %2869 = vmatprep.mubr.msk.bf16.mxu1 %vm2186_vm11, %v2152_v47 }
 0x14d   : > { %2853 = vmatprep.mubr.msk.bf16.mxu0 %vm2186_vm11, %v2136_v14 }
 0x14e   : > { %v739_v11 = vpop.permute.xlu1 %738 }
 0x14f   : > { %v723_v31 = vpop.permute.xlu0 %722  ;;  %v1925_v13 = vsel %vm1895_vm3, %v3984_v49, %v739_v11 }
 0x150   : > { %v1909_v39 = vsel %vm1895_vm3, %v3999_v12, %v723_v31 }
 0x152   : > { %v1890_v29 = vpop.permute.xlu1 %1889 }
 0x153   : > { %v2154_v1 = vsel %vm2126_vm10, %v2121_v23, %v1890_v29  ;;  %v1874_v45 = vpop.permute.xlu0 %1873 }
 0x154   : > { %v2138_v7 = vsel %vm2126_vm10, %v2105_v4, %v1874_v45  ;;  %2870 = vmatmul.mubr.msk.bf16.gmra.mxu1 %vm2186_vm11, %v2154_v1  ;;  %v4487_v45 = vld [vmem:[%s4614_s2] ss:$0 sm:$0xff] }
 0x155   : > { %2854 = vmatmul.mubr.msk.bf16.gmra.mxu0 %vm2186_vm11, %v2138_v7 }
 0x156   : > { %v741_v37 = vpop.permute.xlu1 %740 }
 0x157   : > { %v725_v18 = vpop.permute.xlu0 %724  ;;  %v1927_v33 = vsel %vm1895_vm3, %v4065_v44, %v741_v37 }
 0x158   : > { %v1911_v12 = vsel %vm1895_vm3, %v4072_v40, %v725_v18 }
 0x15a   : > { %v868_v21 = vpop.permute.xlu1 %867 }
 0x15b   : > { %v852_v27 = vpop.permute.xlu0 %851  ;;  %v1958_v59 = vsel %vm1928_vm4, %v1925_v13, %v868_v21 }
 0x15c   : > { %v1942_v41 = vsel %vm1928_vm4, %v1909_v39, %v852_v27 }
 0x15e   : > { %v870_v24 = vpop.permute.xlu1 %869 }
 0x15f   : > { %v854_v6 = vpop.permute.xlu0 %853  ;;  %v1960_v47 = vsel %vm1928_vm4, %v1927_v33, %v870_v24 }
 0x160   : > { %v1944_v10 = vsel %vm1928_vm4, %v1911_v12, %v854_v6 }
 0x162   : > { %v980_v48 = vpop.permute.xlu1 %979 }
 0x163   : > { %v964_v52 = vpop.permute.xlu0 %963  ;;  %v1991_v62 = vsel %vm1961_vm5, %v1958_v59, %v980_v48 }
 0x164   : > { %v1975_v20 = vsel %vm1961_vm5, %v1942_v41, %v964_v52 }
 0x166   : > { %v982_v8 = vpop.permute.xlu1 %981 }
 0x167   : > { %v966_v55 = vpop.permute.xlu0 %965  ;;  %v1993_v14 = vsel %vm1961_vm5, %v1960_v47, %v982_v8 }
 0x168   : > { %v1977_v16 = vsel %vm1961_vm5, %v1944_v10, %v966_v55 }
 0x16a   : > { %v1252_v5 = vpop.permute.xlu1 %1251 }
 0x16b   : > { %v1236_v0 = vpop.permute.xlu0 %1235  ;;  %v2024_v61 = vsel %vm1994_vm6, %v1991_v62, %v1252_v5 }
 0x16c   : > { %v2008_v49 = vsel %vm1994_vm6, %v1975_v20, %v1236_v0 }
 0x16e   : > { %v1254_v15 = vpop.permute.xlu1 %1253 }
 0x16f   : > { %v1238_v25 = vpop.permute.xlu0 %1237  ;;  %v2026_v40 = vsel %vm1994_vm6, %v1993_v14, %v1254_v15 }
 0x170   : > { %v2010_v58 = vsel %vm1994_vm6, %v1977_v16, %v1238_v25 }
 0x172   : > { %v1380_v30 = vpop.permute.xlu1 %1379 }
 0x173   : > { %v1364_v26 = vpop.permute.xlu0 %1363  ;;  %v2057_v42 = vsel %vm2027_vm7, %v2024_v61, %v1380_v30 }
 0x174   : > { %v2041_v60 = vsel %vm2027_vm7, %v2008_v49, %v1364_v26 }
 0x176   : > { %v1382_v38 = vpop.permute.xlu1 %1381 }
 0x177   : > { %v1366_v56 = vpop.permute.xlu0 %1365  ;;  %v2059_v28 = vsel %vm2027_vm7, %v2026_v40, %v1382_v38 }
 0x178   : > { %v2043_v35 = vsel %vm2027_vm7, %v2010_v58, %v1366_v56 }
 0x17a   : > { %v1492_v50 = vpop.permute.xlu1 %1491 }
 0x17b   : > { %v1476_v32 = vpop.permute.xlu0 %1475  ;;  %v2090_v2 = vsel %vm2060_vm8, %v2057_v42, %v1492_v50 }
 0x17c   : > { %v2074_v43 = vsel %vm2060_vm8, %v2041_v60, %v1476_v32 }
 0x17e   : > { %v1494_v19 = vpop.permute.xlu1 %1493 }
 0x17f   : > { %v1478_v34 = vpop.permute.xlu0 %1477  ;;  %v2092_v22 = vsel %vm2060_vm8, %v2059_v28, %v1494_v19 }
 0x180   : > { %v2076_v63 = vsel %vm2060_vm8, %v2043_v35, %v1478_v34 }
 0x182   : > { %v1764_v53 = vpop.permute.xlu1 %1763 }
 0x183   : > { %v1748_v9 = vpop.permute.xlu0 %1747  ;;  %v2123_v44 = vsel %vm2093_vm9, %v2090_v2, %v1764_v53 }
 0x184   : > { %v2107_v36 = vsel %vm2093_vm9, %v2074_v43, %v1748_v9 }
 0x186   : > { %v1766_v57 = vpop.permute.xlu1 %1765 }
 0x187   : > { %v1750_v3 = vpop.permute.xlu0 %1749  ;;  %v2125_v17 = vsel %vm2093_vm9, %v2092_v22, %v1766_v57 }
 0x188   : > { %v2109_v23 = vsel %vm2093_vm9, %v2076_v63, %v1750_v3 }
 0x18a   : > { %v1892_v51 = vpop.permute.xlu1 %1891 }
 0x18b   : > { %v2156_v54 = vsel %vm2126_vm10, %v2123_v44, %v1892_v51  ;;  %v1876_v11 = vpop.permute.xlu0 %1875 }
 0x18c   : > { %v2140_v31 = vsel %vm2126_vm10, %v2107_v36, %v1876_v11  ;;  %2873 = vmatprep.mubr.msk.bf16.mxu1 %vm2186_vm11, %v2156_v54 }
 0x18d   : > { %2857 = vmatprep.mubr.msk.bf16.mxu0 %vm2186_vm11, %v2140_v31 }
 0x18e   : > { %v1894_v46 = vpop.permute.xlu1 %1893 }
 0x18f   : > { %v2158_v29 = vsel %vm2126_vm10, %v2125_v17, %v1894_v46  ;;  %v1878_v4 = vpop.permute.xlu0 %1877 }
 0x190   : > { %v2142_v1 = vsel %vm2126_vm10, %v2109_v23, %v1878_v4  ;;  %2874 = vmatmul.mubr.msk.bf16.gmra.mxu1 %vm2186_vm11, %v2158_v29 }
 0x191   : > { %2858 = vmatmul.mubr.msk.bf16.gmra.mxu0 %vm2186_vm11, %v2142_v1 }
 0x194   : > { %v2863_v7 = vpop.f32.mrf.mxu1 }
 0x195   : > { %v2847_v37 = vpop.f32.mrf.mxu0  ;;  %v2330_v18 = vadd.f32 %v2863_v7, %v4487_v45 }
 0x196   : > { %v2266_v21 = vadd.f32 %v2847_v37, %v4487_v45  ;;  %v2321_v27 = vpop.f32.mrf.mxu1 }
 0x197   : > { %2402 = vst [vmem:[%s4491_s6 + $0x90] sm:$0xff] %v2330_v18  ;;  %v2257_v24 = vpop.f32.mrf.mxu0  ;;  %v2322_v6 = vadd.f32 %v4487_v45, %v2321_v27 }
 0x198   : > { %2386 = vst [vmem:[%s4491_s6 + $0x10] sm:$0xff] %v2266_v21  ;;  %v2258_v48 = vadd.f32 %v4487_v45, %v2257_v24  ;;  %v2864_v52 = vpop.f32.mrf.mxu1 }
 0x199   : > { %2400 = vst [vmem:[%s4491_s6 + $0x80] sm:$0xff] %v2322_v6  ;;  %v2848_v8 = vpop.f32.mrf.mxu0  ;;  %v2333_v55 = vadd.f32 %v2864_v52, %v4487_v45 }
 0x19a   : > { %2384 = vst [vmem:[%s4491_s6] sm:$0xff] %v2258_v48  ;;  %v2269_v5 = vadd.f32 %v2848_v8, %v4487_v45  ;;  %v2324_v0 = vpop.f32.mrf.mxu1 }
 0x19b   : > { %2403 = vst [vmem:[%s4491_s6 + $0x98] sm:$0xff] %v2333_v55  ;;  %v2260_v15 = vpop.f32.mrf.mxu0  ;;  %v2325_v25 = vadd.f32 %v4487_v45, %v2324_v0 }
 0x19c   : > { %2387 = vst [vmem:[%s4491_s6 + $0x18] sm:$0xff] %v2269_v5  ;;  %v2261_v30 = vadd.f32 %v4487_v45, %v2260_v15 }
 0x19d   : > { %2401 = vst [vmem:[%s4491_s6 + $0x88] sm:$0xff] %v2325_v25 }
 0x19e   : > { %2385 = vst [vmem:[%s4491_s6 + $0x8] sm:$0xff] %v2261_v30 }
 0x1d4   : > { %v2867_v26 = vpop.f32.mrf.mxu1 }
 0x1d5   : > { %v2851_v38 = vpop.f32.mrf.mxu0  ;;  %v2346_v56 = vadd.f32 %v2867_v26, %v4487_v45 }
 0x1d6   : > { %v2282_v50 = vadd.f32 %v2851_v38, %v4487_v45  ;;  %v2337_v32 = vpop.f32.mrf.mxu1 }
 0x1d7   : > { %2406 = vst [vmem:[%s4491_s6 + $0xb0] sm:$0xff] %v2346_v56  ;;  %v2273_v19 = vpop.f32.mrf.mxu0  ;;  %v2338_v34 = vadd.f32 %v4487_v45, %v2337_v32 }
 0x1d8   : > { %2390 = vst [vmem:[%s4491_s6 + $0x30] sm:$0xff] %v2282_v50  ;;  %v2274_v53 = vadd.f32 %v4487_v45, %v2273_v19  ;;  %v2868_v9 = vpop.f32.mrf.mxu1 }
 0x1d9   : > { %2404 = vst [vmem:[%s4491_s6 + $0xa0] sm:$0xff] %v2338_v34  ;;  %v2852_v13 = vpop.f32.mrf.mxu0  ;;  %v2349_v39 = vadd.f32 %v2868_v9, %v4487_v45 }
 0x1da   : > { %2388 = vst [vmem:[%s4491_s6 + $0x20] sm:$0xff] %v2274_v53  ;;  %v2285_v59 = vadd.f32 %v2852_v13, %v4487_v45  ;;  %v2340_v41 = vpop.f32.mrf.mxu1 }
 0x1db   : > { %2407 = vst [vmem:[%s4491_s6 + $0xb8] sm:$0xff] %v2349_v39  ;;  %v2276_v62 = vpop.f32.mrf.mxu0  ;;  %v2341_v57 = vadd.f32 %v4487_v45, %v2340_v41 }
 0x1dc   : > { %2391 = vst [vmem:[%s4491_s6 + $0x38] sm:$0xff] %v2285_v59  ;;  %v2277_v20 = vadd.f32 %v4487_v45, %v2276_v62 }
 0x1dd   : > { %2405 = vst [vmem:[%s4491_s6 + $0xa8] sm:$0xff] %v2341_v57 }
 0x1de   : > { %2389 = vst [vmem:[%s4491_s6 + $0x28] sm:$0xff] %v2277_v20 }
 0x214   : > { %v2871_v61 = vpop.f32.mrf.mxu1 }
 0x215   : > { %v2855_v3 = vpop.f32.mrf.mxu0  ;;  %v2362_v33 = vadd.f32 %v2871_v61, %v4487_v45 }
 0x216   : > { %v2298_v49 = vadd.f32 %v2855_v3, %v4487_v45  ;;  %v2353_v42 = vpop.f32.mrf.mxu1 }
 0x217   : > { %2410 = vst [vmem:[%s4491_s6 + $0xd0] sm:$0xff] %v2362_v33  ;;  %v2289_v12 = vpop.f32.mrf.mxu0  ;;  %v2354_v47 = vadd.f32 %v4487_v45, %v2353_v42 }
 0x218   : > { %2394 = vst [vmem:[%s4491_s6 + $0x50] sm:$0xff] %v2298_v49  ;;  %v2290_v60 = vadd.f32 %v4487_v45, %v2289_v12  ;;  %v2872_v2 = vpop.f32.mrf.mxu1 }
 0x219   : > { %2408 = vst [vmem:[%s4491_s6 + $0xc0] sm:$0xff] %v2354_v47  ;;  %v2856_v10 = vpop.f32.mrf.mxu0  ;;  %v2365_v14 = vadd.f32 %v2872_v2, %v4487_v45 }
 0x21a   : > { %2392 = vst [vmem:[%s4491_s6 + $0x40] sm:$0xff] %v2290_v60  ;;  %v2301_v43 = vadd.f32 %v2856_v10, %v4487_v45  ;;  %v2356_v44 = vpop.f32.mrf.mxu1 }
 0x21b   : > { %2411 = vst [vmem:[%s4491_s6 + $0xd8] sm:$0xff] %v2365_v14  ;;  %v2292_v51 = vpop.f32.mrf.mxu0  ;;  %v2357_v16 = vadd.f32 %v4487_v45, %v2356_v44 }
 0x21c   : > { %2395 = vst [vmem:[%s4491_s6 + $0x58] sm:$0xff] %v2301_v43  ;;  %v2293_v40 = vadd.f32 %v4487_v45, %v2292_v51 }
 0x21d   : > { %2409 = vst [vmem:[%s4491_s6 + $0xc8] sm:$0xff] %v2357_v16 }
 0x21e   : > { %2393 = vst [vmem:[%s4491_s6 + $0x48] sm:$0xff] %v2293_v40 }
 0x250   : > { %v2875_v36 = vpop.f32.mrf.mxu1 }
 0x251   : > { %v2859_v54 = vpop.f32.mrf.mxu0  ;;  %v2378_v11 = vadd.f32 %v2875_v36, %v4487_v45 }
 0x252   : > { %v2314_v58 = vadd.f32 %v2859_v54, %v4487_v45  ;;  %v2369_v28 = vpop.f32.mrf.mxu1 }
 0x253   : > { %2414 = vst [vmem:[%s4491_s6 + $0xf0] sm:$0xff] %v2378_v11  ;;  %v2305_v31 = vpop.f32.mrf.mxu0  ;;  %v2370_v35 = vadd.f32 %v4487_v45, %v2369_v28 }
 0x254   : > { %2398 = vst [vmem:[%s4491_s6 + $0x70] sm:$0xff] %v2314_v58  ;;  %v2306_v22 = vadd.f32 %v4487_v45, %v2305_v31  ;;  %v2876_v63 = vpop.f32.mrf.mxu1 }
 0x255   : > { %2412 = vst [vmem:[%s4491_s6 + $0xe0] sm:$0xff] %v2370_v35  ;;  %v2860_v17 = vpop.f32.mrf.mxu0  ;;  %v2381_v46 = vadd.f32 %v2876_v63, %v4487_v45 }
 0x256   : > { %2396 = vst [vmem:[%s4491_s6 + $0x60] sm:$0xff] %v2306_v22  ;;  %v2317_v23 = vadd.f32 %v2860_v17, %v4487_v45  ;;  %v2372_v29 = vpop.f32.mrf.mxu1 }
 0x257   : > { %2415 = vst [vmem:[%s4491_s6 + $0xf8] sm:$0xff] %v2381_v46  ;;  %v2308_v4 = vpop.f32.mrf.mxu0  ;;  %v2373_v1 = vadd.f32 %v4487_v45, %v2372_v29 }
 0x258   : > { %2399 = vst [vmem:[%s4491_s6 + $0x78] sm:$0xff] %v2317_v23  ;;  %v2309_v7 = vadd.f32 %v4487_v45, %v2308_v4 }
 0x259   : > { %2413 = vst [vmem:[%s4491_s6 + $0xe8] sm:$0xff] %v2373_v1 }
 0x25a   : > { %2397 = vst [vmem:[%s4491_s6 + $0x68] sm:$0xff] %v2309_v7 }
 0x25b   : > { %3110 = shalt.err (!%p3107_p5)
}
 0x25c   : > { %s3111_s26 = scalar_lea.hbm %s4556_s15, 4096  ;;  %s3115_s29 = scalar_lea.hbm %s4615_s3, 8192 }
 0x25d   : > { %p3112_p6 = scmp.ne.s32.totalorder %s4556_s15, %s3111_s26  ;;  %p3116_p10 = scmp.lt.s32.totalorder %s4556_s15, %s4615_s3 }
 0x25e   : > { %p3117_p11 = scmp.lt.s32.totalorder %s3115_s29, %s3111_s26 }
 0x25f   : > { %p3113_p7 = pnand %p3112_p6, %p3245_p4 }
 0x260   : > { %p3118_p12 = por %p3117_p11, %p3116_p10 }
 0x261   : > { %p3114_p9 = pneg %p3113_p7 }
 0x263   : > { %p3119_p13 = pnand %p3118_p12, %p3114_p9 }
 0x265   : > { %3122 = shalt.err (!%p3119_p13)
}
 0x266   : > { %s3184_s6 = smov 128  }
 0x267   : > { %2886 = dma.vmem_to_hbm [thread:$0]  (%p3245_p4), %s4560_s8, 4096, %s4556_s15, %s4566_s11, %s3184_s6, %s3184_s6, %s3176_s5  }
 0x268 PF: > { %p2892_p0 = scmp.ge.s32.totalorder %s3173_s17, 2  ;;  %s2447_s7 = sand.u32 1, %s3153_s12  }
 0x269   : > { %s2448_s9 = scalar_lea.sflag [#allocation3], %s2447_s7 }
 0x26a   : > { %p2889_p1 = pnand %p2892_p0, %p3252_p8 }
 0x26c   : > { %p2890_p2 = pneg %p2889_p1 }
 0x26e   : > { %3148 = dma.done.wait (%p2890_p2), %s2448_s9, 4096  }
 0x26f   : > { %3150 = vsyncadd (%p2890_p2), %s2448_s9, 4294963200  ;;  %s16_s17 = sadd.s32 1, %s3173_s17   ;;  %s4633_s12 = smov %s3157_s13 }
 0x270   : > { %p13_p3 = scmp.ge.s32.totalorder %s16_s17, 4   ;;  %s4634_s13 = smov %s3161_s14 }
 0x271   : > { %s4635_s14 = smov %s3258_s25  ;;  %s4636_s15 = smov %s3169_s16 }
 0x272   : > { %s4637_s16 = smov %s4639_s20  ;;  %15 = sbr.rel (!%p13_p3) target bundleno = 4 (0x4), region = 70 }
 0x277   :  { %2453 = vsyncpa [#allocation3], 1 }
 0x278   :  { %2455 = vsyncpa [#allocation3 + $0x1], 1 }

// kernel: tpu_custom_call.1
= control target key start
LH: loop header
LB: loop body
LE: loop exit
PB: predicated region body
PF: predicated region fallthrough
CT: control target
= control target key end

     0   :  { %8 = vsyncpa [#allocation3], 0  ;;  %s4612_s0 = inlined_call_operand.vmem [shape: bf16[2,18,18,4], index: 0, kind: input, shape index: {}]   ;;  %s4613_s1 = inlined_call_operand.vmem [shape: bf16[36,128], index: 1, kind: input, shape index: {}]   ;;  %s4614_s2 = inlined_call_operand.vmem [shape: f32[1,128], index: 2, kind: input, shape index: {}]   ;;  %s4615_s3 = inlined_call_operand.hbm [shape: f32[2,256,128], index: 3, kind: output, shape index: {}]  }
   0x1   :  { %10 = vsyncpa [#allocation3 + $0x1], 0  ;;  %s3205_s12 = smov 0   ;;  %s3207_s13 = smov 0  }
   0x2   :  { %s3209_s14 = smov 0   ;;  %s3211_s15 = smov 0  }
   0x3   :  { %s3213_s16 = smov 0   ;;  %s3215_s17 = smov 0  }
   0x4 LB: > { %s2515_s18 = sadd.s32 4294967295, %s3173_s17   ;;  %s2516_s19 = sadd.s32 4294967294, %s3173_s17   ;;  %s3173_s17 = sphi %s3215_s17, %s16_s17   ;;  %s3169_s16 = sphi %s3213_s16, %s4637_s16   ;;  %s3165_s15 = sphi %s3211_s15, %s4636_s15   ;;  %s3161_s14 = sphi %s3209_s14, %s4635_s14   ;;  %s3157_s13 = sphi %s3207_s13, %s4634_s13   ;;  %s3153_s12 = sphi %s3205_s12, %s4633_s12  }
   0x5   : > { %s28_s20 = sadd.s32 1, %s3169_s16  ;;  %s105_s21 = sadd.s32 1, %s3161_s14 }
   0x6   : > { %p30_p0 = scmp.ge.s32.totalorder %s28_s20, 2  ;;  %p115_p1 = scmp.ne.s32.totalorder %s3161_s14, %s3157_s13 }
   0x7   : > { %p116_p2 = scmp.eq.s32.totalorder %s2515_s18, 1  ;;  %p121_p3 = scmp.ne.s32.totalorder %s3157_s13, %s3153_s12 }
   0x8   : > { %s4639_s20 = smov (%p30_p0, %s28_s20), 0  ;;  %p122_p5 = scmp.eq.s32.totalorder %s2516_s19, 1 }
   0x9   : > { %p3245_p4 = por %p116_p2, %p115_p1  ;;  %s100_s23 = ssub.s32 %s3169_s16, %s4639_s20 }
   0xa   : > { %p2519_p6 = scmp.ge.s32.totalorder %s3173_s17, 1  ;;  %p103_p7 = scmp.eq.s32.totalorder %s100_s23, 0 }
   0xb   : > { %p3252_p8 = por %p122_p5, %p121_p3  ;;  %p154_p9 = scmp.lt.s32.totalorder %s3173_s17, 3 }
   0xc   : > { %s3258_s25 = scalar_select %p103_p7, %s3161_s14, %s105_s21  }
   0xd   : > { %p155_p10 = pnand %p2519_p6, %p154_p9 }
   0xf   : > { %158 = sbr.rel (%p155_p10) target bundleno = 616 (0x268), region = 32 }
  0x14   : > { %p178_p11 = scmp.lt.s32.totalorder %s3165_s15, 1  ;;  %s3175_s4 = smov 12   ;;  %vm790_vm0 = vcmask 1046528   ;;  %vm517_vm1 = vsmask.f32 7424  ;;  %vm2219_vm2 = vcmask 1041408  }
  0x15   : > { %s3176_s5 = smov 8   ;;  %s3177_s6 = smov 4   ;;  %vm1895_vm3 = vcmask 31744   ;;  %vm1928_vm4 = vcmask 64512   ;;  %vm1961_vm5 = vcmask 97280   ;;  %vm1994_vm6 = vcmask 130048  }
  0x16   : > { %s179_s26 = scalar_select %p178_p11, %s3165_s15, 1  ;;  %vm2027_vm7 = vcmask 162816   ;;  %vm2060_vm8 = vcmask 195584   ;;  %vm2093_vm9 = vcmask 228352   ;;  %vm2126_vm10 = vcmask 261120  }
  0x17   : > { %s3178_s7 = smov 16   ;;  %s3179_s8 = smov 20   ;;  %vm2186_vm11 = vcmask 293888  }
  0x18   : > { %s2885_s27 = smul.u32 216, %s179_s26  ;;  %s3180_s9 = smov 24  }
  0x19   : > { %s3181_s10 = smov 28   ;;  %s3182_s11 = smov 32  }
  0x1a   : > { %s3265_s30 = scalar_lea.vmem %s4612_s0, %s2885_s27  ;;  %s175_s28 = sand.u32 1, %s3157_s13  }
  0x1b   : > { %v2538_v0 = vld [vmem:[%s3265_s30 + $0x6c] sm:$0xf]  ;;  %v3269_v1 = vld [vmem:[%s3265_s30 + $0x70] sm:$0xf]  ;;  %v206_v6 = vld [vmem:[%s3265_s30 + $0x64] sm:$0xf] }
  0x1c   : > { %v3272_v2 = vcombine.low %v2538_v0, %v3269_v1  ;;  %v2522_v3 = vld [vmem:[%s3265_s30 + $0xc] sm:$0xf]  ;;  %v3276_v4 = vld [vmem:[%s3265_s30 + $0x10] sm:$0xf]  ;;  %v245_v7 = vld [vmem:[%s3265_s30 + $0x60] sm:$0xe] }
  0x1d   : > { %v3279_v5 = vcombine.low %v2522_v3, %v3276_v4  ;;  %v3286_v8 = vld [vmem:[%s3265_s30 + $0x68] ss:$0 sps:$4 sm:$0x11]   ;;  %v2690_v9 = vcombine.low %v245_v7, %v206_v6  ;;  %v205_v10 = vld [vmem:[%s3265_s30 + $0x60] sm:$0xf]  ;;  %s2520_s29 = sshll.u32 %s175_s28, 8 }
  0x1e   : > { %967 = vrot.lane.b32.xlu1 %v3272_v2, %s3175_s4  ;;  %v1130_v11 = vshll.u32 %v3272_v2, 16  ;;  %v190_v12 = vld [vmem:[%s3265_s30 + $0x4] sm:$0xf]  ;;  %v816_v14 = vrot.slane %v3286_v8, 1  ;;  %v237_v15 = vld [vmem:[%s3265_s30] sm:$0xe]  ;;  %v3297_v18 = vcombine.low %v205_v10, %v206_v6 }
  0x1f   : > { %951 = vrot.lane.b32.xlu0 %v3279_v5, %s3175_s4  ;;  %v815_v13 = vrot.slane %v2690_v9, 1  ;;  %v189_v16 = vld [vmem:[%s3265_s30] sm:$0xf]  ;;  %v1034_v17 = vshll.u32 %v3279_v5, 16  ;;  %v2682_v20 = vcombine.low %v237_v15, %v190_v12  ;;  %v207_v21 = vld [vmem:[%s3265_s30 + $0x6c] sm:$0xf] }
  0x20   : > { %v2957_v19 = vld [vmem:[%s3265_s30 + $0x8] ss:$0 sps:$4 sm:$0x11]   ;;  %v3302_v23 = vcombine.low %v189_v16, %v190_v12  ;;  %v208_v24 = vld [vmem:[%s3265_s30 + $0x70] sm:$0xf]  ;;  %v615_v30 = vshrl.u32 %v3297_v18, 16 }
  0x21   : > { %v817_v22 = vsel %vm790_vm0, %v815_v13, %v816_v14  ;;  %v246_v25 = vld [vmem:[%s3265_s30 + $0x6c] sm:$0xe]  ;;  %v791_v26 = vrot.slane %v2682_v20, 1  ;;  %v792_v27 = vrot.slane %v2957_v19, 1  ;;  %v3309_v31 = vcombine.low %v207_v21, %v208_v24  ;;  %v192_v33 = vld [vmem:[%s3265_s30 + $0x10] sm:$0xf] }
  0x22   : > { %855 = vrot.lane.b32.xlu1 %v817_v22, %s3176_s5  ;;  %v2961_v28 = vld [vmem:[%s3265_s30 + $0x74] ss:$0 sps:$4 sm:$0x11]   ;;  %v2691_v29 = vcombine.low %v246_v25, %v208_v24  ;;  %v191_v32 = vld [vmem:[%s3265_s30 + $0xc] sm:$0xf]  ;;  %v519_v41 = vshrl.u32 %v3302_v23, 16 }
  0x23   : > { %v793_v34 = vsel %vm790_vm0, %v791_v26, %v792_v27  ;;  %v819_v36 = vrot.slane %v2961_v28, 1  ;;  %v238_v37 = vld [vmem:[%s3265_s30 + $0xc] sm:$0xe]  ;;  %v3315_v38 = vcombine.low %v191_v32, %v192_v33  ;;  %v2964_v39 = vld [vmem:[%s3265_s30 + $0x14] ss:$0 sps:$4 sm:$0x11]  }
  0x24   : > { %v818_v35 = vrot.slane %v2691_v29, 1  ;;  %839 = vrot.lane.b32.xlu0 %v793_v34, %s3176_s5  ;;  %v2683_v40 = vcombine.low %v238_v37, %v192_v33  ;;  %v521_v42 = vshll.u32 %v3302_v23, 16  ;;  %v526_v43 = vshll.u32 %v2957_v19, 16  ;;  %v2540_v52 = vld [vmem:[%s3265_s30 + $0x78] sm:$0xf]  ;;  %s3183_s19 = smov [#allocation2]  }
  0x25   : > { %v531_v45 = vshrl.u32 %v3315_v38, 16  ;;  %v533_v46 = vshll.u32 %v3315_v38, 16  ;;  %v627_v47 = vshrl.u32 %v3309_v31, 16  ;;  %v795_v49 = vrot.slane %v2964_v39, 1  ;;  %v3329_v57 = vld [vmem:[%s3265_s30 + $0x7c] sm:$0xf] }
  0x26   : > { %v820_v44 = vsel %vm790_vm0, %v818_v35, %v819_v36  ;;  %v794_v48 = vrot.slane %v2683_v40, 1  ;;  %v538_v50 = vshll.u32 %v2964_v39, 16  ;;  %v523_v51 = vrot.slane %v521_v42, 1  ;;  %v2524_v62 = vld [vmem:[%s3265_s30 + $0x18] sm:$0xf]  ;;  %s3101_s21 = sshll.u32 %s3183_s19, 4  ;;  %s3102_s21 = int_to_ptr.vmem [resolvable:$false] %s3101_s21 }
  0x27   : > { %857 = vrot.lane.b32.xlu1 %v820_v44, %s3176_s5  ;;  %v535_v53 = vrot.slane %v533_v46, 1  ;;  %v528_v54 = vrot.slane %v526_v43, 1  ;;  %v629_v55 = vshll.u32 %v3309_v31, 16  ;;  %v634_v56 = vshll.u32 %v2961_v28, 16  ;;  %v3335_v63 = vld [vmem:[%s3265_s30 + $0x1c] sm:$0xf] }
  0x28   : > { %v796_v58 = vsel %vm790_vm0, %v794_v48, %v795_v49  ;;  %v540_v59 = vrot.slane %v538_v50, 1  ;;  %v524_v60 = vor.u32 %v523_v51, %v519_v41  ;;  %v617_v61 = vshll.u32 %v3297_v18, 16  ;;  %v3342_v13 = vld [vmem:[%s3265_s30 + $0x74] ss:$0 sps:$4 sm:$0x11]   ;;  %s3103_s23 = scalar_lea.vmem %s3102_s21, 8192 }
  0x29   : > { %841 = vrot.lane.b32.xlu0 %v796_v58, %s3176_s5  ;;  %v536_v0 = vor.u32 %v535_v53, %v531_v45  ;;  %v631_v3 = vrot.slane %v629_v55, 1  ;;  %v636_v6 = vrot.slane %v634_v56, 1  ;;  %v622_v7 = vshll.u32 %v3286_v8, 16  ;;  %v3347_v20 = vld [vmem:[%s3265_s30 + $0x14] ss:$0 sps:$4 sm:$0x11]  }
  0x2a   : > { %v529_v9 = vsel %vm517_vm1, %v524_v60, %v528_v54  ;;  %v619_v10 = vrot.slane %v617_v61, 1  ;;  %v2707_v12 = vcombine.low %v2540_v52, %v3329_v57  ;;  %v2699_v19 = vcombine.low %v2524_v62, %v3335_v63  ;;  %v3354_v24 = vld [vmem:[%s3265_s30 + $0x80] ss:$0 sps:$4 sm:$0x11]   ;;  %v2578_v35 = vld [vmem:[%s3265_s30 + $0x6c] sm:$0xe] }
  0x2b   : > { %v541_v14 = vsel %vm517_vm1, %v536_v0, %v540_v59  ;;  %v632_v15 = vor.u32 %v631_v3, %v627_v47  ;;  %v624_v16 = vrot.slane %v622_v7, 1  ;;  %v1128_v21 = vshrl.u32 %v3272_v2, 16  ;;  %v2570_v43 = vld [vmem:[%s3265_s30 + $0xc] sm:$0xe]  ;;  %v2579_v45 = vld [vmem:[%s3265_s30 + $0x78] sm:$0xe] }
  0x2c   : > { %712 = vrot.lane.b32.xlu1 %v541_v14, %s3177_s6  ;;  %v620_v8 = vor.u32 %v619_v10, %v615_v30  ;;  %v1132_v22 = vrot.slane %v1130_v11, 1  ;;  %v1142_v26 = vshll.u32 %v2707_v12, 16  ;;  %v1135_v27 = vshll.u32 %v3342_v13, 16  ;;  %v3365_v11 = vld [vmem:[%s3265_s30 + $0x20] ss:$0 sps:$4 sm:$0x11]  }
  0x2d   : > { %710 = vrot.lane.b32.xlu0 %v529_v9, %s3177_s6  ;;  %v637_v25 = vsel %vm517_vm1, %v632_v15, %v636_v6  ;;  %v1032_v28 = vshrl.u32 %v3279_v5, 16  ;;  %v1046_v30 = vshll.u32 %v2699_v19, 16  ;;  %v1036_v32 = vrot.slane %v1034_v17, 1  ;;  %v2571_v50 = vld [vmem:[%s3265_s30 + $0x18] sm:$0xe] }
  0x2e   : > { %v625_v29 = vsel %vm517_vm1, %v620_v8, %v624_v16  ;;  %v1039_v2 = vshll.u32 %v3347_v20, 16  ;;  %v1133_v33 = vor.u32 %v1132_v22, %v1128_v21  ;;  %v1137_v34 = vrot.slane %v1135_v27, 1  ;;  %v2602_v55 = vld [vmem:[%s3265_s30 + $0x78] sm:$0xf]  ;;  %v3385_v56 = vld [vmem:[%s3265_s30 + $0x7c] sm:$0xf] }
  0x2f   : > { %v1037_v36 = vor.u32 %v1036_v32, %v1032_v28  ;;  %v1140_v37 = vshrl.u32 %v2707_v12, 16  ;;  %v1144_v39 = vrot.slane %v1142_v26, 1  ;;  %v1147_v5 = vshll.u32 %v3354_v24, 16  ;;  %v2586_v3 = vld [vmem:[%s3265_s30 + $0x18] sm:$0xf] }
  0x30   : > { %728 = vrot.lane.b32.xlu1 %v637_v25, %s3177_s6  ;;  %v1041_v17 = vrot.slane %v1039_v2, 1  ;;  %v1044_v40 = vshrl.u32 %v2699_v19, 16  ;;  %v1048_v41 = vrot.slane %v1046_v30, 1  ;;  %v1051_v42 = vshll.u32 %v3365_v11, 16  ;;  %v3396_v6 = vld [vmem:[%s3265_s30 + $0x1c] sm:$0xf] }
  0x31   : > { %726 = vrot.lane.b32.xlu0 %v625_v29, %s3177_s6  ;;  %v2738_v44 = vcombine.low %v2578_v35, %v3269_v1  ;;  %v1138_v46 = vsel %vm517_vm1, %v1133_v33, %v1137_v34  ;;  %v1145_v47 = vor.u32 %v1144_v39, %v1140_v37  ;;  %v1149_v48 = vrot.slane %v1147_v5, 1  ;;  %v2588_v16 = vld [vmem:[%s3265_s30 + $0x24] sm:$0xf]  ;;  %v3416_v21 = vld [vmem:[%s3265_s30 + $0x80] ss:$0 sps:$4 sm:$0x11]  }
  0x32   : > { %v2730_v49 = vcombine.low %v2570_v43, %v3276_v4  ;;  %v1042_v51 = vsel %vm517_vm1, %v1037_v36, %v1041_v17  ;;  %v1049_v52 = vor.u32 %v1048_v41, %v1044_v40  ;;  %v1053_v53 = vrot.slane %v1051_v42, 1  ;;  %v3423_v27 = vld [vmem:[%s3265_s30 + $0x20] ss:$0 sps:$4 sm:$0x11]   ;;  %v209_v37 = vld [vmem:[%s3265_s30 + $0x78] sm:$0xf] }
  0x33   : > { %v1327_v1 = vrot.slane %v2738_v44, 1  ;;  %v1328_v54 = vrot.slane %v3342_v13, 1  ;;  %v2739_v58 = vcombine.low %v2579_v45, %v3329_v57  ;;  %v2731_v4 = vcombine.low %v2571_v50, %v3335_v63  ;;  %v2604_v63 = vld [vmem:[%s3265_s30 + $0x84] sm:$0xf]  ;;  %v3405_v13 = vld [vmem:[%s3265_s30 + $0x88] sm:$0xf] }
  0x34   : > { %969 = vrot.lane.b32.xlu1 %v2707_v12, %s3175_s4  ;;  %v1150_v59 = vsel %vm517_vm1, %v1145_v47, %v1149_v48  ;;  %v1054_v60 = vsel %vm517_vm1, %v1049_v52, %v1053_v53  ;;  %v1303_v61 = vrot.slane %v2730_v49, 1  ;;  %v1304_v62 = vrot.slane %v3347_v20, 1  ;;  %v3432_v34 = vld [vmem:[%s3265_s30 + $0x2c] ss:$0 sps:$4 sm:$0x11]  }
  0x35   : > { %953 = vrot.lane.b32.xlu0 %v2699_v19, %s3175_s4  ;;  %v2754_v0 = vcombine.low %v2602_v55, %v3385_v56  ;;  %v1329_v57 = vsel %vm790_vm0, %v1327_v1, %v1328_v54  ;;  %v1330_v7 = vrot.slane %v2739_v58, 1  ;;  %v1331_v9 = vrot.slane %v3354_v24, 1  ;;  %v3411_v19 = vld [vmem:[%s3265_s30 + $0x28] sm:$0xf]  ;;  %v3437_v39 = vld [vmem:[%s3265_s30 + $0x7c] sm:$0xf] }
  0x36   : > { %v1306_v10 = vrot.slane %v2731_v4, 1  ;;  %v1307_v12 = vrot.slane %v3365_v11, 1  ;;  %v1305_v14 = vsel %vm790_vm0, %v1303_v61, %v1304_v62  ;;  %v2746_v15 = vcombine.low %v2586_v3, %v3396_v6  ;;  %v3428_v11 = vld [vmem:[%s3265_s30 + $0x8c] ss:$0 sps:$4 sm:$0x11]  }
  0x37   : > { %v1642_v20 = vshll.u32 %v2754_v0, 16  ;;  %v2755_v8 = vcombine.low %v2604_v63, %v3405_v13  ;;  %v1332_v22 = vsel %vm790_vm0, %v1330_v7, %v1331_v9  ;;  %v2747_v24 = vcombine.low %v2588_v16, %v3411_v19  ;;  %v193_v17 = vld [vmem:[%s3265_s30 + $0x18] sm:$0xf]  ;;  %v3441_v40 = vld [vmem:[%s3265_s30 + $0x1c] sm:$0xf] }
  0x38   : > { %1239 = vrot.lane.b32.xlu1 %v1138_v46, %s3178_s7  ;;  %v1308_v25 = vsel %vm790_vm0, %v1306_v10, %v1307_v12  ;;  %v1546_v26 = vshll.u32 %v2746_v15, 16  ;;  %v1640_v28 = vshrl.u32 %v2754_v0, 16  ;;  %v1647_v32 = vshll.u32 %v3416_v21, 16  ;;  %v2642_v41 = vld [vmem:[%s3265_s30 + $0x78] sm:$0xe] }
  0x39   : > { %1223 = vrot.lane.b32.xlu0 %v1042_v51, %s3178_s7  ;;  %v1644_v29 = vrot.slane %v1642_v20, 1  ;;  %v1654_v30 = vshll.u32 %v2755_v8, 16  ;;  %v1544_v2 = vshrl.u32 %v2746_v15, 16  ;;  %v1558_v33 = vshll.u32 %v2747_v24, 16  ;;  %v2634_v46 = vld [vmem:[%s3265_s30 + $0x18] sm:$0xe] }
  0x3a   : > { %v1548_v35 = vrot.slane %v1546_v26, 1  ;;  %v1551_v36 = vshll.u32 %v3423_v27, 16  ;;  %v1649_v42 = vrot.slane %v1647_v32, 1  ;;  %v1652_v43 = vshrl.u32 %v2755_v8, 16  ;;  %v195_v9 = vld [vmem:[%s3265_s30 + $0x24] sm:$0xf] }
  0x3b   : > { %v1645_v5 = vor.u32 %v1644_v29, %v1640_v28  ;;  %v1656_v44 = vrot.slane %v1654_v30, 1  ;;  %v1659_v45 = vshll.u32 %v3428_v11, 16  ;;  %v1556_v47 = vshrl.u32 %v2747_v24, 16  ;;  %v3459_v4 = vld [vmem:[%s3265_s30 + $0x80] ss:$0 sps:$4 sm:$0x11]  }
  0x3c   : > { %1241 = vrot.lane.b32.xlu1 %v1150_v59, %s3178_s7  ;;  %v1560_v48 = vrot.slane %v1558_v33, 1  ;;  %v1563_v49 = vshll.u32 %v3432_v34, 16  ;;  %v3450_v50 = vcombine.low %v209_v37, %v3437_v39  ;;  %v1549_v51 = vor.u32 %v1548_v35, %v1544_v2  ;;  %v3476_v10 = vld [vmem:[%s3265_s30 + $0x28] sm:$0xf]  ;;  %v2643_v12 = vld [vmem:[%s3265_s30 + $0x84] sm:$0xe] }
  0x3d   : > { %1225 = vrot.lane.b32.xlu0 %v1054_v60, %s3178_s7  ;;  %v1553_v52 = vrot.slane %v1551_v36, 1  ;;  %v3453_v53 = vcombine.low %v193_v17, %v3441_v40  ;;  %v2786_v1 = vcombine.low %v2642_v41, %v3385_v56  ;;  %v2778_v54 = vcombine.low %v2634_v46, %v3396_v6  ;;  %v3465_v56 = vld [vmem:[%s3265_s30 + $0x20] ss:$0 sps:$4 sm:$0x11]   ;;  %v211_v6 = vld [vmem:[%s3265_s30 + $0x84] sm:$0xf] }
  0x3e   : > { %v1657_v55 = vor.u32 %v1656_v44, %v1652_v43  ;;  %v1661_v58 = vrot.slane %v1659_v45, 1  ;;  %v1650_v59 = vsel %vm517_vm1, %v1645_v5, %v1649_v42  ;;  %v1561_v60 = vor.u32 %v1560_v48, %v1556_v47  ;;  %v3501_v36 = vld [vmem:[%s3265_s30 + $0x8c] ss:$0 sps:$4 sm:$0x11]  }
  0x3f   : > { %v1565_v61 = vrot.slane %v1563_v49, 1  ;;  %v641_v62 = vshll.u32 %v3450_v50, 16  ;;  %v545_v3 = vshll.u32 %v3453_v53, 16  ;;  %v1839_v63 = vrot.slane %v2786_v1, 1 }
  0x40   : > { %1367 = vrot.lane.b32.xlu1 %v1329_v57, %s3179_s8  ;;  %v3471_v57 = vld [vmem:[%s3265_s30 + $0x88] sm:$0xf]  ;;  %v1840_v7 = vrot.slane %v3416_v21, 1  ;;  %v1816_v16 = vrot.slane %v3423_v27, 1  ;;  %v646_v20 = vshll.u32 %v3459_v4, 16  ;;  %v543_v26 = vshrl.u32 %v3453_v53, 16 }
  0x41   : > { %1351 = vrot.lane.b32.xlu0 %v1305_v14, %s3179_s8  ;;  %v1662_v14 = vsel %vm517_vm1, %v1657_v55, %v1661_v58  ;;  %v1566_v21 = vsel %vm517_vm1, %v1561_v60, %v1565_v61  ;;  %v547_v28 = vrot.slane %v545_v3, 1  ;;  %v550_v27 = vshll.u32 %v3465_v56, 16 }
  0x42   : > { %v3493_v29 = vcombine.low %v195_v9, %v3476_v10  ;;  %v2787_v30 = vcombine.low %v2643_v12, %v3405_v13  ;;  %v648_v2 = vrot.slane %v646_v20, 1  ;;  %v1841_v33 = vsel %vm790_vm0, %v1839_v63, %v1840_v7  ;;  %v3506_v13 = vld [vmem:[%s3265_s30 + $0x2c] ss:$0 sps:$4 sm:$0x11]   ;;  %v240_v63 = vld [vmem:[%s3265_s30 + $0x24] sm:$0xe] }
  0x43   : > { %v548_v17 = vor.u32 %v547_v28, %v543_v26  ;;  %v552_v41 = vrot.slane %v550_v27, 1  ;;  %v1843_v43 = vrot.slane %v3428_v11, 1  ;;  %v1819_v45 = vrot.slane %v3432_v34, 1  ;;  %v239_v34 = vld [vmem:[%s3265_s30 + $0x18] sm:$0xe] }
  0x44   : > { %1369 = vrot.lane.b32.xlu1 %v1332_v22, %s3179_s8  ;;  %v639_v22 = vshrl.u32 %v3450_v50, 16  ;;  %4623 = vst [vmem:[#allocation5_spill] sm:$0xff] %v3493_v29  ;;  %v1842_v42 = vrot.slane %v2787_v30, 1  ;;  %v658_v49 = vshll.u32 %v3501_v36, 16  ;;  %v555_v1 = vshrl.u32 %v3493_v29, 16 }
  0x45   : > { %1353 = vrot.lane.b32.xlu0 %v1308_v25, %s3179_s8  ;;  %v3488_v25 = vcombine.low %v211_v6, %v3471_v57  ;;  %v2684_v61 = vcombine.low %v239_v34, %v3441_v40  ;;  %v822_v7 = vrot.slane %v3459_v4, 1  ;;  %v798_v9 = vrot.slane %v3465_v56, 1  ;;  %v2526_v56 = vld [vmem:[%s3265_s30 + $0x24] sm:$0xf]  ;;  %v2544_v28 = vld [vmem:[%s3265_s30 + $0x90] sm:$0xf] }
  0x46   : > { %v1844_v55 = vsel %vm790_vm0, %v1842_v42, %v1843_v43  ;;  %v2685_v4 = vcombine.low %v240_v63, %v3476_v10  ;;  %v3553_v10 = vld [vmem:[%s3265_s30 + $0x94] sm:$0xf] }
  0x47   : > { %v653_v37 = vshll.u32 %v3488_v25, 16  ;;  %v651_v47 = vshrl.u32 %v3488_v25, 16 }
  0x48   : > { %1479 = vrot.lane.b32.xlu1 %v2754_v0, %s3180_s9  ;;  %v1554_v0 = vsel %vm517_vm1, %v1549_v51, %v1553_v52  ;;  %v247_v51 = vld [vmem:[%s3265_s30 + $0x78] sm:$0xe]  ;;  %v553_v52 = vsel %vm517_vm1, %v548_v17, %v552_v41  ;;  %v800_v30 = vrot.slane %v2685_v4, 1  ;;  %v3567_v41 = vld [vmem:[%s3265_s30 + $0x8c] ss:$0 sps:$4 sm:$0x11]  }
  0x49   : > { %1463 = vrot.lane.b32.xlu0 %v2746_v15, %s3180_s9  ;;  %v1815_v15 = vrot.slane %v2778_v54, 1  ;;  %v655_v48 = vrot.slane %v653_v37, 1  ;;  %v562_v54 = vshll.u32 %v3506_v13, 16  ;;  %v2692_v60 = vcombine.low %v247_v51, %v3437_v39  ;;  %v2573_v4 = vld [vmem:[%s3265_s30 + $0x30] sm:$0xe] }
  0x4b   : > { %v1817_v5 = vsel %vm790_vm0, %v1815_v15, %v1816_v16  ;;  %v656_v58 = vor.u32 %v655_v48, %v651_v47  ;;  %v564_v6 = vrot.slane %v562_v54, 1  ;;  %v821_v40 = vrot.slane %v2692_v60, 1  ;;  %v2542_v15 = vld [vmem:[%s3265_s30 + $0x84] sm:$0xf]  ;;  %v3537_v16 = vld [vmem:[%s3265_s30 + $0x88] sm:$0xf] }
  0x4c   : > { %1481 = vrot.lane.b32.xlu1 %v2755_v8, %s3180_s9  ;;  %v2635_v8 = vld [vmem:[%s3265_s30 + $0x24] sm:$0xe]  ;;  %v1159_v47 = vshll.u32 %v3567_v41, 16 }
  0x4d   : > { %1465 = vrot.lane.b32.xlu0 %v2747_v24, %s3180_s9  ;;  %v643_v24 = vrot.slane %v641_v62, 1  ;;  %v2779_v32 = vcombine.low %v2635_v8, %v3411_v19  ;;  %v557_v19 = vshll.u32 %v3493_v29, 16  ;;  %v248_v62 = vld [vmem:[%s3265_s30 + $0x84] sm:$0xe]  ;;  %v3543_v8 = vld [vmem:[%s3265_s30 + $0x28] sm:$0xf] }
  0x4e   : > { %v2693_v12 = vcombine.low %v248_v62, %v3471_v57  ;;  %v2700_v26 = vcombine.low %v2526_v56, %v3543_v8  ;;  %v1161_v54 = vrot.slane %v1159_v47, 1  ;;  %v3046_v47 = vld [vmem:[%s4613_s1 + $0x10] ss:$0 sps:$4 sm:$0x33]   ;;  %v201_v29 = vld [vmem:[%s3265_s30 + $0x48] sm:$0xf] }
  0x4f   : > { %v644_v35 = vor.u32 %v643_v24, %v639_v22  ;;  %v1818_v44 = vrot.slane %v2779_v32, 1  ;;  %v559_v11 = vrot.slane %v557_v19, 1  ;;  %v2708_v22 = vcombine.low %v2542_v15, %v3537_v16  ;;  %v3571_v19 = vld [vmem:[%s3265_s30 + $0x2c] ss:$0 sps:$4 sm:$0x11]   ;;  %2883 = vmatprep.subr.msk.bf16.mxu0 %vm2219_vm2, %v3046_v47  ;;  %2884 = vmatprep.subr.msk.bf16.mxu1 %vm2219_vm2, %v3046_v47 }
  0x50   : > { %1751 = vrot.lane.b32.xlu1 %v1650_v59, %s3181_s10  ;;  %v660_v59 = vrot.slane %v658_v49, 1  ;;  %v824_v57 = vrot.slane %v2693_v12, 1  ;;  %v823_v24 = vsel %vm790_vm0, %v821_v40, %v822_v7  ;;  %v801_v32 = vrot.slane %v3506_v13, 1  ;;  %v3577_v49 = vld [vmem:[%s3265_s30 + $0x98] ss:$0 sps:$4 sm:$0x11]  }
  0x51   : > { %1735 = vrot.lane.b32.xlu0 %v1554_v0, %s3181_s10  ;;  %v649_v46 = vsel %vm517_vm1, %v644_v35, %v648_v2  ;;  %v1820_v0 = vsel %vm790_vm0, %v1818_v44, %v1819_v45  ;;  %v560_v3 = vor.u32 %v559_v11, %v555_v1  ;;  %v2528_v2 = vld [vmem:[%s3265_s30 + $0x30] sm:$0xf]  ;;  %v1154_v35 = vshll.u32 %v2708_v22, 16 }
  0x52   : > { %v661_v39 = vsel %vm517_vm1, %v656_v58, %v660_v59  ;;  %v802_v13 = vsel %vm790_vm0, %v800_v30, %v801_v32  ;;  %v1152_v43 = vshrl.u32 %v2708_v22, 16  ;;  %v1056_v45 = vshrl.u32 %v2700_v26, 16  ;;  %v2580_v59 = vld [vmem:[%s3265_s30 + $0x84] sm:$0xe]  ;;  %v2590_v30 = vld [vmem:[%s3265_s30 + $0x30] sm:$0xf] }
  0x53   : > { %v565_v20 = vsel %vm517_vm1, %v560_v3, %v564_v6  ;;  %v1156_v44 = vrot.slane %v1154_v35, 1  ;;  %v1063_v51 = vshll.u32 %v3571_v19, 16  ;;  %v1171_v58 = vshll.u32 %v3577_v49, 16  ;;  %v2572_v3 = vld [vmem:[%s3265_s30 + $0x24] sm:$0xe] }
  0x54   : > { %1753 = vrot.lane.b32.xlu1 %v1662_v14, %s3181_s10  ;;  %v797_v14 = vrot.slane %v2684_v61, 1  ;;  %v2581_v6 = vld [vmem:[%s3265_s30 + $0x90] sm:$0xe]  ;;  %v2740_v63 = vcombine.low %v2580_v59, %v3537_v16  ;;  %v3612_v32 = vld [vmem:[%s3265_s30 + $0x34] sm:$0xf] }
  0x55   : > { %1737 = vrot.lane.b32.xlu0 %v1566_v21, %s3181_s10  ;;  %v825_v21 = vrot.slane %v3501_v36, 1  ;;  %v2709_v36 = vcombine.low %v2544_v28, %v3553_v10  ;;  %v1157_v1 = vor.u32 %v1156_v44, %v1152_v43  ;;  %v1065_v60 = vrot.slane %v1063_v51, 1  ;;  %v2608_v35 = vld [vmem:[%s3265_s30 + $0x9c] sm:$0xf] }
  0x56   : > { %v799_v27 = vsel %vm790_vm0, %v797_v14, %v798_v9  ;;  %v1173_v12 = vrot.slane %v1171_v58, 1  ;;  %v1333_v56 = vrot.slane %v2740_v63, 1  ;;  %v1310_v28 = vrot.slane %v3571_v19, 1  ;;  %v3642_v51 = vld [vmem:[%s3265_s30 + $0x38] ss:$0 sps:$4 sm:$0x11]  }
  0x57   : > { %v826_v37 = vsel %vm790_vm0, %v824_v57, %v825_v21  ;;  %v1166_v42 = vshll.u32 %v2709_v36, 16  ;;  %v1164_v11 = vshrl.u32 %v2709_v36, 16  ;;  %v1162_v7 = vsel %vm517_vm1, %v1157_v1, %v1161_v54  ;;  %v2606_v57 = vld [vmem:[%s3265_s30 + $0x90] sm:$0xf]  ;;  %v3604_v21 = vld [vmem:[%s3265_s30 + $0x94] sm:$0xf] }
  0x58   : > { %1879 = vrot.lane.b32.xlu1 %v1841_v33, %s3182_s11  ;;  %v3559_v33 = vld [vmem:[%s3265_s30 + $0x34] sm:$0xf]  ;;  %v2748_v19 = vcombine.low %v2590_v30, %v3612_v32  ;;  %v3645_v1 = vld [vmem:[%s3265_s30 + $0xa4] ss:$0 sps:$4 sm:$0x11]  }
  0x59   : > { %1863 = vrot.lane.b32.xlu0 %v1817_v5, %s3182_s11  ;;  %v1058_v5 = vshll.u32 %v2700_v26, 16  ;;  %v2701_v17 = vcombine.low %v2528_v2, %v3559_v33  ;;  %v2756_v2 = vcombine.low %v2606_v57, %v3604_v21  ;;  %v213_v63 = vld [vmem:[%s3265_s30 + $0x90] sm:$0xf] }
  0x5b   : > { %v1060_v48 = vrot.slane %v1058_v5, 1  ;;  %v1068_v61 = vshrl.u32 %v2701_v17, 16  ;;  %v3624_v5 = vld [vmem:[%s3265_s30 + $0x40] sm:$0xf]  ;;  %v1666_v43 = vshll.u32 %v2756_v2, 16 }
  0x5c   : > { %730 = vrot.lane.b32.xlu1 %v649_v46, %s3177_s6  ;;  %v1070_v46 = vshll.u32 %v2701_v17, 16 }
  0x5d   : > { %714 = vrot.lane.b32.xlu0 %v553_v52, %s3177_s6  ;;  %v3581_v52 = vld [vmem:[%s3265_s30 + $0x38] ss:$0 sps:$4 sm:$0x11]   ;;  %v1061_v34 = vor.u32 %v1060_v48, %v1056_v45  ;;  %v1668_v58 = vrot.slane %v1666_v43, 1 }
  0x5e   : > { %v1072_v62 = vrot.slane %v1070_v46, 1  ;;  %v3635_v46 = vld [vmem:[%s3265_s30 + $0x98] ss:$0 sps:$4 sm:$0x11]  }
  0x5f   : > { %v1066_v40 = vsel %vm517_vm1, %v1061_v34, %v1065_v60  ;;  %v1664_v34 = vshrl.u32 %v2756_v2, 16  ;;  %v1671_v59 = vshll.u32 %v3635_v46, 16  ;;  %v1568_v60 = vshrl.u32 %v2748_v19, 16 }
  0x60   : > { %1881 = vrot.lane.b32.xlu1 %v1844_v55, %s3182_s11  ;;  %v1168_v55 = vrot.slane %v1166_v42, 1  ;;  %v1073_v14 = vor.u32 %v1072_v62, %v1068_v61  ;;  %v2221_v61 = vsel %vm2219_vm2, %v3046_v47, 0  ;;  %v3056_v62 = vld [vmem:[%s4613_s1] sm:$0xff]  }
  0x61   : > { %1865 = vrot.lane.b32.xlu0 %v1820_v0, %s3182_s11  ;;  %v1075_v0 = vshll.u32 %v3581_v52, 16  ;;  %2840 = vmatpush3.bf16.msra.mxu0 %v2221_v61  ;;  %v3703_v47 = vld [vmem:[%s3265_s30 + $0x40] sm:$0xf] }
  0x62   : > { %v1169_v9 = vor.u32 %v1168_v55, %v1164_v11  ;;  %v3051_v11 = vld [vmem:[%s4613_s1 + $0x8] sm:$0xff]   ;;  %v3652_v55 = vld [vmem:[%s3265_s30 + $0x44] ss:$0 sps:$4 sm:$0x11]   ;;  %2880 = vmatpush3.bf16.msra.mxu1 %v2221_v61 }
  0x63   : > { %v1077_v15 = vrot.slane %v1075_v0, 1  ;;  %v2644_v0 = vld [vmem:[%s3265_s30 + $0x90] sm:$0xe]  ;;  %2841 = vmatprep.subr.bf16.mxu0 %v3051_v11  ;;  %2878 = vmatprep.subr.bf16.mxu1 %v3051_v11 }
  0x64   : > { %732 = vrot.lane.b32.xlu1 %v661_v39, %s3177_s6  ;;  %v2732_v39 = vcombine.low %v2572_v3, %v3543_v8  ;;  %v1174_v16 = vsel %vm517_vm1, %v1169_v9, %v1173_v12  ;;  %v1334_v8 = vrot.slane %v3567_v41, 1  ;;  %v1683_v12 = vshll.u32 %v3645_v1, 16 }
  0x65   : > { %716 = vrot.lane.b32.xlu0 %v565_v20, %s3177_s6  ;;  %v2741_v20 = vcombine.low %v2581_v6, %v3553_v10  ;;  %v1575_v6 = vshll.u32 %v3642_v51, 16  ;;  %2842 = vmatpush3.bf16.msra.mxu0 %v3051_v11 }
  0x66   : > { %2881 = vmatpush3.bf16.msra.mxu1 %v3051_v11  ;;  %2843 = vmatprep.subr.bf16.mxu0 %v3056_v62 }
  0x67   : > { %v1336_v10 = vrot.slane %v2741_v20, 1  ;;  %2879 = vmatprep.subr.bf16.mxu1 %v3056_v62 }
  0x68   : > { %859 = vrot.lane.b32.xlu1 %v823_v24, %s3176_s5  ;;  %v1078_v24 = vsel %vm517_vm1, %v1073_v14, %v1077_v15 }
  0x69   : > { %843 = vrot.lane.b32.xlu0 %v799_v27, %s3176_s5  ;;  %v1337_v27 = vrot.slane %v3577_v49, 1  ;;  %v1570_v49 = vshll.u32 %v2748_v19, 16  ;;  %2844 = vmatpush3.bf16.msra.mxu0 %v3056_v62 }
  0x6a   : > { %2882 = vmatpush3.bf16.msra.mxu1 %v3056_v62 }
  0x6b   : > { %v1338_v45 = vsel %vm790_vm0, %v1336_v10, %v1337_v27  ;;  %v1572_v3 = vrot.slane %v1570_v49, 1  ;;  %v1685_v10 = vrot.slane %v1683_v12, 1  ;;  %v3730_v12 = vld [vmem:[%s3265_s30 + $0xa4] ss:$0 sps:$4 sm:$0x11]  }
  0x6c   : > { %861 = vrot.lane.b32.xlu1 %v826_v37, %s3176_s5  ;;  %v2592_v37 = vld [vmem:[%s3265_s30 + $0x3c] sm:$0xf] }
  0x6d   : > { %845 = vrot.lane.b32.xlu0 %v802_v13, %s3176_s5  ;;  %v1313_v13 = vrot.slane %v3581_v52, 1  ;;  %v2749_v44 = vcombine.low %v2592_v37, %v3624_v5 }
  0x6f   : > { %v1582_v54 = vshll.u32 %v2749_v44, 16  ;;  %v1580_v15 = vshrl.u32 %v2749_v44, 16 }
  0x70   : > { %971 = vrot.lane.b32.xlu1 %v2708_v22, %s3175_s4  ;;  %v2733_v22 = vcombine.low %v2573_v4, %v3559_v33  ;;  %v1335_v33 = vsel %vm790_vm0, %v1333_v56, %v1334_v8  ;;  %v1587_v4 = vshll.u32 %v3652_v55, 16  ;;  %v1669_v56 = vor.u32 %v1668_v58, %v1664_v34  ;;  %v2637_v58 = vld [vmem:[%s3265_s30 + $0x3c] sm:$0xe] }
  0x71   : > { %955 = vrot.lane.b32.xlu0 %v2700_v26, %s3175_s4  ;;  %v1309_v26 = vrot.slane %v2732_v39, 1  ;;  %v197_v39 = vld [vmem:[%s3265_s30 + $0x30] sm:$0xf]  ;;  %v1584_v20 = vrot.slane %v1582_v54, 1  ;;  %v1673_v8 = vrot.slane %v1671_v59, 1  ;;  %v1822_v34 = vrot.slane %v3642_v51, 1 }
  0x72   : > { %v1312_v41 = vrot.slane %v2733_v22, 1  ;;  %v1573_v22 = vor.u32 %v1572_v3, %v1568_v60 }
  0x74   : > { %973 = vrot.lane.b32.xlu1 %v2709_v36, %s3175_s4  ;;  %v3618_v36 = vld [vmem:[%s3265_s30 + $0xa0] sm:$0xf]  ;;  %v1314_v48 = vsel %vm790_vm0, %v1312_v41, %v1313_v13 }
  0x75   : > { %957 = vrot.lane.b32.xlu0 %v2701_v17, %s3175_s4  ;;  %v1311_v17 = vsel %vm790_vm0, %v1309_v26, %v1310_v28  ;;  %v2757_v42 = vcombine.low %v2608_v35, %v3618_v36  ;;  %v2788_v28 = vcombine.low %v2644_v0, %v3604_v21  ;;  %v1589_v35 = vrot.slane %v1587_v4, 1 }
  0x76   : > { %v1674_v21 = vsel %vm517_vm1, %v1669_v56, %v1673_v8  ;;  %v3739_v56 = vld [vmem:[%s3265_s30 + $0x44] ss:$0 sps:$4 sm:$0x11]  }
  0x77   : > { %v1678_v52 = vshll.u32 %v2757_v42, 16  ;;  %v1676_v9 = vshrl.u32 %v2757_v42, 16  ;;  %v1845_v43 = vrot.slane %v2788_v28, 1  ;;  %v1849_v28 = vrot.slane %v3645_v1, 1 }
  0x78   : > { %1243 = vrot.lane.b32.xlu1 %v1162_v7, %s3178_s7  ;;  %v3663_v7 = vld [vmem:[%s3265_s30 + $0x94] sm:$0xf] }
  0x79   : > { %1227 = vrot.lane.b32.xlu0 %v1066_v40, %s3178_s7  ;;  %v3668_v40 = vld [vmem:[%s3265_s30 + $0x34] sm:$0xf]  ;;  %v1680_v14 = vrot.slane %v1678_v52, 1  ;;  %v3675_v57 = vcombine.low %v213_v63, %v3663_v7 }
  0x7a   : > { %v3678_v26 = vcombine.low %v197_v39, %v3668_v40 }
  0x7b   : > { %4624 = vst [vmem:[#allocation6_spill] sm:$0xff] %v3675_v57  ;;  %v1681_v30 = vor.u32 %v1680_v14, %v1676_v9  ;;  %v665_v37 = vshll.u32 %v3675_v57, 16  ;;  %v2781_v9 = vcombine.low %v2637_v58, %v3624_v5 }
  0x7c   : > { %1245 = vrot.lane.b32.xlu1 %v1174_v16, %s3178_s7  ;;  %v2636_v16 = vld [vmem:[%s3265_s30 + $0x30] sm:$0xe]  ;;  %4625 = vst [vmem:[#allocation7_spill] sm:$0xff] %v3678_v26  ;;  %v569_v13 = vshll.u32 %v3678_v26, 16  ;;  %v567_v62 = vshrl.u32 %v3678_v26, 16 }
  0x7d   : > { %1229 = vrot.lane.b32.xlu0 %v1078_v24, %s3178_s7  ;;  %v1577_v24 = vrot.slane %v1575_v6, 1  ;;  %v2780_v27 = vcombine.low %v2636_v16, %v3612_v32  ;;  %v1686_v52 = vsel %vm517_vm1, %v1681_v30, %v1685_v10  ;;  %v667_v59 = vrot.slane %v665_v37, 1  ;;  %v249_v37 = vld [vmem:[%s3265_s30 + $0x90] sm:$0xe] }
  0x7e   : > { %v571_v0 = vrot.slane %v569_v13, 1  ;;  %v1824_v10 = vrot.slane %v2781_v9, 1  ;;  %v682_v30 = vshll.u32 %v3730_v12, 16 }
  0x7f   : > { %v1578_v32 = vsel %vm517_vm1, %v1573_v22, %v1577_v24  ;;  %v1821_v54 = vrot.slane %v2780_v27, 1  ;;  %v1825_v27 = vrot.slane %v3652_v55, 1 }
  0x80   : > { %1371 = vrot.lane.b32.xlu1 %v1335_v33, %s3179_s8  ;;  %v3684_v33 = vld [vmem:[%s3265_s30 + $0x98] ss:$0 sps:$4 sm:$0x11]   ;;  %v572_v16 = vor.u32 %v571_v0, %v567_v62  ;;  %v242_v62 = vld [vmem:[%s3265_s30 + $0x3c] sm:$0xe] }
  0x81   : > { %1355 = vrot.lane.b32.xlu0 %v1311_v17, %s3179_s8  ;;  %v3690_v17 = vld [vmem:[%s3265_s30 + $0x38] ss:$0 sps:$4 sm:$0x11]   ;;  %v670_v60 = vshll.u32 %v3684_v33, 16 }
  0x82   : > { %v574_v3 = vshll.u32 %v3690_v17, 16 }
  0x84   : > { %1373 = vrot.lane.b32.xlu1 %v1338_v45, %s3179_s8  ;;  %v199_v45 = vld [vmem:[%s3265_s30 + $0x3c] sm:$0xf]  ;;  %v576_v5 = vrot.slane %v574_v3, 1 }
  0x85   : > { %1357 = vrot.lane.b32.xlu0 %v1314_v48, %s3179_s8  ;;  %v2645_v48 = vld [vmem:[%s3265_s30 + $0x9c] sm:$0xe]  ;;  %v3722_v6 = vcombine.low %v199_v45, %v3703_v47 }
  0x86   : > { %v2789_v51 = vcombine.low %v2645_v48, %v3618_v36  ;;  %v1823_v36 = vsel %vm790_vm0, %v1821_v54, %v1822_v34  ;;  %v577_v13 = vsel %vm517_vm1, %v572_v16, %v576_v5  ;;  %v1826_v34 = vsel %vm790_vm0, %v1824_v10, %v1825_v27  ;;  %v2532_v27 = vld [vmem:[%s3265_s30 + $0x48] sm:$0xf] }
  0x87   : > { %4627 = vst [vmem:[#allocation9_spill] sm:$0xff] %v3722_v6  ;;  %v581_v8 = vshll.u32 %v3722_v6, 16  ;;  %v831_v10 = vrot.slane %v3730_v12, 1 }
  0x88   : > { %1483 = vrot.lane.b32.xlu1 %v2756_v2, %s3180_s9  ;;  %v1585_v2 = vor.u32 %v1584_v20, %v1580_v15  ;;  %v672_v15 = vrot.slane %v670_v60, 1  ;;  %v1848_v22 = vrot.slane %v2789_v51, 1  ;;  %v2546_v51 = vld [vmem:[%s3265_s30 + $0x9c] sm:$0xf] }
  0x89   : > { %1467 = vrot.lane.b32.xlu0 %v2748_v19, %s3180_s9  ;;  %v215_v19 = vld [vmem:[%s3265_s30 + $0x9c] sm:$0xf]  ;;  %v583_v1 = vrot.slane %v581_v8, 1  ;;  %v3794_v8 = vld [vmem:[%s3265_s30 + $0xac] sm:$0xf] }
  0x8a   : > { %v1590_v11 = vsel %vm517_vm1, %v1585_v2, %v1589_v35  ;;  %v1850_v48 = vsel %vm790_vm0, %v1848_v22, %v1849_v28 }
  0x8c   : > { %1485 = vrot.lane.b32.xlu1 %v2757_v42, %s3180_s9  ;;  %v3698_v42 = vld [vmem:[%s3265_s30 + $0xa0] sm:$0xf] }
  0x8d   : > { %1469 = vrot.lane.b32.xlu0 %v2749_v44, %s3180_s9  ;;  %v1846_v44 = vrot.slane %v3635_v46, 1  ;;  %v663_v46 = vshrl.u32 %v3675_v57, 16  ;;  %v3717_v61 = vcombine.low %v215_v19, %v3698_v42  ;;  %v579_v19 = vshrl.u32 %v3722_v6, 16 }
  0x8f   : > { %4626 = vst [vmem:[#allocation8_spill] sm:$0xff] %v3717_v61  ;;  %v1847_v39 = vsel %vm790_vm0, %v1845_v43, %v1846_v44  ;;  %v668_v14 = vor.u32 %v667_v59, %v663_v46  ;;  %v677_v20 = vshll.u32 %v3717_v61, 16  ;;  %v675_v35 = vshrl.u32 %v3717_v61, 16  ;;  %v250_v59 = vld [vmem:[%s3265_s30 + $0x9c] sm:$0xe] }
  0x90   : > { %v3693_v41 = vpop.permute.xlu1 %967  ;;  %1755 = vrot.lane.b32.xlu1 %v1674_v21, %s3181_s10  ;;  %v586_v43 = vshll.u32 %v3739_v56, 16  ;;  %v2694_v44 = vcombine.low %v249_v37, %v3663_v7  ;;  %v584_v58 = vor.u32 %v583_v1, %v579_v19  ;;  %v828_v7 = vrot.slane %v3684_v33, 1  ;;  %v2530_v33 = vld [vmem:[%s3265_s30 + $0x3c] sm:$0xf] }
  0x91   : > { %v3707_v49 = vpop.permute.xlu0 %951  ;;  %1739 = vrot.lane.b32.xlu0 %v1578_v32, %s3181_s10  ;;  %v673_v2 = vsel %vm517_vm1, %v668_v14, %v672_v15  ;;  %v679_v21 = vrot.slane %v677_v20, 1  ;;  %v241_v32 = vld [vmem:[%s3265_s30 + $0x30] sm:$0xe]  ;;  %v3778_v14 = vld [vmem:[%s3265_s30 + $0xa0] sm:$0xf]  ;;  %v2687_v20 = vcombine.low %v242_v62, %v3703_v47  ;;  %v807_v37 = vrot.slane %v3739_v56, 1 }
  0x92   : > { %v2686_v45 = vcombine.low %v241_v32, %v3668_v40  ;;  %v588_v46 = vrot.slane %v586_v43, 1  ;;  %v804_v40 = vrot.slane %v3690_v17, 1  ;;  %v827_v0 = vrot.slane %v2694_v44, 1  ;;  %v3814_v1 = vld [vmem:[%s3265_s30 + $0xa4] ss:$0 sps:$4 sm:$0x11]  }
  0x93   : > { %v2710_v5 = vcombine.low %v2546_v51, %v3778_v14  ;;  %v3830_v62 = vld [vmem:[%s3265_s30 + $0xb0] ss:$0 sps:$4 sm:$0x11]  }
  0x94   : > { %v3725_v63 = vpop.permute.xlu1 %855  ;;  %1757 = vrot.lane.b32.xlu1 %v1686_v52, %s3181_s10  ;;  %v680_v52 = vor.u32 %v679_v21, %v675_v35  ;;  %v803_v3 = vrot.slane %v2686_v45, 1  ;;  %v589_v15 = vsel %vm517_vm1, %v584_v58, %v588_v46  ;;  %v829_v22 = vsel %vm790_vm0, %v827_v0, %v828_v7  ;;  %v3836_v51 = vld [vmem:[%s3265_s30 + $0x50] ss:$0 sps:$4 sm:$0x11]  }
  0x95   : > { %1741 = vrot.lane.b32.xlu0 %v1590_v11, %s3181_s10  ;;  %v684_v11 = vrot.slane %v682_v30, 1  ;;  %v3802_v30 = vld [vmem:[%s3265_s30 + $0x4c] sm:$0xf]  ;;  %v806_v21 = vrot.slane %v2687_v20, 1  ;;  %v1178_v12 = vshll.u32 %v2710_v5, 16 }
  0x96   : > { %v3735_v4 = vpop.permute.xlu0 %839  ;;  %v805_v35 = vsel %vm790_vm0, %v803_v3, %v804_v40  ;;  %v2703_v19 = vcombine.low %v2532_v27, %v3802_v30 }
  0x97   : > { %v685_v9 = vsel %vm517_vm1, %v680_v52, %v684_v11  ;;  %v808_v56 = vsel %vm790_vm0, %v806_v21, %v807_v37  ;;  %v1180_v46 = vrot.slane %v1178_v12, 1  ;;  %v1099_v37 = vshll.u32 %v3836_v51, 16 }
  0x98   : > { %1883 = vrot.lane.b32.xlu1 %v1847_v39, %s3182_s11  ;;  %v2695_v39 = vcombine.low %v250_v59, %v3698_v42  ;;  %v2548_v42 = vld [vmem:[%s3265_s30 + $0xa8] sm:$0xf]  ;;  %v1094_v58 = vshll.u32 %v2703_v19, 16  ;;  %v1183_v59 = vshll.u32 %v3814_v1, 16  ;;  %v1092_v21 = vshrl.u32 %v2703_v19, 16 }
  0x99   : > { %v3743_v24 = vpop.permute.xlu1 %857  ;;  %1867 = vrot.lane.b32.xlu0 %v1823_v36, %s3182_s11  ;;  %v3786_v36 = vld [vmem:[%s3265_s30 + $0x40] sm:$0xf] }
  0x9a   : > { %v830_v28 = vrot.slane %v2695_v39, 1  ;;  %v2702_v47 = vcombine.low %v2530_v33, %v3786_v36  ;;  %v1185_v20 = vrot.slane %v1183_v59, 1  ;;  %v2575_v59 = vld [vmem:[%s3265_s30 + $0x48] sm:$0xe] }
  0x9b   : > { %v3756_v55 = vpop.permute.xlu0 %841 }
  0x9c   : > { %734 = vrot.lane.b32.xlu1 %v673_v2, %s3177_s6  ;;  %v832_v43 = vsel %vm790_vm0, %v830_v28, %v831_v10  ;;  %v1082_v44 = vshll.u32 %v2702_v47, 16  ;;  %v1080_v7 = vshrl.u32 %v2702_v47, 16  ;;  %v1195_v28 = vshll.u32 %v3830_v62, 16  ;;  %v2574_v10 = vld [vmem:[%s3265_s30 + $0x3c] sm:$0xe] }
  0x9d   : > { %718 = vrot.lane.b32.xlu0 %v577_v13, %s3177_s6  ;;  %v2711_v13 = vcombine.low %v2548_v42, %v3794_v8 }
  0x9e   : > { %v3763_v54 = vpop.permute.xlu1 %712  ;;  %v1084_v40 = vrot.slane %v1082_v44, 1  ;;  %v3854_v44 = vld [vmem:[%s3265_s30 + $0xac] sm:$0xf] }
  0x9f   : > { %v3767_v60 = vpop.permute.xlu0 %710  ;;  %v1190_v11 = vshll.u32 %v2711_v13, 16  ;;  %v1188_v33 = vshrl.u32 %v2711_v13, 16 }
  0xa0   : > { %1885 = vrot.lane.b32.xlu1 %v1850_v48, %s3182_s11  ;;  %v3822_v48 = vld [vmem:[%s3265_s30 + $0x44] ss:$0 sps:$4 sm:$0x11]   ;;  %v1085_v42 = vor.u32 %v1084_v40, %v1080_v7  ;;  %v1101_v40 = vrot.slane %v1099_v37, 1 }
  0xa1   : > { %1869 = vrot.lane.b32.xlu0 %v1826_v34, %s3182_s11  ;;  %v1176_v34 = vshrl.u32 %v2710_v5, 16  ;;  %v1087_v3 = vshll.u32 %v3822_v48, 16  ;;  %v1316_v37 = vrot.slane %v3822_v48, 1 }
  0xa2   : > { %v3781_v17 = vpop.permute.xlu1 %728 }
  0xa3   : > { %v3788_v16 = vpop.permute.xlu0 %726  ;;  %v1181_v39 = vor.u32 %v1180_v46, %v1176_v34  ;;  %v1197_v46 = vrot.slane %v1195_v28, 1 }
  0xa4   : > { %736 = vrot.lane.b32.xlu1 %v685_v9, %s3177_s6 }
  0xa5   : > { %720 = vrot.lane.b32.xlu0 %v589_v15, %s3177_s6  ;;  %v2582_v15 = vld [vmem:[%s3265_s30 + $0x9c] sm:$0xe]  ;;  %v1186_v34 = vsel %vm517_vm1, %v1181_v39, %v1185_v20  ;;  %v3875_v39 = vld [vmem:[%s3265_s30 + $0xb8] sm:$0xf] }
  0xa6   : > { %v3804_v2 = vpop.permute.xlu1 %969 }
  0xa7   : > { %v3808_v32 = vpop.permute.xlu0 %953 }
  0xa8   : > { %863 = vrot.lane.b32.xlu1 %v829_v22, %s3176_s5  ;;  %v1192_v22 = vrot.slane %v1190_v11, 1  ;;  %v2583_v11 = vld [vmem:[%s3265_s30 + $0xa8] sm:$0xe] }
  0xa9   : > { %847 = vrot.lane.b32.xlu0 %v805_v35, %s3176_s5  ;;  %v1089_v35 = vrot.slane %v1087_v3, 1  ;;  %v2594_v3 = vld [vmem:[%s3265_s30 + $0x48] sm:$0xf] }
  0xaa   : > { %v3818_v45 = vpop.permute.xlu1 %1239 }
  0xab   : > { %v3824_v52 = vpop.permute.xlu0 %1223 }
  0xac   : > { %865 = vrot.lane.b32.xlu1 %v832_v43, %s3176_s5  ;;  %v2610_v43 = vld [vmem:[%s3265_s30 + $0xa8] sm:$0xf] }
  0xad   : > { %849 = vrot.lane.b32.xlu0 %v808_v56, %s3176_s5  ;;  %v2734_v56 = vcombine.low %v2574_v10, %v3786_v36  ;;  %v3868_v36 = vcombine.low %v2610_v43, %v3854_v44  ;;  %v3871_v10 = vld [vmem:[%s3265_s30 + $0x4c] sm:$0xf] }
  0xae   : > { %v3832_v0 = vpop.permute.xlu1 %1241 }
  0xaf   : > { %v3838_v9 = vpop.permute.xlu0 %1225 }
  0xb0   : > { %975 = vrot.lane.b32.xlu1 %v2710_v5, %s3175_s4  ;;  %v1096_v5 = vrot.slane %v1094_v58, 1  ;;  %v1193_v58 = vor.u32 %v1192_v22, %v1188_v33  ;;  %v2743_v33 = vcombine.low %v2583_v11, %v3794_v8  ;;  %v2735_v22 = vcombine.low %v2575_v59, %v3802_v30  ;;  %v3895_v30 = vld [vmem:[%s3265_s30 + $0x58] sm:$0xf]  ;;  %v3901_v11 = vld [vmem:[%s3265_s30 + $0xb0] ss:$0 sps:$4 sm:$0x11]  }
  0xb1   : > { %959 = vrot.lane.b32.xlu0 %v2702_v47, %s3175_s4  ;;  %v2742_v47 = vcombine.low %v2582_v15, %v3778_v14  ;;  %v1090_v14 = vsel %vm517_vm1, %v1085_v42, %v1089_v35  ;;  %v1340_v42 = vrot.slane %v3814_v1, 1  ;;  %v1315_v35 = vrot.slane %v2734_v56, 1  ;;  %v2596_v1 = vld [vmem:[%s3265_s30 + $0x54] sm:$0xf] }
  0xb2   : > { %v3845_v27 = vpop.permute.xlu1 %1367  ;;  %v1198_v28 = vsel %vm517_vm1, %v1193_v58, %v1197_v46  ;;  %v3888_v8 = vcombine.low %v2594_v3, %v3871_v10  ;;  %v1690_v56 = vshll.u32 %v3868_v36, 16  ;;  %v1343_v58 = vrot.slane %v3830_v62, 1 }
  0xb3   : > { %v3848_v12 = vpop.permute.xlu0 %1351  ;;  %v1339_v20 = vrot.slane %v2742_v47, 1  ;;  %v1318_v46 = vrot.slane %v2735_v22, 1  ;;  %v1319_v59 = vrot.slane %v3836_v51, 1  ;;  %v1317_v3 = vsel %vm790_vm0, %v1315_v35, %v1316_v37  ;;  %v3927_v35 = vld [vmem:[%s3265_s30 + $0x50] ss:$0 sps:$4 sm:$0x11]  }
  0xb4   : > { %977 = vrot.lane.b32.xlu1 %v2711_v13, %s3175_s4  ;;  %v1097_v13 = vor.u32 %v1096_v5, %v1092_v21  ;;  %v1688_v51 = vshrl.u32 %v3868_v36, 16  ;;  %v1913_v22 = vsel %vm1895_vm3, %v3297_v18, %v3788_v16  ;;  %v3937_v16 = vld [vmem:[%s3265_s30 + $0xbc] ss:$0 sps:$4 sm:$0x11]  }
  0xb5   : > { %961 = vrot.lane.b32.xlu0 %v2703_v19, %s3175_s4  ;;  %v2612_v19 = vld [vmem:[%s3265_s30 + $0xb4] sm:$0xf]  ;;  %v1341_v48 = vsel %vm790_vm0, %v1339_v20, %v1340_v42  ;;  %v1692_v20 = vrot.slane %v1690_v56, 1  ;;  %v1695_v42 = vshll.u32 %v3901_v11, 16 }
  0xb6   : > { %v3861_v7 = vpop.permute.xlu1 %1369  ;;  %v1102_v5 = vsel %vm517_vm1, %v1097_v13, %v1101_v40  ;;  %v3891_v47 = vcombine.low %v2612_v19, %v3875_v39  ;;  %v3910_v13 = vcombine.low %v2596_v1, %v3895_v30  ;;  %v1594_v19 = vshll.u32 %v3888_v8, 16 }
  0xb7   : > { %v3865_v15 = vpop.permute.xlu0 %1353  ;;  %v1320_v1 = vsel %vm790_vm0, %v1318_v46, %v1319_v59  ;;  %v3945_v46 = vld [vmem:[%s3265_s30 + $0x5c] ss:$0 sps:$4 sm:$0x11]  }
  0xb8   : > { %1247 = vrot.lane.b32.xlu1 %v1186_v34, %s3178_s7  ;;  %v1342_v34 = vrot.slane %v2743_v33, 1  ;;  %v1702_v33 = vshll.u32 %v3891_v47, 16  ;;  %v1606_v18 = vshll.u32 %v3910_v13, 16  ;;  %v1700_v6 = vshrl.u32 %v3891_v47, 16 }
  0xb9   : > { %1231 = vrot.lane.b32.xlu0 %v1090_v14, %s3178_s7  ;;  %v2646_v14 = vld [vmem:[%s3265_s30 + $0xa8] sm:$0xe]  ;;  %v1611_v57 = vshll.u32 %v3945_v46, 16 }
  0xba   : > { %v3883_v21 = vpop.permute.xlu1 %1479  ;;  %v1344_v37 = vsel %vm790_vm0, %v1342_v34, %v1343_v58  ;;  %v1704_v61 = vrot.slane %v1702_v33, 1  ;;  %v1693_v34 = vor.u32 %v1692_v20, %v1688_v51  ;;  %v1697_v58 = vrot.slane %v1695_v42, 1  ;;  %v217_v20 = vld [vmem:[%s3265_s30 + $0xa8] sm:$0xf]  ;;  %v3957_v42 = vld [vmem:[%s3265_s30 + $0xac] sm:$0xf] }
  0xbb   : > { %v3897_v43 = vpop.permute.xlu0 %1463  ;;  %v1707_v33 = vshll.u32 %v3937_v16, 16  ;;  %v1608_v51 = vrot.slane %v1606_v18, 1 }
  0xbc   : > { %1249 = vrot.lane.b32.xlu1 %v1198_v28, %s3178_s7  ;;  %v2790_v28 = vcombine.low %v2646_v14, %v3854_v44  ;;  %v1592_v44 = vshrl.u32 %v3888_v8, 16  ;;  %v1596_v14 = vrot.slane %v1594_v19, 1  ;;  %v1604_v19 = vshrl.u32 %v3910_v13, 16 }
  0xbd   : > { %1233 = vrot.lane.b32.xlu0 %v1102_v5, %s3178_s7  ;;  %v1897_v5 = vsel %vm1895_vm3, %v3302_v23, %v3767_v60  ;;  %v1946_v23 = vsel %vm1928_vm4, %v1913_v22, %v3725_v63  ;;  %v1698_v18 = vsel %vm517_vm1, %v1693_v34, %v1697_v58 }
  0xbe   : > { %v3912_v40 = vpop.permute.xlu1 %1481  ;;  %v1930_v59 = vsel %vm1928_vm4, %v1897_v5, %v3735_v4  ;;  %v1979_v4 = vsel %vm1961_vm5, %v1946_v23, %v3693_v41  ;;  %v1597_v5 = vor.u32 %v1596_v14, %v1592_v44  ;;  %v3963_v26 = vrot.slane %v2790_v28, 1  ;;  %v3975_v41 = vld [vmem:[%s3265_s30 + $0x4c] sm:$0xf] }
  0xbf   : > { %v3917_v62 = vpop.permute.xlu0 %1465  ;;  %v1609_v14 = vor.u32 %v1608_v51, %v1604_v19  ;;  %v4036_v51 = vld [vmem:[%s3265_s30 + $0xb8] sm:$0xf] }
  0xc0   : > { %1375 = vrot.lane.b32.xlu1 %v1341_v48, %s3179_s8  ;;  %v2638_v48 = vld [vmem:[%s3265_s30 + $0x48] sm:$0xe] }
  0xc1   : > { %1359 = vrot.lane.b32.xlu0 %v1317_v3, %s3179_s8  ;;  %v1599_v3 = vshll.u32 %v3927_v35, 16  ;;  %v2782_v63 = vcombine.low %v2638_v48, %v3871_v10  ;;  %v1963_v10 = vsel %vm1961_vm5, %v1930_v59, %v3707_v49  ;;  %v3984_v49 = vcombine.low %v217_v20, %v3957_v42 }
  0xc2   : > { %v1752_v56 = vpop.permute.xlu1 %1751 }
  0xc3   : > { %v1736_v60 = vpop.permute.xlu0 %1735 }
  0xc4   : > { %1377 = vrot.lane.b32.xlu1 %v1344_v37, %s3179_s8  ;;  %v1705_v37 = vor.u32 %v1704_v61, %v1700_v6  ;;  %v1996_v61 = vsel %vm1994_vm6, %v1963_v10, %v3824_v52  ;;  %v1709_v52 = vrot.slane %v1707_v33, 1  ;;  %v219_v33 = vld [vmem:[%s3265_s30 + $0xb4] sm:$0xf] }
  0xc5   : > { %1361 = vrot.lane.b32.xlu0 %v1320_v1, %s3179_s8  ;;  %v2012_v1 = vsel %vm1994_vm6, %v1979_v4, %v3818_v45  ;;  %v1601_v45 = vrot.slane %v1599_v3, 1  ;;  %v2029_v28 = vsel %vm2027_vm7, %v1996_v61, %v3848_v12  ;;  %v3999_v12 = vcombine.low %v201_v29, %v3975_v41 }
  0xc6   : > { %v3961_v22 = vpop.permute.xlu1 %1753  ;;  %v2045_v6 = vsel %vm2027_vm7, %v2012_v1, %v3845_v27  ;;  %v1915_v27 = vsel %vm1895_vm3, %v3309_v31, %v3781_v17  ;;  %v1613_v31 = vrot.slane %v1611_v57, 1  ;;  %v4007_v17 = vld [vmem:[%s3265_s30 + $0xb0] ss:$0 sps:$4 sm:$0x11]   ;;  %v1852_v29 = vrot.slane %v3901_v11, 1 }
  0xc7   : > { %v3969_v48 = vpop.permute.xlu0 %1737  ;;  %v2078_v44 = vsel %vm2060_vm8, %v2045_v6, %v3883_v21  ;;  %v1899_v21 = vsel %vm1895_vm3, %v3315_v38, %v3763_v54  ;;  %v1827_v38 = vrot.slane %v2782_v63, 1  ;;  %v689_v54 = vshll.u32 %v3984_v49, 16 }
  0xc8   : > { %1487 = vrot.lane.b32.xlu1 %v3868_v36, %s3180_s9  ;;  %v2062_v36 = vsel %vm2060_vm8, %v2029_v28, %v3897_v43  ;;  %v2111_v23 = vsel %vm2093_vm9, %v2078_v44, %v1752_v56  ;;  %v1948_v56 = vsel %vm1928_vm4, %v1915_v27, %v3743_v24  ;;  %v1602_v57 = vsel %vm517_vm1, %v1597_v5, %v1601_v45  ;;  %v203_v5 = vld [vmem:[%s3265_s30 + $0x54] sm:$0xf] }
  0xc9   : > { %1471 = vrot.lane.b32.xlu0 %v3888_v8, %s3180_s9  ;;  %v2095_v8 = vsel %vm2093_vm9, %v2062_v36, %v1736_v60  ;;  %v1828_v11 = vrot.slane %v3927_v35, 1  ;;  %v4024_v60 = vld [vmem:[%s3265_s30 + $0x50] ss:$0 sps:$4 sm:$0x11]   ;;  %v1981_v3 = vsel %vm1961_vm5, %v1948_v56, %v3804_v2  ;;  %v1932_v24 = vsel %vm1928_vm4, %v1899_v21, %v3756_v55  ;;  %v2647_v45 = vld [vmem:[%s3265_s30 + $0xb4] sm:$0xe] }
  0xca   : > { %v1880_v34 = vpop.permute.xlu1 %1879  ;;  %v593_v63 = vshll.u32 %v3999_v12, 16  ;;  %v1965_v35 = vsel %vm1961_vm5, %v1932_v24, %v3808_v32  ;;  %v2014_v2 = vsel %vm1994_vm6, %v1981_v3, %v3832_v0  ;;  %v1614_v55 = vsel %vm517_vm1, %v1609_v14, %v1613_v31  ;;  %v2639_v28 = vld [vmem:[%s3265_s30 + $0x54] sm:$0xe] }
  0xcb   : > { %v1864_v58 = vpop.permute.xlu0 %1863  ;;  %v2144_v59 = vsel %vm2126_vm10, %v2111_v23, %v1880_v34  ;;  %v694_v4 = vshll.u32 %v4007_v17, 16  ;;  %v1998_v1 = vsel %vm1994_vm6, %v1965_v35, %v3838_v9  ;;  %v2047_v10 = vsel %vm2027_vm7, %v2014_v2, %v3861_v7 }
  0xcc   : > { %1489 = vrot.lane.b32.xlu1 %v3891_v47, %s3180_s9  ;;  %v2128_v43 = vsel %vm2126_vm10, %v2095_v8, %v1864_v58  ;;  %2861 = vmatprep.mubr.msk.bf16.mxu1 %vm2186_vm11, %v2144_v59  ;;  %v1710_v47 = vsel %vm517_vm1, %v1705_v37, %v1709_v52  ;;  %v4048_v37 = vld [vmem:[%s3265_s30 + $0x58] sm:$0xf]  ;;  %v691_v32 = vrot.slane %v689_v54, 1  ;;  %v591_v0 = vshrl.u32 %v3999_v12, 16 }
  0xcd   : > { %1473 = vrot.lane.b32.xlu0 %v3910_v13, %s3180_s9  ;;  %2845 = vmatprep.mubr.msk.bf16.mxu0 %vm2186_vm11, %v2128_v43  ;;  %v687_v13 = vshrl.u32 %v3984_v49, 16  ;;  %v2031_v61 = vsel %vm2027_vm7, %v1998_v1, %v3865_v15  ;;  %v2080_v6 = vsel %vm2060_vm8, %v2047_v10, %v3912_v40  ;;  %v598_v9 = vshll.u32 %v4024_v60, 16  ;;  %v4087_v8 = vld [vmem:[%s3265_s30 + $0xbc] ss:$0 sps:$4 sm:$0x11]  }
  0xce   : > { %v4030_v19 = vpop.permute.xlu1 %730  ;;  %v4065_v44 = vcombine.low %v219_v33, %v4036_v51  ;;  %v2064_v7 = vsel %vm2060_vm8, %v2031_v61, %v3917_v62  ;;  %v595_v15 = vrot.slane %v593_v63, 1  ;;  %v4072_v40 = vcombine.low %v203_v5, %v4048_v37  ;;  %v4094_v43 = vld [vmem:[%s3265_s30 + $0x5c] ss:$0 sps:$4 sm:$0x11]  }
  0xcf   : > { %v4042_v20 = vpop.permute.xlu0 %714  ;;  %v2097_v14 = vsel %vm2093_vm9, %v2064_v7, %v3969_v48  ;;  %v2791_v23 = vcombine.low %v2647_v45, %v3875_v39  ;;  %v2783_v62 = vcombine.low %v2639_v28, %v3895_v30  ;;  %v692_v48 = vor.u32 %v691_v32, %v687_v13  ;;  %v252_v28 = vld [vmem:[%s3265_s30 + $0xb4] sm:$0xe] }
  0xd0   : > { %1759 = vrot.lane.b32.xlu1 %v1698_v18, %s3181_s10  ;;  %v2113_v18 = vsel %vm2093_vm9, %v2080_v6, %v3961_v22  ;;  %v1853_v22 = vsel %vm790_vm0, %v3963_v26, %v1852_v29  ;;  %v696_v21 = vrot.slane %v694_v4, 1  ;;  %v701_v39 = vshll.u32 %v4065_v44, 16  ;;  %v244_v7 = vld [vmem:[%s3265_s30 + $0x54] sm:$0xe] }
  0xd1   : > { %1743 = vrot.lane.b32.xlu0 %v1602_v57, %s3181_s10  ;;  %v1829_v58 = vsel %vm790_vm0, %v1827_v38, %v1828_v11  ;;  %v596_v59 = vor.u32 %v595_v15, %v591_v0  ;;  %v600_v31 = vrot.slane %v598_v9, 1  ;;  %v605_v54 = vshll.u32 %v4072_v40, 16 }
  0xd2   : > { %v1882_v52 = vpop.permute.xlu1 %1881  ;;  %v1854_v26 = vrot.slane %v2791_v23, 1  ;;  %v1855_v29 = vrot.slane %v3937_v16, 1  ;;  %v1830_v57 = vrot.slane %v2783_v62, 1  ;;  %v697_v38 = vsel %vm517_vm1, %v692_v48, %v696_v21  ;;  %v2550_v62 = vld [vmem:[%s3265_s30 + $0xb4] sm:$0xf] }
  0xd3   : > { %v2146_v27 = vsel %vm2126_vm10, %v2113_v18, %v1882_v52  ;;  %v1866_v36 = vpop.permute.xlu0 %1865  ;;  %v699_v11 = vshrl.u32 %v4065_v44, 16  ;;  %v703_v3 = vrot.slane %v701_v39, 1  ;;  %v706_v24 = vshll.u32 %v4087_v8, 16  ;;  %v2534_v48 = vld [vmem:[%s3265_s30 + $0x54] sm:$0xf] }
  0xd4   : > { %v2130_v34 = vsel %vm2126_vm10, %v2097_v14, %v1866_v36  ;;  %1761 = vrot.lane.b32.xlu1 %v1710_v47, %s3181_s10  ;;  %2862 = vmatmul.mubr.msk.bf16.vlgmr.msra.gmra.mxu1 %vm2186_vm11, %v2146_v27  ;;  %v1831_v47 = vrot.slane %v3945_v46, 1  ;;  %v601_v63 = vsel %vm517_vm1, %v596_v59, %v600_v31  ;;  %v603_v33 = vshrl.u32 %v4072_v40, 16  ;;  %v251_v46 = vld [vmem:[%s3265_s30 + $0xa8] sm:$0xe] }
  0xd5   : > { %1745 = vrot.lane.b32.xlu0 %v1614_v55, %s3181_s10  ;;  %2846 = vmatmul.mubr.msk.bf16.vlgmr.msra.gmra.mxu0 %vm2186_vm11, %v2130_v34  ;;  %v607_v35 = vrot.slane %v605_v54, 1  ;;  %v610_v16 = vshll.u32 %v4094_v43, 16  ;;  %v243_v55 = vld [vmem:[%s3265_s30 + $0x48] sm:$0xe]  ;;  %v1856_v4 = vsel %vm790_vm0, %v1854_v26, %v1855_v29  ;;  %v704_v5 = vor.u32 %v703_v3, %v699_v11  ;;  %v4139_v34 = vld [vmem:[%s3265_s30 + $0xb8] sm:$0xf] }
  0xd6   : > { %v4090_v30 = vpop.permute.xlu1 %732  ;;  %v708_v1 = vrot.slane %v706_v24, 1  ;;  %v2696_v10 = vcombine.low %v251_v46, %v3957_v42  ;;  %v1832_v0 = vsel %vm790_vm0, %v1830_v57, %v1831_v47  ;;  %v2688_v45 = vcombine.low %v243_v55, %v3975_v41  ;;  %v2552_v26 = vld [vmem:[%s3265_s30 + $0xc0] sm:$0xf]  ;;  %v4159_v29 = vld [vmem:[%s3265_s30 + $0xc4] sm:$0xf] }
  0xd7   : > { %v4097_v56 = vpop.permute.xlu0 %716  ;;  %v608_v61 = vor.u32 %v607_v35, %v603_v33  ;;  %v612_v6 = vrot.slane %v610_v16, 1  ;;  %v834_v52 = vrot.slane %v4007_v17, 1  ;;  %v2697_v15 = vcombine.low %v252_v28, %v4036_v51  ;;  %v4145_v17 = vld [vmem:[%s3265_s30 + $0x58] sm:$0xf]  ;;  %v2536_v47 = vld [vmem:[%s3265_s30 + $0x60] sm:$0xf] }
  0xd8   : > { %1887 = vrot.lane.b32.xlu1 %v1853_v22, %s3182_s11  ;;  %v709_v42 = vsel %vm517_vm1, %v704_v5, %v708_v1  ;;  %v833_v18 = vrot.slane %v2696_v10, 1  ;;  %v809_v27 = vrot.slane %v2688_v45, 1  ;;  %v810_v36 = vrot.slane %v4024_v60, 1  ;;  %v4175_v24 = vld [vmem:[%s3265_s30 + $0x5c] ss:$0 sps:$4 sm:$0x11]  }
  0xd9   : > { %1871 = vrot.lane.b32.xlu0 %v1829_v58, %s3182_s11  ;;  %v613_v41 = vsel %vm517_vm1, %v608_v61, %v612_v6  ;;  %v2689_v23 = vcombine.low %v244_v7, %v4048_v37  ;;  %v836_v51 = vrot.slane %v2697_v15, 1  ;;  %v837_v37 = vrot.slane %v4087_v8, 1  ;;  %v4169_v8 = vld [vmem:[%s3265_s30 + $0xbc] ss:$0 sps:$4 sm:$0x11]  }
  0xda   : > { %v4106_v13 = vpop.permute.xlu1 %859  ;;  %v835_v60 = vsel %vm790_vm0, %v833_v18, %v834_v52  ;;  %v2712_v21 = vcombine.low %v2550_v62, %v4139_v34  ;;  %v811_v58 = vsel %vm790_vm0, %v809_v27, %v810_v36  ;;  %v813_v31 = vrot.slane %v4094_v43, 1  ;;  %v4188_v10 = vld [vmem:[%s3265_s30 + $0xc8] ss:$0 sps:$4 sm:$0x11]  }
  0xdb   : > { %v4112_v2 = vpop.permute.xlu0 %843  ;;  %v812_v59 = vrot.slane %v2689_v23, 1  ;;  %v2704_v54 = vcombine.low %v2534_v48, %v4145_v17  ;;  %v838_v11 = vsel %vm790_vm0, %v836_v51, %v837_v37  ;;  %v2713_v43 = vcombine.low %v2552_v26, %v4159_v29  ;;  %v4193_v28 = vld [vmem:[%s3265_s30 + $0x68] ss:$0 sps:$4 sm:$0x11]   ;;  %v2584_v37 = vld [vmem:[%s3265_s30 + $0xb4] sm:$0xe] }
  0xdc   : > { %738 = vrot.lane.b32.xlu1 %v697_v38, %s3177_s6  ;;  %v4165_v38 = vld [vmem:[%s3265_s30 + $0x64] sm:$0xf]  ;;  %v1202_v3 = vshll.u32 %v2712_v21, 16  ;;  %v1200_v55 = vshrl.u32 %v2712_v21, 16  ;;  %v1111_v1 = vshll.u32 %v4175_v24, 16  ;;  %v1219_v36 = vshll.u32 %v4188_v10, 16 }
  0xdd   : > { %722 = vrot.lane.b32.xlu0 %v601_v63, %s3177_s6  ;;  %v814_v33 = vsel %vm790_vm0, %v812_v59, %v813_v31  ;;  %v2705_v35 = vcombine.low %v2536_v47, %v4165_v38  ;;  %v1106_v16 = vshll.u32 %v2704_v54, 16  ;;  %v1104_v6 = vshrl.u32 %v2704_v54, 16 }
  0xde   : > { %v4119_v32 = vpop.permute.xlu1 %861  ;;  %v1204_v5 = vrot.slane %v1202_v3, 1  ;;  %v1212_v52 = vshrl.u32 %v2713_v43, 16  ;;  %v1123_v51 = vshll.u32 %v4193_v28, 16  ;;  %v2744_v26 = vcombine.low %v2584_v37, %v4139_v34 }
  0xdf   : > { %v4124_v9 = vpop.permute.xlu0 %845  ;;  %v1108_v45 = vrot.slane %v1106_v16, 1  ;;  %v1118_v7 = vshll.u32 %v2705_v35, 16  ;;  %v1116_v48 = vshrl.u32 %v2705_v35, 16 }
  0xe0   : > { %1889 = vrot.lane.b32.xlu1 %v1856_v4, %s3182_s11  ;;  %v1207_v4 = vshll.u32 %v4169_v8, 16  ;;  %v1205_v15 = vor.u32 %v1204_v5, %v1200_v55  ;;  %v2585_v55 = vld [vmem:[%s3265_s30 + $0xc0] sm:$0xe]  ;;  %v1346_v5 = vrot.slane %v4169_v8, 1 }
  0xe1   : > { %1873 = vrot.lane.b32.xlu0 %v1832_v0, %s3182_s11  ;;  %v1214_v0 = vshll.u32 %v2713_v43, 16  ;;  %v1109_v62 = vor.u32 %v1108_v45, %v1104_v6 }
  0xe2   : > { %v4132_v14 = vpop.permute.xlu1 %971  ;;  %v1209_v18 = vrot.slane %v1207_v4, 1  ;;  %v1345_v4 = vrot.slane %v2744_v26, 1 }
  0xe3   : > { %v4141_v22 = vpop.permute.xlu0 %955  ;;  %v1216_v27 = vrot.slane %v1214_v0, 1  ;;  %v4226_v0 = vld [vmem:[%s3265_s30 + $0xc4] sm:$0xf] }
  0xe4   : > { %740 = vrot.lane.b32.xlu1 %v709_v42, %s3177_s6  ;;  %v1210_v59 = vsel %vm517_vm1, %v1205_v15, %v1209_v18  ;;  %v1322_v18 = vrot.slane %v4175_v24, 1  ;;  %v2598_v15 = vld [vmem:[%s3265_s30 + $0x60] sm:$0xf]  ;;  %v1347_v24 = vsel %vm790_vm0, %v1345_v4, %v1346_v5  ;;  %v4277_v4 = vld [vmem:[%s3265_s30 + $0xd4] ss:$0 sps:$4 sm:$0x11]  }
  0xe5   : > { %724 = vrot.lane.b32.xlu0 %v613_v41, %s3177_s6  ;;  %v1113_v41 = vrot.slane %v1111_v1, 1  ;;  %v1217_v31 = vor.u32 %v1216_v27, %v1212_v52  ;;  %v2745_v1 = vcombine.low %v2585_v55, %v4159_v29  ;;  %v2616_v27 = vld [vmem:[%s3265_s30 + $0xcc] sm:$0xf]  ;;  %s4491_s6 = scalar_lea.vmem [#allocation2], %s2520_s29 }
  0xe6   : > { %v4152_v39 = vpop.permute.xlu1 %973 }
  0xe7   : > { %v4161_v57 = vpop.permute.xlu0 %957 }
  0xe8   : > { %867 = vrot.lane.b32.xlu1 %v835_v60, %s3176_s5  ;;  %v1120_v60 = vrot.slane %v1118_v7, 1 }
  0xe9   : > { %851 = vrot.lane.b32.xlu0 %v811_v58, %s3176_s5  ;;  %v2576_v58 = vld [vmem:[%s3265_s30 + $0x54] sm:$0xe] }
  0xea   : > { %v4177_v63 = vpop.permute.xlu1 %1243  ;;  %v1121_v3 = vor.u32 %v1120_v60, %v1116_v48  ;;  %v2736_v16 = vcombine.low %v2576_v58, %v4145_v17  ;;  %v2614_v17 = vld [vmem:[%s3265_s30 + $0xc0] sm:$0xf]  ;;  %v4250_v60 = vld [vmem:[%s3265_s30 + $0xc8] ss:$0 sps:$4 sm:$0x11]  }
  0xeb   : > { %v4181_v46 = vpop.permute.xlu0 %1227  ;;  %v2760_v29 = vcombine.low %v2614_v17, %v4226_v0 }
  0xec   : > { %869 = vrot.lane.b32.xlu1 %v838_v11, %s3176_s5  ;;  %v1114_v11 = vsel %vm517_vm1, %v1109_v62, %v1113_v41  ;;  %v1321_v7 = vrot.slane %v2736_v16, 1  ;;  %v4235_v41 = vld [vmem:[%s3265_s30 + $0x64] sm:$0xf]  ;;  %v1349_v62 = vrot.slane %v4188_v10, 1  ;;  %v1719_v16 = vshll.u32 %v4250_v60, 16 }
  0xed   : > { %853 = vrot.lane.b32.xlu0 %v814_v33, %s3176_s5  ;;  %v1125_v33 = vrot.slane %v1123_v51, 1  ;;  %v2752_v48 = vcombine.low %v2598_v15, %v4235_v41  ;;  %v4266_v10 = vld [vmem:[%s3265_s30 + $0x68] ss:$0 sps:$4 sm:$0x11]  }
  0xee   : > { %v4190_v61 = vpop.permute.xlu1 %1245  ;;  %v1323_v37 = vsel %vm790_vm0, %v1321_v7, %v1322_v18  ;;  %v1623_v17 = vshll.u32 %v4266_v10, 16  ;;  %v1917_v7 = vsel %vm1895_vm3, %v3450_v50, %v4030_v19 }
  0xef   : > { %v4195_v42 = vpop.permute.xlu0 %1229  ;;  %v1126_v45 = vsel %vm517_vm1, %v1121_v3, %v1125_v33  ;;  %v1714_v3 = vshll.u32 %v2760_v29, 16 }
  0xf0   : > { %979 = vrot.lane.b32.xlu1 %v2712_v21, %s3175_s4 }
  0xf1   : > { %963 = vrot.lane.b32.xlu0 %v2704_v54, %s3175_s4  ;;  %v1221_v54 = vrot.slane %v1219_v36, 1  ;;  %v4243_v36 = vld [vmem:[%s3265_s30 + $0xd0] sm:$0xf]  ;;  %v1716_v18 = vrot.slane %v1714_v3, 1  ;;  %v1625_v3 = vrot.slane %v1623_v17, 1 }
  0xf2   : > { %v4200_v23 = vpop.permute.xlu1 %1371  ;;  %v4260_v26 = vcombine.low %v2616_v27, %v4243_v36  ;;  %v1901_v27 = vsel %vm1895_vm3, %v3453_v53, %v4042_v20  ;;  %v1731_v53 = vshll.u32 %v4277_v4, 16 }
  0xf3   : > { %v4204_v21 = vpop.permute.xlu0 %1355  ;;  %v1222_v34 = vsel %vm517_vm1, %v1217_v31, %v1221_v54  ;;  %v2600_v31 = vld [vmem:[%s3265_s30 + $0x6c] sm:$0xf]  ;;  %v1934_v50 = vsel %vm1928_vm4, %v1901_v27, %v4112_v2 }
  0xf4   : > { %981 = vrot.lane.b32.xlu1 %v2713_v43, %s3175_s4  ;;  %v1724_v15 = vshrl.u32 %v4260_v26, 16 }
  0xf5   : > { %965 = vrot.lane.b32.xlu0 %v2705_v35, %s3175_s4  ;;  %v2577_v35 = vld [vmem:[%s3265_s30 + $0x60] sm:$0xe] }
  0xf6   : > { %v4211_v47 = vpop.permute.xlu1 %1373  ;;  %v2737_v52 = vcombine.low %v2577_v35, %v4165_v38  ;;  %v1348_v38 = vrot.slane %v2745_v1, 1  ;;  %v1712_v1 = vshrl.u32 %v2760_v29, 16 }
  0xf7   : > { %v4216_v43 = vpop.permute.xlu0 %1357 }
  0xf8   : > { %1251 = vrot.lane.b32.xlu1 %v1210_v59, %s3178_s7  ;;  %v1324_v58 = vrot.slane %v2737_v52, 1  ;;  %v1325_v59 = vrot.slane %v4193_v28, 1  ;;  %v1350_v33 = vsel %vm790_vm0, %v1348_v38, %v1349_v62  ;;  %v1618_v28 = vshll.u32 %v2752_v48, 16 }
  0xf9   : > { %1235 = vrot.lane.b32.xlu0 %v1114_v11, %s3178_s7  ;;  %v4263_v11 = vld [vmem:[%s3265_s30 + $0x70] sm:$0xf]  ;;  %v1616_v52 = vshrl.u32 %v2752_v48, 16  ;;  %v1721_v38 = vrot.slane %v1719_v16, 1  ;;  %v1717_v16 = vor.u32 %v1716_v18, %v1712_v1 }
  0xfa   : > { %v4228_v6 = vpop.permute.xlu1 %1483  ;;  %v1326_v35 = vsel %vm790_vm0, %v1324_v58, %v1325_v59  ;;  %v1620_v62 = vrot.slane %v1618_v28, 1 }
  0xfb   : > { %v4237_v8 = vpop.permute.xlu0 %1467 }
  0xfc   : > { %1253 = vrot.lane.b32.xlu1 %v1222_v34, %s3178_s7  ;;  %v4274_v34 = vcombine.low %v2600_v31, %v4263_v11  ;;  %v1621_v17 = vor.u32 %v1620_v62, %v1616_v52  ;;  %v1919_v52 = vsel %vm1895_vm3, %v3488_v25, %v4090_v30 }
  0xfd   : > { %1237 = vrot.lane.b32.xlu0 %v1126_v45, %s3178_s7  ;;  %v1726_v45 = vshll.u32 %v4260_v26, 16  ;;  %s2819_s7 = sshll.u32 %s3165_s15, 12 }
  0xfe   : > { %v4252_v51 = vpop.permute.xlu1 %1485  ;;  %v1630_v20 = vshll.u32 %v4274_v34, 16  ;;  %v1628_v28 = vshrl.u32 %v4274_v34, 16  ;;  %v1626_v25 = vsel %vm517_vm1, %v1621_v17, %v1625_v3  ;;  %s4556_s15 = scalar_lea.hbm %s4615_s3, %s2819_s7 }
  0xff   : > { %v4257_v54 = vpop.permute.xlu0 %1469 }
 0x100   : > { %1379 = vrot.lane.b32.xlu1 %v1347_v24, %s3179_s8  ;;  %v1950_v24 = vsel %vm1928_vm4, %v1917_v7, %v4106_v13  ;;  %v1967_v13 = vsel %vm1961_vm5, %v1934_v50, %v4141_v22  ;;  %v1632_v7 = vrot.slane %v1630_v20, 1 }
 0x101   : > { %1363 = vrot.lane.b32.xlu0 %v1323_v37, %s3179_s8  ;;  %v4293_v37 = vld [vmem:[%s3265_s30 + $0x74] ss:$0 sps:$4 sm:$0x11]   ;;  %v1983_v19 = vsel %vm1961_vm5, %v1950_v24, %v4132_v14  ;;  %v2000_v2 = vsel %vm1994_vm6, %v1967_v13, %v4181_v46 }
 0x102   : > { %v1756_v55 = vpop.permute.xlu1 %1755  ;;  %v2016_v59 = vsel %vm1994_vm6, %v1983_v19, %v4177_v63  ;;  %v2033_v22 = vsel %vm2027_vm7, %v2000_v2, %v4204_v21  ;;  %v1635_v46 = vshll.u32 %v4293_v37, 16  ;;  %v2641_v19 = vld [vmem:[%s3265_s30 + $0x6c] sm:$0xe] }
 0x103   : > { %v1740_v5 = vpop.permute.xlu0 %1739  ;;  %v2049_v14 = vsel %vm2027_vm7, %v2016_v59, %v4200_v23  ;;  %v2066_v23 = vsel %vm2060_vm8, %v2033_v22, %v4237_v8  ;;  %v1837_v22 = vrot.slane %v4293_v37, 1 }
 0x104   : > { %1381 = vrot.lane.b32.xlu1 %v1350_v33, %s3179_s8  ;;  %v1728_v33 = vrot.slane %v1726_v45, 1  ;;  %v2082_v63 = vsel %vm2060_vm8, %v2049_v14, %v4228_v6  ;;  %v1733_v45 = vrot.slane %v1731_v53, 1  ;;  %v2099_v18 = vsel %vm2093_vm9, %v2066_v23, %v1740_v5  ;;  %v4628_v5 = vld [vmem:[#allocation5_spill] sm:$0xff] }
 0x105   : > { %1365 = vrot.lane.b32.xlu0 %v1326_v35, %s3179_s8  ;;  %v2648_v35 = vld [vmem:[%s3265_s30 + $0xc0] sm:$0xe]  ;;  %v1637_v30 = vrot.slane %v1635_v46, 1  ;;  %s2432_s8 = sshll.u32 %s4491_s6, 4  ;;  %s4560_s8 = int_to_ptr.vmem [resolvable:$true] %s2432_s8 }
 0x106   : > { %v4299_v58 = vpop.permute.xlu1 %1757  ;;  %v1729_v24 = vor.u32 %v1728_v33, %v1724_v15  ;;  %v2792_v6 = vcombine.low %v2648_v35, %v4226_v0  ;;  %v1903_v0 = vsel %vm1895_vm3, %v4628_v5, %v4097_v56  ;;  %v1952_v15 = vsel %vm1928_vm4, %v1919_v52, %v4119_v32  ;;  %v2649_v32 = vld [vmem:[%s3265_s30 + $0xcc] sm:$0xe]  ;;  %s3097_s18 = scalar_lea.vmem %s4560_s8, 4096  ;;  %p3104_p1 = scmp.lt.s32.totalorder %s4560_s8, %s3102_s21 }
 0x107   : > { %v4307_v31 = vpop.permute.xlu0 %1741  ;;  %v1633_v56 = vor.u32 %v1632_v7, %v1628_v28  ;;  %v2793_v33 = vcombine.low %v2649_v32, %v4243_v36  ;;  %p3098_p12 = scmp.ne.s32.totalorder %s4560_s8, %s3097_s18  ;;  %p3105_p2 = scmp.lt.s32.totalorder %s3103_s23, %s3097_s18 }
 0x108   : > { %1491 = vrot.lane.b32.xlu1 %v2760_v29, %s3180_s9  ;;  %v2115_v29 = vsel %vm2093_vm9, %v2082_v63, %v1756_v55  ;;  %v1722_v55 = vsel %vm517_vm1, %v1717_v16, %v1721_v38  ;;  %v1985_v38 = vsel %vm1961_vm5, %v1952_v15, %v4152_v39  ;;  %v1857_v13 = vrot.slane %v2792_v6, 1 }
 0x109   : > { %1475 = vrot.lane.b32.xlu0 %v2752_v48, %s3180_s9  ;;  %v2640_v48 = vld [vmem:[%s3265_s30 + $0x60] sm:$0xe]  ;;  %v2018_v53 = vsel %vm1994_vm6, %v1985_v38, %v4190_v61  ;;  %v4629_v38 = vld [vmem:[#allocation6_spill] sm:$0xff]  ;;  %p3099_p13 = pnand %p3098_p12, %p3245_p4  ;;  %p3106_p3 = por %p3105_p2, %p3104_p1 }
 0x10a   : > { %v1884_v1 = vpop.permute.xlu1 %1883  ;;  %v2784_v50 = vcombine.low %v2640_v48, %v4235_v41  ;;  %v2051_v59 = vsel %vm2027_vm7, %v2018_v53, %v4211_v47  ;;  %v1858_v41 = vrot.slane %v4250_v60, 1 }
 0x10b   : > { %v2148_v21 = vsel %vm2126_vm10, %v2115_v29, %v1884_v1  ;;  %v1868_v27 = vpop.permute.xlu0 %1867  ;;  %v2084_v3 = vsel %vm2060_vm8, %v2051_v59, %v4252_v51  ;;  %p3100_p0 = pneg %p3099_p13 }
 0x10c   : > { %v2132_v8 = vsel %vm2126_vm10, %v2099_v18, %v1868_v27  ;;  %1493 = vrot.lane.b32.xlu1 %v4260_v26, %s3180_s9  ;;  %2865 = vmatprep.mubr.msk.bf16.mxu1 %vm2186_vm11, %v2148_v21  ;;  %v1936_v26 = vsel %vm1928_vm4, %v1903_v0, %v4124_v9  ;;  %v1734_v9 = vsel %vm517_vm1, %v1729_v24, %v1733_v45  ;;  %v1833_v14 = vrot.slane %v2784_v50, 1  ;;  %v4630_v50 = vld [vmem:[#allocation7_spill] sm:$0xff] }
 0x10d   : > { %1477 = vrot.lane.b32.xlu0 %v4274_v34, %s3180_s9  ;;  %2849 = vmatprep.mubr.msk.bf16.mxu0 %vm2186_vm11, %v2132_v8  ;;  %v1969_v34 = vsel %vm1961_vm5, %v1936_v26, %v4161_v57  ;;  %v1834_v57 = vrot.slane %v4266_v10, 1  ;;  %v2117_v60 = vsel %vm2093_vm9, %v2084_v3, %v4299_v58  ;;  %v1638_v10 = vsel %vm517_vm1, %v1633_v56, %v1637_v30  ;;  %p3107_p5 = pnand %p3106_p3, %p3100_p0 }
 0x10e   : > { %v4350_v62 = vpop.permute.xlu1 %734  ;;  %v2002_v39 = vsel %vm1994_vm6, %v1969_v34, %v4195_v42  ;;  %v2785_v42 = vcombine.low %v2641_v19, %v4263_v11  ;;  %v1860_v11 = vrot.slane %v2793_v33, 1  ;;  %v1861_v58 = vrot.slane %v4277_v4, 1 }
 0x10f   : > { %v4359_v20 = vpop.permute.xlu0 %718  ;;  %v2035_v61 = vsel %vm2027_vm7, %v2002_v39, %v4216_v43  ;;  %v1921_v56 = vsel %vm1895_vm3, %v4629_v38, %v4350_v62 }
 0x110   : > { %1763 = vrot.lane.b32.xlu1 %v1722_v55, %s3181_s10  ;;  %v2068_v47 = vsel %vm2060_vm8, %v2035_v61, %v4257_v54  ;;  %v1859_v54 = vsel %vm790_vm0, %v1857_v13, %v1858_v41  ;;  %v1836_v35 = vrot.slane %v2785_v42, 1  ;;  %v1862_v17 = vsel %vm790_vm0, %v1860_v11, %v1861_v58 }
 0x111   : > { %1747 = vrot.lane.b32.xlu0 %v1626_v25, %s3181_s10  ;;  %v2101_v43 = vsel %vm2093_vm9, %v2068_v47, %v4307_v31  ;;  %v1835_v31 = vsel %vm790_vm0, %v1833_v14, %v1834_v57  ;;  %v1905_v32 = vsel %vm1895_vm3, %v4630_v50, %v4359_v20 }
 0x112   : > { %v1886_v2 = vpop.permute.xlu1 %1885  ;;  %v1838_v23 = vsel %vm790_vm0, %v1836_v35, %v1837_v22 }
 0x113   : > { %v2150_v51 = vsel %vm2126_vm10, %v2117_v60, %v1886_v2  ;;  %v1870_v16 = vpop.permute.xlu0 %1869  ;;  %v4631_v2 = vld [vmem:[#allocation8_spill] sm:$0xff] }
 0x114   : > { %v2134_v36 = vsel %vm2126_vm10, %v2101_v43, %v1870_v16  ;;  %1765 = vrot.lane.b32.xlu1 %v1734_v9, %s3181_s10  ;;  %2866 = vmatmul.mubr.msk.bf16.gmra.mxu1 %vm2186_vm11, %v2150_v51  ;;  %v4632_v43 = vld [vmem:[#allocation9_spill] sm:$0xff] }
 0x115   : > { %1749 = vrot.lane.b32.xlu0 %v1638_v10, %s3181_s10  ;;  %2850 = vmatmul.mubr.msk.bf16.gmra.mxu0 %vm2186_vm11, %v2134_v36 }
 0x116   : > { %v737_v28 = vpop.permute.xlu1 %736 }
 0x117   : > { %v721_v63 = vpop.permute.xlu0 %720  ;;  %v1923_v10 = vsel %vm1895_vm3, %v4631_v2, %v737_v28 }
 0x118   : > { %1891 = vrot.lane.b32.xlu1 %v1859_v54, %s3182_s11  ;;  %v1907_v51 = vsel %vm1895_vm3, %v4632_v43, %v721_v63 }
 0x119   : > { %1875 = vrot.lane.b32.xlu0 %v1835_v31, %s3182_s11 }
 0x11a   : > { %v864_v46 = vpop.permute.xlu1 %863 }
 0x11b   : > { %v848_v29 = vpop.permute.xlu0 %847  ;;  %v1954_v19 = vsel %vm1928_vm4, %v1921_v56, %v864_v46 }
 0x11c   : > { %1893 = vrot.lane.b32.xlu1 %v1862_v17, %s3182_s11  ;;  %v1938_v34 = vsel %vm1928_vm4, %v1905_v32, %v848_v29 }
 0x11d   : > { %1877 = vrot.lane.b32.xlu0 %v1838_v23, %s3182_s11  ;;  %s4566_s11 = scalar_lea.sflag [#allocation3], %s175_s28 }
 0x11e   : > { %v866_v4 = vpop.permute.xlu1 %865 }
 0x11f   : > { %v850_v1 = vpop.permute.xlu0 %849  ;;  %v1956_v16 = vsel %vm1928_vm4, %v1923_v10, %v866_v4 }
 0x120   : > { %v1940_v36 = vsel %vm1928_vm4, %v1907_v51, %v850_v1 }
 0x122   : > { %v976_v45 = vpop.permute.xlu1 %975 }
 0x123   : > { %v960_v7 = vpop.permute.xlu0 %959  ;;  %v1987_v53 = vsel %vm1961_vm5, %v1954_v19, %v976_v45 }
 0x124   : > { %v1971_v13 = vsel %vm1961_vm5, %v1938_v34, %v960_v7 }
 0x126   : > { %v978_v37 = vpop.permute.xlu1 %977 }
 0x127   : > { %v962_v18 = vpop.permute.xlu0 %961  ;;  %v1989_v54 = vsel %vm1961_vm5, %v1956_v16, %v978_v37 }
 0x128   : > { %v1973_v58 = vsel %vm1961_vm5, %v1940_v36, %v962_v18 }
 0x12a   : > { %v1248_v21 = vpop.permute.xlu1 %1247 }
 0x12b   : > { %v1232_v27 = vpop.permute.xlu0 %1231  ;;  %v2020_v39 = vsel %vm1994_vm6, %v1987_v53, %v1248_v21 }
 0x12c   : > { %v2004_v41 = vsel %vm1994_vm6, %v1971_v13, %v1232_v27 }
 0x12e   : > { %v1250_v24 = vpop.permute.xlu1 %1249 }
 0x12f   : > { %v1234_v6 = vpop.permute.xlu0 %1233  ;;  %v2022_v28 = vsel %vm1994_vm6, %v1989_v54, %v1250_v24 }
 0x130   : > { %v2006_v35 = vsel %vm1994_vm6, %v1973_v58, %v1234_v6 }
 0x132   : > { %v1376_v48 = vpop.permute.xlu1 %1375 }
 0x133   : > { %v1360_v52 = vpop.permute.xlu0 %1359  ;;  %v2053_v62 = vsel %vm2027_vm7, %v2020_v39, %v1376_v48 }
 0x134   : > { %v2037_v57 = vsel %vm2027_vm7, %v2004_v41, %v1360_v52 }
 0x136   : > { %v1378_v8 = vpop.permute.xlu1 %1377 }
 0x137   : > { %v1362_v55 = vpop.permute.xlu0 %1361  ;;  %v2055_v22 = vsel %vm2027_vm7, %v2022_v28, %v1378_v8 }
 0x138   : > { %v2039_v63 = vsel %vm2027_vm7, %v2006_v35, %v1362_v55 }
 0x13a   : > { %v1488_v5 = vpop.permute.xlu1 %1487 }
 0x13b   : > { %v1472_v0 = vpop.permute.xlu0 %1471  ;;  %v2086_v20 = vsel %vm2060_vm8, %v2053_v62, %v1488_v5 }
 0x13c   : > { %v2070_v61 = vsel %vm2060_vm8, %v2037_v57, %v1472_v0 }
 0x13e   : > { %v1490_v15 = vpop.permute.xlu1 %1489 }
 0x13f   : > { %v1474_v25 = vpop.permute.xlu0 %1473  ;;  %v2088_v17 = vsel %vm2060_vm8, %v2055_v22, %v1490_v15 }
 0x140   : > { %v2072_v46 = vsel %vm2060_vm8, %v2039_v63, %v1474_v25 }
 0x142   : > { %v1760_v30 = vpop.permute.xlu1 %1759 }
 0x143   : > { %v1744_v26 = vpop.permute.xlu0 %1743  ;;  %v2119_v3 = vsel %vm2093_vm9, %v2086_v20, %v1760_v30 }
 0x144   : > { %v2103_v42 = vsel %vm2093_vm9, %v2070_v61, %v1744_v26 }
 0x146   : > { %v1762_v9 = vpop.permute.xlu1 %1761 }
 0x147   : > { %v1746_v59 = vpop.permute.xlu0 %1745  ;;  %v2121_v23 = vsel %vm2093_vm9, %v2088_v17, %v1762_v9 }
 0x148   : > { %v2105_v4 = vsel %vm2093_vm9, %v2072_v46, %v1746_v59 }
 0x14a   : > { %v1888_v33 = vpop.permute.xlu1 %1887 }
 0x14b   : > { %v2152_v47 = vsel %vm2126_vm10, %v2119_v3, %v1888_v33  ;;  %v1872_v60 = vpop.permute.xlu0 %1871 }
 0x14c   : > { %v2136_v14 = vsel %vm2126_vm10, %v2103_v42, %v1872_v60  ;;  %2869 = vmatprep.mubr.msk.bf16.mxu1 %vm2186_vm11, %v2152_v47 }
 0x14d   : > { %2853 = vmatprep.mubr.msk.bf16.mxu0 %vm2186_vm11, %v2136_v14 }
 0x14e   : > { %v739_v11 = vpop.permute.xlu1 %738 }
 0x14f   : > { %v723_v31 = vpop.permute.xlu0 %722  ;;  %v1925_v13 = vsel %vm1895_vm3, %v3984_v49, %v739_v11 }
 0x150   : > { %v1909_v39 = vsel %vm1895_vm3, %v3999_v12, %v723_v31 }
 0x152   : > { %v1890_v29 = vpop.permute.xlu1 %1889 }
 0x153   : > { %v2154_v1 = vsel %vm2126_vm10, %v2121_v23, %v1890_v29  ;;  %v1874_v45 = vpop.permute.xlu0 %1873 }
 0x154   : > { %v2138_v7 = vsel %vm2126_vm10, %v2105_v4, %v1874_v45  ;;  %2870 = vmatmul.mubr.msk.bf16.gmra.mxu1 %vm2186_vm11, %v2154_v1  ;;  %v4487_v45 = vld [vmem:[%s4614_s2] ss:$0 sm:$0xff] }
 0x155   : > { %2854 = vmatmul.mubr.msk.bf16.gmra.mxu0 %vm2186_vm11, %v2138_v7 }
 0x156   : > { %v741_v37 = vpop.permute.xlu1 %740 }
 0x157   : > { %v725_v18 = vpop.permute.xlu0 %724  ;;  %v1927_v33 = vsel %vm1895_vm3, %v4065_v44, %v741_v37 }
 0x158   : > { %v1911_v12 = vsel %vm1895_vm3, %v4072_v40, %v725_v18 }
 0x15a   : > { %v868_v21 = vpop.permute.xlu1 %867 }
 0x15b   : > { %v852_v27 = vpop.permute.xlu0 %851  ;;  %v1958_v59 = vsel %vm1928_vm4, %v1925_v13, %v868_v21 }
 0x15c   : > { %v1942_v41 = vsel %vm1928_vm4, %v1909_v39, %v852_v27 }
 0x15e   : > { %v870_v24 = vpop.permute.xlu1 %869 }
 0x15f   : > { %v854_v6 = vpop.permute.xlu0 %853  ;;  %v1960_v47 = vsel %vm1928_vm4, %v1927_v33, %v870_v24 }
 0x160   : > { %v1944_v10 = vsel %vm1928_vm4, %v1911_v12, %v854_v6 }
 0x162   : > { %v980_v48 = vpop.permute.xlu1 %979 }
 0x163   : > { %v964_v52 = vpop.permute.xlu0 %963  ;;  %v1991_v62 = vsel %vm1961_vm5, %v1958_v59, %v980_v48 }
 0x164   : > { %v1975_v20 = vsel %vm1961_vm5, %v1942_v41, %v964_v52 }
 0x166   : > { %v982_v8 = vpop.permute.xlu1 %981 }
 0x167   : > { %v966_v55 = vpop.permute.xlu0 %965  ;;  %v1993_v14 = vsel %vm1961_vm5, %v1960_v47, %v982_v8 }
 0x168   : > { %v1977_v16 = vsel %vm1961_vm5, %v1944_v10, %v966_v55 }
 0x16a   : > { %v1252_v5 = vpop.permute.xlu1 %1251 }
 0x16b   : > { %v1236_v0 = vpop.permute.xlu0 %1235  ;;  %v2024_v61 = vsel %vm1994_vm6, %v1991_v62, %v1252_v5 }
 0x16c   : > { %v2008_v49 = vsel %vm1994_vm6, %v1975_v20, %v1236_v0 }
 0x16e   : > { %v1254_v15 = vpop.permute.xlu1 %1253 }
 0x16f   : > { %v1238_v25 = vpop.permute.xlu0 %1237  ;;  %v2026_v40 = vsel %vm1994_vm6, %v1993_v14, %v1254_v15 }
 0x170   : > { %v2010_v58 = vsel %vm1994_vm6, %v1977_v16, %v1238_v25 }
 0x172   : > { %v1380_v30 = vpop.permute.xlu1 %1379 }
 0x173   : > { %v1364_v26 = vpop.permute.xlu0 %1363  ;;  %v2057_v42 = vsel %vm2027_vm7, %v2024_v61, %v1380_v30 }
 0x174   : > { %v2041_v60 = vsel %vm2027_vm7, %v2008_v49, %v1364_v26 }
 0x176   : > { %v1382_v38 = vpop.permute.xlu1 %1381 }
 0x177   : > { %v1366_v56 = vpop.permute.xlu0 %1365  ;;  %v2059_v28 = vsel %vm2027_vm7, %v2026_v40, %v1382_v38 }
 0x178   : > { %v2043_v35 = vsel %vm2027_vm7, %v2010_v58, %v1366_v56 }
 0x17a   : > { %v1492_v50 = vpop.permute.xlu1 %1491 }
 0x17b   : > { %v1476_v32 = vpop.permute.xlu0 %1475  ;;  %v2090_v2 = vsel %vm2060_vm8, %v2057_v42, %v1492_v50 }
 0x17c   : > { %v2074_v43 = vsel %vm2060_vm8, %v2041_v60, %v1476_v32 }
 0x17e   : > { %v1494_v19 = vpop.permute.xlu1 %1493 }
 0x17f   : > { %v1478_v34 = vpop.permute.xlu0 %1477  ;;  %v2092_v22 = vsel %vm2060_vm8, %v2059_v28, %v1494_v19 }
 0x180   : > { %v2076_v63 = vsel %vm2060_vm8, %v2043_v35, %v1478_v34 }
 0x182   : > { %v1764_v53 = vpop.permute.xlu1 %1763 }
 0x183   : > { %v1748_v9 = vpop.permute.xlu0 %1747  ;;  %v2123_v44 = vsel %vm2093_vm9, %v2090_v2, %v1764_v53 }
 0x184   : > { %v2107_v36 = vsel %vm2093_vm9, %v2074_v43, %v1748_v9 }
 0x186   : > { %v1766_v57 = vpop.permute.xlu1 %1765 }
 0x187   : > { %v1750_v3 = vpop.permute.xlu0 %1749  ;;  %v2125_v17 = vsel %vm2093_vm9, %v2092_v22, %v1766_v57 }
 0x188   : > { %v2109_v23 = vsel %vm2093_vm9, %v2076_v63, %v1750_v3 }
 0x18a   : > { %v1892_v51 = vpop.permute.xlu1 %1891 }
 0x18b   : > { %v2156_v54 = vsel %vm2126_vm10, %v2123_v44, %v1892_v51  ;;  %v1876_v11 = vpop.permute.xlu0 %1875 }
 0x18c   : > { %v2140_v31 = vsel %vm2126_vm10, %v2107_v36, %v1876_v11  ;;  %2873 = vmatprep.mubr.msk.bf16.mxu1 %vm2186_vm11, %v2156_v54 }
 0x18d   : > { %2857 = vmatprep.mubr.msk.bf16.mxu0 %vm2186_vm11, %v2140_v31 }
 0x18e   : > { %v1894_v46 = vpop.permute.xlu1 %1893 }
 0x18f   : > { %v2158_v29 = vsel %vm2126_vm10, %v2125_v17, %v1894_v46  ;;  %v1878_v4 = vpop.permute.xlu0 %1877 }
 0x190   : > { %v2142_v1 = vsel %vm2126_vm10, %v2109_v23, %v1878_v4  ;;  %2874 = vmatmul.mubr.msk.bf16.gmra.mxu1 %vm2186_vm11, %v2158_v29 }
 0x191   : > { %2858 = vmatmul.mubr.msk.bf16.gmra.mxu0 %vm2186_vm11, %v2142_v1 }
 0x194   : > { %v2863_v7 = vpop.f32.mrf.mxu1 }
 0x195   : > { %v2847_v37 = vpop.f32.mrf.mxu0  ;;  %v2330_v18 = vadd.f32 %v2863_v7, %v4487_v45 }
 0x196   : > { %v2266_v21 = vadd.f32 %v2847_v37, %v4487_v45  ;;  %v2321_v27 = vpop.f32.mrf.mxu1 }
 0x197   : > { %2402 = vst [vmem:[%s4491_s6 + $0x90] sm:$0xff] %v2330_v18  ;;  %v2257_v24 = vpop.f32.mrf.mxu0  ;;  %v2322_v6 = vadd.f32 %v4487_v45, %v2321_v27 }
 0x198   : > { %2386 = vst [vmem:[%s4491_s6 + $0x10] sm:$0xff] %v2266_v21  ;;  %v2258_v48 = vadd.f32 %v4487_v45, %v2257_v24  ;;  %v2864_v52 = vpop.f32.mrf.mxu1 }
 0x199   : > { %2400 = vst [vmem:[%s4491_s6 + $0x80] sm:$0xff] %v2322_v6  ;;  %v2848_v8 = vpop.f32.mrf.mxu0  ;;  %v2333_v55 = vadd.f32 %v2864_v52, %v4487_v45 }
 0x19a   : > { %2384 = vst [vmem:[%s4491_s6] sm:$0xff] %v2258_v48  ;;  %v2269_v5 = vadd.f32 %v2848_v8, %v4487_v45  ;;  %v2324_v0 = vpop.f32.mrf.mxu1 }
 0x19b   : > { %2403 = vst [vmem:[%s4491_s6 + $0x98] sm:$0xff] %v2333_v55  ;;  %v2260_v15 = vpop.f32.mrf.mxu0  ;;  %v2325_v25 = vadd.f32 %v4487_v45, %v2324_v0 }
 0x19c   : > { %2387 = vst [vmem:[%s4491_s6 + $0x18] sm:$0xff] %v2269_v5  ;;  %v2261_v30 = vadd.f32 %v4487_v45, %v2260_v15 }
 0x19d   : > { %2401 = vst [vmem:[%s4491_s6 + $0x88] sm:$0xff] %v2325_v25 }
 0x19e   : > { %2385 = vst [vmem:[%s4491_s6 + $0x8] sm:$0xff] %v2261_v30 }
 0x1d4   : > { %v2867_v26 = vpop.f32.mrf.mxu1 }
 0x1d5   : > { %v2851_v38 = vpop.f32.mrf.mxu0  ;;  %v2346_v56 = vadd.f32 %v2867_v26, %v4487_v45 }
 0x1d6   : > { %v2282_v50 = vadd.f32 %v2851_v38, %v4487_v45  ;;  %v2337_v32 = vpop.f32.mrf.mxu1 }
 0x1d7   : > { %2406 = vst [vmem:[%s4491_s6 + $0xb0] sm:$0xff] %v2346_v56  ;;  %v2273_v19 = vpop.f32.mrf.mxu0  ;;  %v2338_v34 = vadd.f32 %v4487_v45, %v2337_v32 }
 0x1d8   : > { %2390 = vst [vmem:[%s4491_s6 + $0x30] sm:$0xff] %v2282_v50  ;;  %v2274_v53 = vadd.f32 %v4487_v45, %v2273_v19  ;;  %v2868_v9 = vpop.f32.mrf.mxu1 }
 0x1d9   : > { %2404 = vst [vmem:[%s4491_s6 + $0xa0] sm:$0xff] %v2338_v34  ;;  %v2852_v13 = vpop.f32.mrf.mxu0  ;;  %v2349_v39 = vadd.f32 %v2868_v9, %v4487_v45 }
 0x1da   : > { %2388 = vst [vmem:[%s4491_s6 + $0x20] sm:$0xff] %v2274_v53  ;;  %v2285_v59 = vadd.f32 %v2852_v13, %v4487_v45  ;;  %v2340_v41 = vpop.f32.mrf.mxu1 }
 0x1db   : > { %2407 = vst [vmem:[%s4491_s6 + $0xb8] sm:$0xff] %v2349_v39  ;;  %v2276_v62 = vpop.f32.mrf.mxu0  ;;  %v2341_v57 = vadd.f32 %v4487_v45, %v2340_v41 }
 0x1dc   : > { %2391 = vst [vmem:[%s4491_s6 + $0x38] sm:$0xff] %v2285_v59  ;;  %v2277_v20 = vadd.f32 %v4487_v45, %v2276_v62 }
 0x1dd   : > { %2405 = vst [vmem:[%s4491_s6 + $0xa8] sm:$0xff] %v2341_v57 }
 0x1de   : > { %2389 = vst [vmem:[%s4491_s6 + $0x28] sm:$0xff] %v2277_v20 }
 0x214   : > { %v2871_v61 = vpop.f32.mrf.mxu1 }
 0x215   : > { %v2855_v3 = vpop.f32.mrf.mxu0  ;;  %v2362_v33 = vadd.f32 %v2871_v61, %v4487_v45 }
 0x216   : > { %v2298_v49 = vadd.f32 %v2855_v3, %v4487_v45  ;;  %v2353_v42 = vpop.f32.mrf.mxu1 }
 0x217   : > { %2410 = vst [vmem:[%s4491_s6 + $0xd0] sm:$0xff] %v2362_v33  ;;  %v2289_v12 = vpop.f32.mrf.mxu0  ;;  %v2354_v47 = vadd.f32 %v4487_v45, %v2353_v42 }
 0x218   : > { %2394 = vst [vmem:[%s4491_s6 + $0x50] sm:$0xff] %v2298_v49  ;;  %v2290_v60 = vadd.f32 %v4487_v45, %v2289_v12  ;;  %v2872_v2 = vpop.f32.mrf.mxu1 }
 0x219   : > { %2408 = vst [vmem:[%s4491_s6 + $0xc0] sm:$0xff] %v2354_v47  ;;  %v2856_v10 = vpop.f32.mrf.mxu0  ;;  %v2365_v14 = vadd.f32 %v2872_v2, %v4487_v45 }
 0x21a   : > { %2392 = vst [vmem:[%s4491_s6 + $0x40] sm:$0xff] %v2290_v60  ;;  %v2301_v43 = vadd.f32 %v2856_v10, %v4487_v45  ;;  %v2356_v44 = vpop.f32.mrf.mxu1 }
 0x21b   : > { %2411 = vst [vmem:[%s4491_s6 + $0xd8] sm:$0xff] %v2365_v14  ;;  %v2292_v51 = vpop.f32.mrf.mxu0  ;;  %v2357_v16 = vadd.f32 %v4487_v45, %v2356_v44 }
 0x21c   : > { %2395 = vst [vmem:[%s4491_s6 + $0x58] sm:$0xff] %v2301_v43  ;;  %v2293_v40 = vadd.f32 %v4487_v45, %v2292_v51 }
 0x21d   : > { %2409 = vst [vmem:[%s4491_s6 + $0xc8] sm:$0xff] %v2357_v16 }
 0x21e   : > { %2393 = vst [vmem:[%s4491_s6 + $0x48] sm:$0xff] %v2293_v40 }
 0x250   : > { %v2875_v36 = vpop.f32.mrf.mxu1 }
 0x251   : > { %v2859_v54 = vpop.f32.mrf.mxu0  ;;  %v2378_v11 = vadd.f32 %v2875_v36, %v4487_v45 }
 0x252   : > { %v2314_v58 = vadd.f32 %v2859_v54, %v4487_v45  ;;  %v2369_v28 = vpop.f32.mrf.mxu1 }
 0x253   : > { %2414 = vst [vmem:[%s4491_s6 + $0xf0] sm:$0xff] %v2378_v11  ;;  %v2305_v31 = vpop.f32.mrf.mxu0  ;;  %v2370_v35 = vadd.f32 %v4487_v45, %v2369_v28 }
 0x254   : > { %2398 = vst [vmem:[%s4491_s6 + $0x70] sm:$0xff] %v2314_v58  ;;  %v2306_v22 = vadd.f32 %v4487_v45, %v2305_v31  ;;  %v2876_v63 = vpop.f32.mrf.mxu1 }
 0x255   : > { %2412 = vst [vmem:[%s4491_s6 + $0xe0] sm:$0xff] %v2370_v35  ;;  %v2860_v17 = vpop.f32.mrf.mxu0  ;;  %v2381_v46 = vadd.f32 %v2876_v63, %v4487_v45 }
 0x256   : > { %2396 = vst [vmem:[%s4491_s6 + $0x60] sm:$0xff] %v2306_v22  ;;  %v2317_v23 = vadd.f32 %v2860_v17, %v4487_v45  ;;  %v2372_v29 = vpop.f32.mrf.mxu1 }
 0x257   : > { %2415 = vst [vmem:[%s4491_s6 + $0xf8] sm:$0xff] %v2381_v46  ;;  %v2308_v4 = vpop.f32.mrf.mxu0  ;;  %v2373_v1 = vadd.f32 %v4487_v45, %v2372_v29 }
 0x258   : > { %2399 = vst [vmem:[%s4491_s6 + $0x78] sm:$0xff] %v2317_v23  ;;  %v2309_v7 = vadd.f32 %v4487_v45, %v2308_v4 }
 0x259   : > { %2413 = vst [vmem:[%s4491_s6 + $0xe8] sm:$0xff] %v2373_v1 }
 0x25a   : > { %2397 = vst [vmem:[%s4491_s6 + $0x68] sm:$0xff] %v2309_v7 }
 0x25b   : > { %3110 = shalt.err (!%p3107_p5)
}
 0x25c   : > { %s3111_s26 = scalar_lea.hbm %s4556_s15, 4096  ;;  %s3115_s29 = scalar_lea.hbm %s4615_s3, 8192 }
 0x25d   : > { %p3112_p6 = scmp.ne.s32.totalorder %s4556_s15, %s3111_s26  ;;  %p3116_p10 = scmp.lt.s32.totalorder %s4556_s15, %s4615_s3 }
 0x25e   : > { %p3117_p11 = scmp.lt.s32.totalorder %s3115_s29, %s3111_s26 }
 0x25f   : > { %p3113_p7 = pnand %p3112_p6, %p3245_p4 }
 0x260   : > { %p3118_p12 = por %p3117_p11, %p3116_p10 }
 0x261   : > { %p3114_p9 = pneg %p3113_p7 }
 0x263   : > { %p3119_p13 = pnand %p3118_p12, %p3114_p9 }
 0x265   : > { %3122 = shalt.err (!%p3119_p13)
}
 0x266   : > { %s3184_s6 = smov 128  }
 0x267   : > { %2886 = dma.vmem_to_hbm [thread:$0]  (%p3245_p4), %s4560_s8, 4096, %s4556_s15, %s4566_s11, %s3184_s6, %s3184_s6, %s3176_s5  }
 0x268 PF: > { %p2892_p0 = scmp.ge.s32.totalorder %s3173_s17, 2  ;;  %s2447_s7 = sand.u32 1, %s3153_s12  }
 0x269   : > { %s2448_s9 = scalar_lea.sflag [#allocation3], %s2447_s7 }
 0x26a   : > { %p2889_p1 = pnand %p2892_p0, %p3252_p8 }
 0x26c   : > { %p2890_p2 = pneg %p2889_p1 }
 0x26e   : > { %3148 = dma.done.wait (%p2890_p2), %s2448_s9, 4096  }
 0x26f   : > { %3150 = vsyncadd (%p2890_p2), %s2448_s9, 4294963200  ;;  %s16_s17 = sadd.s32 1, %s3173_s17   ;;  %s4633_s12 = smov %s3157_s13 }
 0x270   : > { %p13_p3 = scmp.ge.s32.totalorder %s16_s17, 4   ;;  %s4634_s13 = smov %s3161_s14 }
 0x271   : > { %s4635_s14 = smov %s3258_s25  ;;  %s4636_s15 = smov %s3169_s16 }
 0x272   : > { %s4637_s16 = smov %s4639_s20  ;;  %15 = sbr.rel (!%p13_p3) target bundleno = 4 (0x4), region = 70 }
 0x277   :  { %2453 = vsyncpa [#allocation3], 1 }
 0x278   :  { %2455 = vsyncpa [#allocation3 + $0x1], 1 }

</bundles_post_ra>
